<compile_context>
chip_gen: v7x
topology: tpu7x:2x2x1
jax: 0.10.0
libtpu: 0.0.40
codegen_flags: <defaults>
</compile_context>

<pallas_src>
import jax
import jax.numpy as jnp
import numpy as np
from jax.experimental import pallas as pl
from jax.experimental.pallas import tpu as pltpu

T_SLICES = 7
CHANNELS = 112          # real channel count (Conv2d(112, 112, 1))
C_PAD = 128             # conv output lanes padded to a full 128-lane vreg width


def _tile_and_vmem_budget():
    """Generation-dependent spatial tile / VMEM limit.

    v5e / v6e have 128 MiB physical VMEM and are HBM-bound -> larger tiles
    amortize per-step pipeline overhead; v7x has 64 MiB -> keep 1024 / 40 MiB.
    """
    try:
        vmem_cap = pltpu.get_tpu_info().vmem_capacity_bytes
    except Exception:  # info unavailable -> conservative (v7x-safe) defaults
        vmem_cap = 64 * 1024 * 1024
    if vmem_cap >= 128 * 1024 * 1024:          # v5e / v6e
        return 2048, 96 * 1024 * 1024
    return 1024, 40 * 1024 * 1024              # v7x (64 MiB VMEM) / unknown


def _pick_hw_tile(hw, max_tile):
    """Largest legal spatial tile: full extent if it fits, otherwise a
    multiple of 8 that divides HW and is <= max_tile.  Hard-fails rather than
    silently returning a VMEM-busting full-extent tile."""
    if hw <= max_tile:
        return hw                              # full-dim block is always legal
    start = max_tile - (max_tile % 8)
    for cand in range(start, 7, -8):
        if hw % cand == 0:
            return cand
    raise ValueError(
        f"H*W={hw} has no tile that is a multiple of 8, divides H*W and is "
        f"<= {max_tile}; pad the spatial extent before calling this kernel.")


def _siamese_kernel(x_ref, wt_ref, b_ref, o_ref, p_ref):
    # x_ref : (1, T, HW_TILE, C)   f32/bf16  raw channels-last input tile
    # wt_ref: (C, C_PAD)           bf16      conv weight, pre-transposed, N zero-padded
    # b_ref : (1, C_PAD)           f32       conv bias (zero-padded lanes)
    # o_ref : (1, HW_TILE, C)      f32       softmax-weighted-sum output tile
    # p_ref : (1, 1, 1, C_PAD)     f32       per-(batch, hw-tile) pooled partial sum
    wt = wt_ref[...]
    bias = b_ref[...]

    # 1x1 conv over channels == per-pixel matmul (MXU).  The T=7 slices are
    # statically unrolled: no (T, HW, C) -> (T*HW, C) relayout is needed, and
    # the bf16 cast happens per-slice right before the dot (no host pre-pass).
    ys = []
    for t in range(T_SLICES):
        xt = x_ref[0, t].astype(wt.dtype)                        # (HW_TILE, C)
        yt = jnp.dot(xt, wt, preferred_element_type=jnp.float32)
        ys.append(yt + bias)                                     # (HW_TILE, C_PAD) f32

    # Fused softmax-weighted sum over the slice axis (torch dim=1):
    #   out = sum_t(y_t * e_t) / sum_t(e_t),  e_t = exp(y_t - max_t y)
    m = ys[0]
    for yt in ys[1:]:
        m = jnp.maximum(m, yt)
    den = jnp.zeros_like(m)
    num = jnp.zeros_like(m)
    for yt in ys:
        e = jnp.exp(yt - m)
        den = den + e
        num = num + yt * e
    inv = pl.reciprocal(den, approx=True)   # EUP slot -> effectively free
    out = num * inv                         # (HW_TILE, C_PAD); padded lanes exactly 0

    # Store exactly 112 real channels (masked vst; avoids a wrapper slice pass).
    o_ref[0] = out[:, :CHANNELS].astype(o_ref.dtype)

    # Per-tile pooled partial sums: no cross-step accumulation, so both grid
    # axes stay megacore-parallel.  Padded lanes contribute exact zeros.
    p_ref[...] = jnp.sum(out, axis=0, keepdims=True)[None, None]


def siamese_forward(x, conv_w, conv_b):
    """x: (B, 7, H, W, 112) channels-last; conv_w: (112, 112); conv_b: (112,)."""
    B, T, H, W, C = x.shape
    assert T == T_SLICES and C == CHANNELS
    HW = H * W
    max_tile, vmem_limit = _tile_and_vmem_budget()
    HW_TILE = _pick_hw_tile(HW, max_tile)
    n_hw = HW // HW_TILE

    # Channels-last flatten only -- a free reshape, no pad / cast pre-pass.
    x_r = x.reshape(B, T, HW, C)

    # Pre-transposed conv weight, output lanes zero-padded 112 -> 128 (bf16
    # MXU operand); bias zero-padded to match so padded lanes stay exact 0.
    w_t = jnp.zeros((C, C_PAD), jnp.bfloat16).at[:, :C].set(
        conv_w.T.astype(jnp.bfloat16))
    bias = jnp.zeros((1, C_PAD), jnp.float32).at[0, :C].set(
        conv_b.astype(jnp.float32))

    out, pool_part = pl.pallas_call(
        _siamese_kernel,
        out_shape=(
            jax.ShapeDtypeStruct((B, HW, C), jnp.float32),
            jax.ShapeDtypeStruct((B, n_hw, 1, C_PAD), jnp.float32),
        ),
        grid_spec=pltpu.PrefetchScalarGridSpec(
            num_scalar_prefetch=0,
            grid=(B, n_hw),
            in_specs=[
                pl.BlockSpec((1, T, HW_TILE, C), lambda b, h: (b, 0, h, 0)),
                pl.BlockSpec((C, C_PAD), lambda b, h: (0, 0)),
                pl.BlockSpec((1, C_PAD), lambda b, h: (0, 0)),
            ],
            out_specs=(
                pl.BlockSpec((1, HW_TILE, C), lambda b, h: (b, h, 0)),
                pl.BlockSpec((1, 1, 1, C_PAD), lambda b, h: (b, h, 0, 0)),
            ),
        ),
        compiler_params=pltpu.CompilerParams(
            # No revisited output blocks -> both grid axes can shard across
            # TensorCores (uses both cores on v7x even for B=1 / odd B).
            dimension_semantics=("parallel", "parallel"),
            vmem_limit_bytes=vmem_limit,
        ),
    )(x_r, w_t, bias)

    # Kernel output already has exactly 112 channels; reshape is free.
    out_pre = out.reshape(B, H, W, C)

    # TODO(synk): base_model is an injected submodule with unknown architecture;
    # use identity as a deterministic stand-in (base_out = out_pre[:, None]).
    base_out = out_pre[:, None]                       # (B, 1, H, W, C)

    # F.avg_pool3d over the full (H, W, C) extent, then .view(B, -1).
    # Padded lanes of the pooled partials are exact zeros, so summing 128
    # lanes == 112 lanes; divide by the real element count H*W*112.
    out_glb_avg_pool = (jnp.sum(pool_part, axis=(1, 2, 3)) / (HW * C)).reshape(B, -1)
    return base_out, out_glb_avg_pool


def _reference_forward(x, conv_w, conv_b):
    """Plain-JAX reference mirroring the PyTorch forward semantics, with the
    same matmul dtype policy as the kernel (bf16 operands, f32 accumulation)."""
    dt = jnp.bfloat16
    y = jnp.einsum(
        "bthwi,oi->bthwo", x.astype(dt), conv_w.astype(dt),
        preferred_element_type=jnp.float32,
    ) + conv_b.astype(jnp.float32)
    s = jax.nn.softmax(y, axis=1)          # softmax over the 7 slices
    out = jnp.sum(y * s, axis=1)           # (B, H, W, C)
    base_out = out[:, None]
    pool = jnp.mean(base_out, axis=(2, 3, 4)).reshape(x.shape[0], -1)
    return base_out, pool


if __name__ == "__main__":
    B, T, H, W, C = 2, T_SLICES, 16, 16, CHANNELS

    key = jax.random.PRNGKey(0)
    kx, kw, kb = jax.random.split(key, 3)
    x = jax.random.normal(kx, (B, T, H, W, C), dtype=jnp.float32)

    # Deterministic Conv2d(112, 112, 1) parameters (PyTorch-style uniform init).
    bound = 1.0 / np.sqrt(C)
    conv_w = jax.random.uniform(kw, (C, C), jnp.float32, -bound, bound)
    conv_b = jax.random.uniform(kb, (C,), jnp.float32, -bound, bound)

    base_out, glb_pool = jax.jit(siamese_forward)(x, conv_w, conv_b)
    jax.block_until_ready(base_out)

    ref_out, ref_pool = _reference_forward(x, conv_w, conv_b)
    np.testing.assert_allclose(np.asarray(base_out), np.asarray(ref_out),
                               rtol=2e-3, atol=2e-3)
    np.testing.assert_allclose(np.asarray(glb_pool), np.asarray(ref_pool),
                               rtol=2e-3, atol=2e-3)

    print("KERNEL_OK")
</pallas_src>

<mosaic_0001>
module attributes {stable_mosaic.version = 11 : i64} {
  func.func @_siamese_kernel(%arg0: i32, %arg1: i32, %arg2: memref<1x7x256x112xf32, #tpu.memory_space<vmem>>, %arg3: memref<112x128xbf16, #tpu.memory_space<vmem>>, %arg4: memref<1x128xf32, #tpu.memory_space<vmem>>, %arg5: memref<1x256x112xf32, #tpu.memory_space<vmem>>, %arg6: memref<1x1x1x128xf32, #tpu.memory_space<vmem>>) attributes {dimension_semantics = [#tpu.dimension_semantics<parallel>, #tpu.dimension_semantics<parallel>], iteration_bounds = array<i64: 2, 1>, scalar_prefetch = 0 : i64, scratch_operands = 0 : i64, tpu.core_type = #tpu.core_type<tc>, window_params = [{transform_indices = @transform_0, window_bounds = array<i64: 1, 7, 256, 112>}, {pipeline_mode = #tpu.pipeline_mode<synchronous>, transform_indices = @transform_1, window_bounds = array<i64: 112, 128>}, {pipeline_mode = #tpu.pipeline_mode<synchronous>, transform_indices = @transform_2, window_bounds = array<i64: 1, 128>}, {transform_indices = @transform_3, window_bounds = array<i64: 1, 256, 112>}, {transform_indices = @transform_4, window_bounds = array<i64: 1, 1, 1, 128>}]} {
    %c0 = arith.constant 0 : index
    %c0_0 = arith.constant 0 : index
    %0 = vector.load %arg3[%c0, %c0_0] : memref<112x128xbf16, #tpu.memory_space<vmem>>, vector<112x128xbf16>
    %c0_1 = arith.constant 0 : index
    %c0_2 = arith.constant 0 : index
    %1 = vector.load %arg4[%c0_1, %c0_2] : memref<1x128xf32, #tpu.memory_space<vmem>>, vector<1x128xf32>
    %c0_3 = arith.constant 0 : index
    %c0_4 = arith.constant 0 : index
    %c0_5 = arith.constant 0 : index
    %c0_6 = arith.constant 0 : index
    %2 = vector.load %arg2[%c0_3, %c0_4, %c0_5, %c0_6] : memref<1x7x256x112xf32, #tpu.memory_space<vmem>>, vector<1x1x256x112xf32>
    %3 = vector.shape_cast %2 : vector<1x1x256x112xf32> to vector<256x112xf32>
    %4 = arith.truncf %3 : vector<256x112xf32> to vector<256x112xbf16>
    %cst = arith.constant dense<0.000000e+00> : vector<256x128xf32>
    %5 = tpu.matmul %4, %0, %cst {dimension_numbers = #tpu.dot_dimension_numbers<[1], [0], [0], [1], [0, 0, 1, 1], [], []>} : vector<256x112xbf16>, vector<112x128xbf16>, vector<256x128xf32> -> vector<256x128xf32>
    %6 = vector.broadcast %1 : vector<1x128xf32> to vector<256x128xf32>
    %7 = arith.addf %5, %6 : vector<256x128xf32>
    %c0_7 = arith.constant 0 : index
    %c1 = arith.constant 1 : index
    %c0_8 = arith.constant 0 : index
    %c0_9 = arith.constant 0 : index
    %8 = vector.load %arg2[%c0_7, %c1, %c0_8, %c0_9] : memref<1x7x256x112xf32, #tpu.memory_space<vmem>>, vector<1x1x256x112xf32>
    %9 = vector.shape_cast %8 : vector<1x1x256x112xf32> to vector<256x112xf32>
    %10 = arith.truncf %9 : vector<256x112xf32> to vector<256x112xbf16>
    %cst_10 = arith.constant dense<0.000000e+00> : vector<256x128xf32>
    %11 = tpu.matmul %10, %0, %cst_10 {dimension_numbers = #tpu.dot_dimension_numbers<[1], [0], [0], [1], [0, 0, 1, 1], [], []>} : vector<256x112xbf16>, vector<112x128xbf16>, vector<256x128xf32> -> vector<256x128xf32>
    %12 = vector.broadcast %1 : vector<1x128xf32> to vector<256x128xf32>
    %13 = arith.addf %11, %12 : vector<256x128xf32>
    %c0_11 = arith.constant 0 : index
    %c2 = arith.constant 2 : index
    %c0_12 = arith.constant 0 : index
    %c0_13 = arith.constant 0 : index
    %14 = vector.load %arg2[%c0_11, %c2, %c0_12, %c0_13] : memref<1x7x256x112xf32, #tpu.memory_space<vmem>>, vector<1x1x256x112xf32>
    %15 = vector.shape_cast %14 : vector<1x1x256x112xf32> to vector<256x112xf32>
    %16 = arith.truncf %15 : vector<256x112xf32> to vector<256x112xbf16>
    %cst_14 = arith.constant dense<0.000000e+00> : vector<256x128xf32>
    %17 = tpu.matmul %16, %0, %cst_14 {dimension_numbers = #tpu.dot_dimension_numbers<[1], [0], [0], [1], [0, 0, 1, 1], [], []>} : vector<256x112xbf16>, vector<112x128xbf16>, vector<256x128xf32> -> vector<256x128xf32>
    %18 = vector.broadcast %1 : vector<1x128xf32> to vector<256x128xf32>
    %19 = arith.addf %17, %18 : vector<256x128xf32>
    %c0_15 = arith.constant 0 : index
    %c3 = arith.constant 3 : index
    %c0_16 = arith.constant 0 : index
    %c0_17 = arith.constant 0 : index
    %20 = vector.load %arg2[%c0_15, %c3, %c0_16, %c0_17] : memref<1x7x256x112xf32, #tpu.memory_space<vmem>>, vector<1x1x256x112xf32>
    %21 = vector.shape_cast %20 : vector<1x1x256x112xf32> to vector<256x112xf32>
    %22 = arith.truncf %21 : vector<256x112xf32> to vector<256x112xbf16>
    %cst_18 = arith.constant dense<0.000000e+00> : vector<256x128xf32>
    %23 = tpu.matmul %22, %0, %cst_18 {dimension_numbers = #tpu.dot_dimension_numbers<[1], [0], [0], [1], [0, 0, 1, 1], [], []>} : vector<256x112xbf16>, vector<112x128xbf16>, vector<256x128xf32> -> vector<256x128xf32>
    %24 = vector.broadcast %1 : vector<1x128xf32> to vector<256x128xf32>
    %25 = arith.addf %23, %24 : vector<256x128xf32>
    %c0_19 = arith.constant 0 : index
    %c4 = arith.constant 4 : index
    %c0_20 = arith.constant 0 : index
    %c0_21 = arith.constant 0 : index
    %26 = vector.load %arg2[%c0_19, %c4, %c0_20, %c0_21] : memref<1x7x256x112xf32, #tpu.memory_space<vmem>>, vector<1x1x256x112xf32>
    %27 = vector.shape_cast %26 : vector<1x1x256x112xf32> to vector<256x112xf32>
    %28 = arith.truncf %27 : vector<256x112xf32> to vector<256x112xbf16>
    %cst_22 = arith.constant dense<0.000000e+00> : vector<256x128xf32>
    %29 = tpu.matmul %28, %0, %cst_22 {dimension_numbers = #tpu.dot_dimension_numbers<[1], [0], [0], [1], [0, 0, 1, 1], [], []>} : vector<256x112xbf16>, vector<112x128xbf16>, vector<256x128xf32> -> vector<256x128xf32>
    %30 = vector.broadcast %1 : vector<1x128xf32> to vector<256x128xf32>
    %31 = arith.addf %29, %30 : vector<256x128xf32>
    %c0_23 = arith.constant 0 : index
    %c5 = arith.constant 5 : index
    %c0_24 = arith.constant 0 : index
    %c0_25 = arith.constant 0 : index
    %32 = vector.load %arg2[%c0_23, %c5, %c0_24, %c0_25] : memref<1x7x256x112xf32, #tpu.memory_space<vmem>>, vector<1x1x256x112xf32>
    %33 = vector.shape_cast %32 : vector<1x1x256x112xf32> to vector<256x112xf32>
    %34 = arith.truncf %33 : vector<256x112xf32> to vector<256x112xbf16>
    %cst_26 = arith.constant dense<0.000000e+00> : vector<256x128xf32>
    %35 = tpu.matmul %34, %0, %cst_26 {dimension_numbers = #tpu.dot_dimension_numbers<[1], [0], [0], [1], [0, 0, 1, 1], [], []>} : vector<256x112xbf16>, vector<112x128xbf16>, vector<256x128xf32> -> vector<256x128xf32>
    %36 = vector.broadcast %1 : vector<1x128xf32> to vector<256x128xf32>
    %37 = arith.addf %35, %36 : vector<256x128xf32>
    %c0_27 = arith.constant 0 : index
    %c6 = arith.constant 6 : index
    %c0_28 = arith.constant 0 : index
    %c0_29 = arith.constant 0 : index
    %38 = vector.load %arg2[%c0_27, %c6, %c0_28, %c0_29] : memref<1x7x256x112xf32, #tpu.memory_space<vmem>>, vector<1x1x256x112xf32>
    %39 = vector.shape_cast %38 : vector<1x1x256x112xf32> to vector<256x112xf32>
    %40 = arith.truncf %39 : vector<256x112xf32> to vector<256x112xbf16>
    %cst_30 = arith.constant dense<0.000000e+00> : vector<256x128xf32>
    %41 = tpu.matmul %40, %0, %cst_30 {dimension_numbers = #tpu.dot_dimension_numbers<[1], [0], [0], [1], [0, 0, 1, 1], [], []>} : vector<256x112xbf16>, vector<112x128xbf16>, vector<256x128xf32> -> vector<256x128xf32>
    %42 = vector.broadcast %1 : vector<1x128xf32> to vector<256x128xf32>
    %43 = arith.addf %41, %42 : vector<256x128xf32>
    %44 = arith.maximumf %7, %13 : vector<256x128xf32>
    %45 = arith.maximumf %44, %19 : vector<256x128xf32>
    %46 = arith.maximumf %45, %25 : vector<256x128xf32>
    %47 = arith.maximumf %46, %31 : vector<256x128xf32>
    %48 = arith.maximumf %47, %37 : vector<256x128xf32>
    %49 = arith.maximumf %48, %43 : vector<256x128xf32>
    %cst_31 = arith.constant 0.000000e+00 : f32
    %50 = vector.broadcast %cst_31 : f32 to vector<256x128xf32>
    %cst_32 = arith.constant 0.000000e+00 : f32
    %51 = vector.broadcast %cst_32 : f32 to vector<256x128xf32>
    %52 = arith.subf %7, %49 : vector<256x128xf32>
    %53 = math.exp %52 : vector<256x128xf32>
    %54 = arith.addf %50, %53 : vector<256x128xf32>
    %55 = arith.mulf %7, %53 : vector<256x128xf32>
    %56 = arith.addf %51, %55 : vector<256x128xf32>
    %57 = arith.subf %13, %49 : vector<256x128xf32>
    %58 = math.exp %57 : vector<256x128xf32>
    %59 = arith.addf %54, %58 : vector<256x128xf32>
    %60 = arith.mulf %13, %58 : vector<256x128xf32>
    %61 = arith.addf %56, %60 : vector<256x128xf32>
    %62 = arith.subf %19, %49 : vector<256x128xf32>
    %63 = math.exp %62 : vector<256x128xf32>
    %64 = arith.addf %59, %63 : vector<256x128xf32>
    %65 = arith.mulf %19, %63 : vector<256x128xf32>
    %66 = arith.addf %61, %65 : vector<256x128xf32>
    %67 = arith.subf %25, %49 : vector<256x128xf32>
    %68 = math.exp %67 : vector<256x128xf32>
    %69 = arith.addf %64, %68 : vector<256x128xf32>
    %70 = arith.mulf %25, %68 : vector<256x128xf32>
    %71 = arith.addf %66, %70 : vector<256x128xf32>
    %72 = arith.subf %31, %49 : vector<256x128xf32>
    %73 = math.exp %72 : vector<256x128xf32>
    %74 = arith.addf %69, %73 : vector<256x128xf32>
    %75 = arith.mulf %31, %73 : vector<256x128xf32>
    %76 = arith.addf %71, %75 : vector<256x128xf32>
    %77 = arith.subf %37, %49 : vector<256x128xf32>
    %78 = math.exp %77 : vector<256x128xf32>
    %79 = arith.addf %74, %78 : vector<256x128xf32>
    %80 = arith.mulf %37, %78 : vector<256x128xf32>
    %81 = arith.addf %76, %80 : vector<256x128xf32>
    %82 = arith.subf %43, %49 : vector<256x128xf32>
    %83 = math.exp %82 : vector<256x128xf32>
    %84 = arith.addf %79, %83 : vector<256x128xf32>
    %85 = arith.mulf %43, %83 : vector<256x128xf32>
    %86 = arith.addf %81, %85 : vector<256x128xf32>
    %87 = tpu.reciprocal %84 {approx = true} : vector<256x128xf32> -> vector<256x128xf32>
    %88 = arith.mulf %86, %87 : vector<256x128xf32>
    %89 = vector.extract_strided_slice %88 {offsets = [0, 0], sizes = [256, 112], strides = [1, 1]} : vector<256x128xf32> to vector<256x112xf32>
    %c0_33 = arith.constant 0 : index
    %c0_34 = arith.constant 0 : index
    %c0_35 = arith.constant 0 : index
    %90 = vector.load %arg5[%c0_33, %c0_34, %c0_35] : memref<1x256x112xf32, #tpu.memory_space<vmem>>, vector<1x256x112xf32>
    %91 = vector.shape_cast %90 : vector<1x256x112xf32> to vector<256x112xf32>
    %92 = vector.shape_cast %89 : vector<256x112xf32> to vector<1x256x112xf32>
    tpu.vector_store %arg5[%c0_33, %c0_34, %c0_35], %92 {strides = array<i32>} : memref<1x256x112xf32, #tpu.memory_space<vmem>>, vector<1x256x112xf32>,
    %cst_36 = arith.constant dense<0.000000e+00> : vector<128xf32>
    %93 = vector.multi_reduction <add>, %88, %cst_36 [0] : vector<256x128xf32> to vector<128xf32>
    %94 = vector.shape_cast %93 : vector<128xf32> to vector<1x128xf32>
    %95 = vector.shape_cast %94 : vector<1x128xf32> to vector<1x1x1x128xf32>
    %c0_37 = arith.constant 0 : index
    %c0_38 = arith.constant 0 : index
    %c0_39 = arith.constant 0 : index
    %c0_40 = arith.constant 0 : index
    %96 = vector.load %arg6[%c0_37, %c0_38, %c0_39, %c0_40] : memref<1x1x1x128xf32, #tpu.memory_space<vmem>>, vector<1x1x1x128xf32>
    tpu.vector_store %arg6[%c0_37, %c0_38, %c0_39, %c0_40], %95 {strides = array<i32>} : memref<1x1x1x128xf32, #tpu.memory_space<vmem>>, vector<1x1x1x128xf32>,
    return
  }
  func.func @transform_0(%arg0: i32, %arg1: i32) -> (i32, i32, i32, i32) {
    %c0_i32 = arith.constant 0 : i32
    %c0_i32_0 = arith.constant 0 : i32
    %c0_i32_1 = arith.constant 0 : i32
    return %arg0, %c0_i32, %arg1, %c0_i32_0 : i32, i32, i32, i32
  }
  func.func @transform_1(%arg0: i32, %arg1: i32) -> (i32, i32) {
    %c0_i32 = arith.constant 0 : i32
    %c0_i32_0 = arith.constant 0 : i32
    %c0_i32_1 = arith.constant 0 : i32
    return %c0_i32, %c0_i32_0 : i32, i32
  }
  func.func @transform_2(%arg0: i32, %arg1: i32) -> (i32, i32) {
    %c0_i32 = arith.constant 0 : i32
    %c0_i32_0 = arith.constant 0 : i32
    %c0_i32_1 = arith.constant 0 : i32
    return %c0_i32, %c0_i32_0 : i32, i32
  }
  func.func @transform_3(%arg0: i32, %arg1: i32) -> (i32, i32, i32) {
    %c0_i32 = arith.constant 0 : i32
    %c0_i32_0 = arith.constant 0 : i32
    return %arg0, %arg1, %c0_i32 : i32, i32, i32
  }
  func.func @transform_4(%arg0: i32, %arg1: i32) -> (i32, i32, i32, i32) {
    %c0_i32 = arith.constant 0 : i32
    %c0_i32_0 = arith.constant 0 : i32
    %c0_i32_1 = arith.constant 0 : i32
    return %arg0, %arg1, %c0_i32, %c0_i32_0 : i32, i32, i32, i32
  }
}

</mosaic_0001>

<bundles_post_ra>
// kernel: siamese_forward.1
= control target key start
LH: loop header
LB: loop body
LE: loop exit
PB: predicated region body
PF: predicated region fallthrough
CT: control target
= control target key end

     0   :  { %10 = vsyncpa [#allocation3], 0  ;;  %s8267_s0 = inlined_call_operand.hbm [shape: f32[2,7,256,112], index: 0, kind: input, shape index: {}]   ;;  %s8268_s1 = inlined_call_operand.vmem [shape: bf16[112,128], index: 1, kind: input, shape index: {}]   ;;  %s8269_s2 = inlined_call_operand.vmem [shape: f32[1,128], index: 2, kind: input, shape index: {}]   ;;  %s8270_s3 = inlined_call_operand.hbm [shape: f32[2,256,112], index: 3, kind: output, shape index: {0}]   ;;  %s8271_s4 = inlined_call_operand.vmem [shape: f32[2,1,1,128], index: 4, kind: output, shape index: {1}]  }
   0x1   :  { %12 = vsyncpa [#allocation3 + $0x1], 0 }
   0x2   :  { %13 = vsyncpa [#allocation4], 0 }
   0x3   :  { %15 = vsyncpa [#allocation4 + $0x1], 0  ;;  %s5489_s15 = smov 0   ;;  %s5491_s16 = smov 0  }
   0x4   :  { %s5493_s17 = smov 0   ;;  %s5495_s18 = smov 0  }
   0x5   :  { %s5497_s19 = smov 0   ;;  %s5499_s20 = smov 0  }
   0x6 LB: > { %s3931_s21 = sadd.s32 4294967295, %s5456_s20   ;;  %s3932_s22 = sadd.s32 4294967294, %s5456_s20   ;;  %s5456_s20 = sphi %s5499_s20, %s21_s20   ;;  %s5452_s19 = sphi %s5497_s19, %s8961_s19   ;;  %s5448_s18 = sphi %s5495_s18, %s8960_s18   ;;  %s5444_s17 = sphi %s5493_s17, %s8959_s17   ;;  %s5440_s16 = sphi %s5491_s16, %s8958_s16   ;;  %s5436_s15 = sphi %s5489_s15, %s8957_s15  }
   0x7   : > { %s33_s23 = sadd.s32 1, %s5452_s19  ;;  %s42_s24 = sadd.s32 1, %s5444_s17 }
   0x8   : > { %p35_p0 = scmp.ge.s32.totalorder %s33_s23, 2  ;;  %p49_p1 = scmp.ne.s32.totalorder %s5444_s17, %s5440_s16 }
   0x9   : > { %p50_p2 = scmp.eq.s32.totalorder %s5456_s20, 0  ;;  %p55_p3 = scmp.ne.s32.totalorder %s5440_s16, %s5436_s15 }
   0xa   : > { %s8963_s23 = smov (%p35_p0, %s33_s23), 0  ;;  %p56_p5 = scmp.eq.s32.totalorder %s3931_s21, 0 }
   0xb   : > { %p5530_p4 = por %p50_p2, %p49_p1  ;;  %s37_s26 = ssub.s32 %s5452_s19, %s8963_s23 }
   0xc   : > { %p123_p6 = scmp.eq.s32.totalorder %s3931_s21, 1  ;;  %p40_p7 = scmp.eq.s32.totalorder %s37_s26, 0 }
   0xd   : > { %p5536_p8 = por %p56_p5, %p55_p3  ;;  %p129_p10 = scmp.eq.s32.totalorder %s3932_s22, 1 }
   0xe   : > { %p5540_p9 = por %p123_p6, %p49_p1  ;;  %p4768_p13 = scmp.lt.s32.totalorder %s5456_s20, 2 }
   0xf   : > { %s5545_s29 = scalar_select %p40_p7, %s5444_s17, %s42_s24  }
  0x10   : > { %s8562_s28 = scalar_select %p5540_p9, 1, 0 }
  0x11   : > { %p5547_p11 = por %p129_p10, %p55_p3  ;;  %s183_s5 = sand.u32 1, %s5444_s17  }
  0x12   : > { %s4753_s6 = smul.u32 1792, %s183_s5  ;;  %p5557_p0 = pnand %p4768_p13, %p5530_p4 }
  0x13   : > { %s8563_s30 = scalar_select %p5547_p11, 1, 0 }
  0x14   : > { %s4754_s7 = smul.u32 28672, %s5452_s19  ;;  %s187_s12 = scalar_lea.vmem [#allocation2], %s4753_s6 }
  0x15   : > { %s196_s13 = sshll.u32 %s187_s12, 4  ;;  %s5569_s14 = scalar_lea.sflag [#allocation3], %s183_s5  ;;  %s5566_s13 = int_to_ptr.vmem [resolvable:$true] %s196_s13 }
  0x16   : > { %s5564_s11 = scalar_lea.hbm %s8267_s0, %s4754_s7  ;;  %p5346_p3 = pneg %p5557_p0 }
  0x17   : > { %s5344_s21 = scalar_lea.hbm %s5564_s11, 28672  ;;  %s5349_s25 = scalar_lea.hbm %s8267_s0, 57344 }
  0x18   : > { %p5345_p2 = scmp.ne.s32.totalorder %s5564_s11, %s5344_s21  ;;  %p5350_p6 = scmp.lt.u32.totalorder %s5564_s11, %s8267_s0 }
  0x19   : > { %p5351_p7 = scmp.lt.u32.totalorder %s5349_s25, %s5344_s21  ;;  %p5353_p13 = scmp.lt.u32.totalorder %s5344_s21, %s5564_s11 }
  0x1a   : > { %p5347_p4 = pnand %p5346_p3, %p5345_p2 }
  0x1b   : > { %p5352_p10 = por %p5351_p7, %p5350_p6 }
  0x1c   : > { %p5348_p5 = pneg %p5347_p4 }
  0x1d   : > { %p5354_p12 = por %p5353_p13, %p5352_p10 }
  0x1f   : > { %p5355_p1 = pnand %p5354_p12, %p5348_p5 }
  0x21   : > { %5358 = shalt.err (!%p5355_p1)
}
  0x22   : > { %s5359_s5 = scalar_lea.vmem %s5566_s13, 28672  ;;  %s5458_s7 = smov [#allocation2]  }
  0x23   : > { %p5360_p2 = scmp.ne.s32.totalorder %s5566_s13, %s5359_s5  ;;  %s5364_s9 = sshll.u32 %s5458_s7, 4  ;;  %s5365_s9 = int_to_ptr.vmem [resolvable:$false] %s5364_s9 }
  0x24   : > { %s5366_s10 = scalar_lea.vmem %s5365_s9, 57344  ;;  %p5367_p9 = scmp.lt.s32.totalorder %s5566_s13, %s5365_s9 }
  0x25   : > { %p5362_p4 = pnand %p5360_p2, %p5346_p3  ;;  %p5368_p6 = scmp.lt.s32.totalorder %s5366_s10, %s5359_s5 }
  0x27   : > { %p5363_p11 = pneg %p5362_p4  ;;  %p5369_p7 = por %p5368_p6, %p5367_p9 }
  0x29   : > { %p5370_p10 = pnand %p5369_p7, %p5363_p11 }
  0x2b   : > { %5373 = shalt.err (!%p5370_p10)
}
  0x2c   : > { %s5459_s12 = smov 128   ;;  %s5460_s21 = smov 8  }
  0x2d   : > { %4763 = dma.hbm_to_vmem [thread:$0]  (!%p5557_p0), %s5564_s11, 28672, %s5566_s13, %s5569_s14, %s5459_s12, %s5459_s12, %s5460_s21  }
  0x2e   : > { %p204_p12 = scmp.lt.s32.totalorder %s5456_s20, 3  ;;  %p8565_p1 = scmp.ge.s32.totalorder %s5456_s20, 1 }
  0x30   : > { %p205_p3 = pnand %p8565_p1, %p204_p12 }
  0x32   : > { %208 = sbr.rel (%p205_p3) target bundleno = 897 (0x381), region = 32 }
  0x39   : > { %s5601_s22 = sand.u32 1, %s5440_s16  }
  0x3a   : > { %s4755_s24 = smul.u32 1792, %s5601_s22  ;;  %s211_s25 = scalar_lea.sflag [#allocation3], %s5601_s22 }
  0x3c   : > { %s5605_s26 = scalar_lea.vmem [#allocation2], %s4755_s24 }
  0x3d   : > { %5427 = dma.done.wait (%p5536_p8), %s211_s25, 28672  }
  0x3e   : > { %5429 = vsyncadd (%p5536_p8), %s211_s25, 4294938624  ;;  %v5614_v0 = vld [vmem:[%s8268_s1] sm:$0xff]   ;;  %v5619_v1 = vld [vmem:[%s8268_s1 + $0x8] sm:$0xff]   ;;  %vm365_vm0 = vcmask 916480   ;;  %s3937_s14 = sshll.u32 %s5601_s22, 8  ;;  %s4255_s10 = sshll.u32 %s5448_s18, 12 }
  0x3f   : > { %4417 = vmatprep.subr.bf16.mxu0 %v5614_v0  ;;  %4739 = vmatprep.subr.bf16.mxu1 %v5614_v0  ;;  %v5630_v2 = vld [vmem:[%s8268_s1 + $0x10] sm:$0xff]   ;;  %v269_v3 = vld [vmem:[%s5605_s26] sm:$0xff]  ;;  %v270_v4 = vld [vmem:[%s5605_s26 + $0x8] sm:$0xff]  ;;  %s7162_s27 = scalar_lea.vmem [#allocation5], %s3937_s14  ;;  %s8208_s25 = scalar_lea.hbm %s8270_s3, %s4255_s10 }
  0x40   : > { %4418 = vmatpush3.bf16.msra.mxu0 %v5614_v0  ;;  %4746 = vmatpush3.bf16.msra.mxu1 %v5614_v0  ;;  %v285_v5 = vld [vmem:[%s5605_s26 + $0x80] sm:$0xff]  ;;  %v5642_v6 = vld [vmem:[%s8268_s1 + $0x18] sm:$0xff]   ;;  %v301_v7 = vpack.c.bf16 %v270_v4, %v269_v3  ;;  %v286_v8 = vld [vmem:[%s5605_s26 + $0x88] sm:$0xff]  ;;  %s3815_s12 = sshll.u32 %s7162_s27, 4  ;;  %p8954_p9 = scmp.ne.s32.totalorder %s8562_s28, 0  ;;  %s8210_s12 = int_to_ptr.vmem [resolvable:$true] %s3815_s12 }
  0x41   : > { %4419 = vmatprep.subr.bf16.mxu0 %v5619_v1  ;;  %4740 = vmatprep.subr.bf16.mxu1 %v5619_v1  ;;  %v309_v9 = vpack.c.bf16 %v286_v8, %v285_v5  ;;  %v5653_v10 = vld [vmem:[%s8268_s1 + $0x20] sm:$0xff]   ;;  %v5663_v11 = vld [vmem:[%s8268_s1 + $0x28] sm:$0xff]   ;;  %v5672_v12 = vld [vmem:[%s8268_s1 + $0x30] sm:$0xff]   ;;  %s5374_s8 = scalar_lea.vmem %s8210_s12, 4096  ;;  %s5461_s11 = smov [#allocation5]  }
  0x42   : > { %4431 = vmatprep.mubr.msk.bf16.mxu0 %vm365_vm0, %v301_v7  ;;  %v271_v13 = vld [vmem:[%s5605_s26 + $0x10] sm:$0xff]  ;;  %v272_v14 = vld [vmem:[%s5605_s26 + $0x18] sm:$0xff]  ;;  %v273_v17 = vld [vmem:[%s5605_s26 + $0x20] sm:$0xff]  ;;  %p5375_p8 = scmp.ne.s32.totalorder %s8210_s12, %s5374_s8  ;;  %s5378_s13 = sshll.u32 %s5461_s11, 4  ;;  %s5379_s13 = int_to_ptr.vmem [resolvable:$false] %s5378_s13 }
  0x43   : > { %4447 = vmatprep.mubr.msk.bf16.mxu1 %vm365_vm0, %v309_v9  ;;  %v287_v15 = vld [vmem:[%s5605_s26 + $0x90] sm:$0xff]  ;;  %v288_v16 = vld [vmem:[%s5605_s26 + $0x98] sm:$0xff]  ;;  %v274_v18 = vld [vmem:[%s5605_s26 + $0x28] sm:$0xff]  ;;  %v302_v19 = vpack.c.bf16 %v272_v14, %v271_v13  ;;  %s5380_s14 = scalar_lea.vmem %s5379_s13, 8192  ;;  %p5381_p5 = scmp.lt.s32.totalorder %s8210_s12, %s5379_s13 }
  0x44   : > { %4420 = vmatpush3.bf16.msra.mxu0 %v5619_v1  ;;  %4747 = vmatpush3.bf16.msra.mxu1 %v5619_v1  ;;  %v310_v20 = vpack.c.bf16 %v288_v16, %v287_v15  ;;  %v289_v21 = vld [vmem:[%s5605_s26 + $0xa0] sm:$0xff]  ;;  %v290_v22 = vld [vmem:[%s5605_s26 + $0xa8] sm:$0xff]  ;;  %v303_v23 = vpack.c.bf16 %v274_v18, %v273_v17  ;;  %v275_v25 = vld [vmem:[%s5605_s26 + $0x30] sm:$0xff]  ;;  %p5376_p11 = pnand %p5375_p8, %p8954_p9  ;;  %p5382_p13 = scmp.lt.s32.totalorder %s5380_s14, %s5374_s8 }
  0x45   : > { %4421 = vmatprep.subr.bf16.mxu0 %v5630_v2  ;;  %4741 = vmatprep.subr.bf16.mxu1 %v5630_v2  ;;  %v311_v24 = vpack.c.bf16 %v290_v22, %v289_v21  ;;  %v276_v26 = vld [vmem:[%s5605_s26 + $0x38] sm:$0xff]  ;;  %v291_v27 = vld [vmem:[%s5605_s26 + $0xb0] sm:$0xff]  ;;  %v277_v29 = vld [vmem:[%s5605_s26 + $0x40] sm:$0xff] }
  0x46   : > { %v292_v28 = vld [vmem:[%s5605_s26 + $0xb8] sm:$0xff]  ;;  %v278_v30 = vld [vmem:[%s5605_s26 + $0x48] sm:$0xff]  ;;  %v304_v31 = vpack.c.bf16 %v276_v26, %v275_v25  ;;  %v293_v33 = vld [vmem:[%s5605_s26 + $0xc0] sm:$0xff]  ;;  %p5377_p0 = pneg %p5376_p11  ;;  %p5383_p2 = por %p5382_p13, %p5381_p5 }
  0x47   : > { %v312_v32 = vpack.c.bf16 %v292_v28, %v291_v27  ;;  %v294_v34 = vld [vmem:[%s5605_s26 + $0xc8] sm:$0xff]  ;;  %v305_v35 = vpack.c.bf16 %v278_v30, %v277_v29  ;;  %v279_v37 = vld [vmem:[%s5605_s26 + $0x50] sm:$0xff]  ;;  %v280_v38 = vld [vmem:[%s5605_s26 + $0x58] sm:$0xff] }
  0x48   : > { %4422 = vmatpush3.bf16.msra.mxu0 %v5630_v2  ;;  %4748 = vmatpush3.bf16.msra.mxu1 %v5630_v2  ;;  %v313_v36 = vpack.c.bf16 %v294_v34, %v293_v33  ;;  %v295_v39 = vld [vmem:[%s5605_s26 + $0xd0] sm:$0xff]  ;;  %v296_v40 = vld [vmem:[%s5605_s26 + $0xd8] sm:$0xff]  ;;  %v281_v41 = vld [vmem:[%s5605_s26 + $0x60] sm:$0xff]  ;;  %v306_v45 = vpack.c.bf16 %v280_v38, %v279_v37  ;;  %p5384_p4 = pnand %p5383_p2, %p5377_p0 }
  0x49   : > { %4423 = vmatprep.subr.bf16.mxu0 %v5642_v6  ;;  %4742 = vmatprep.subr.bf16.mxu1 %v5642_v6  ;;  %v282_v42 = vld [vmem:[%s5605_s26 + $0x68] sm:$0xff]  ;;  %v297_v43 = vld [vmem:[%s5605_s26 + $0xe0] sm:$0xff]  ;;  %v314_v46 = vpack.c.bf16 %v296_v40, %v295_v39  ;;  %v283_v49 = vld [vmem:[%s5605_s26 + $0x70] sm:$0xff] }
  0x4a   : > { %v298_v44 = vld [vmem:[%s5605_s26 + $0xe8] sm:$0xff]  ;;  %v307_v47 = vpack.c.bf16 %v282_v42, %v281_v41  ;;  %v284_v50 = vld [vmem:[%s5605_s26 + $0x78] sm:$0xff]  ;;  %v299_v51 = vld [vmem:[%s5605_s26 + $0xf0] sm:$0xff] }
  0x4b   : > { %v315_v48 = vpack.c.bf16 %v298_v44, %v297_v43  ;;  %v300_v52 = vld [vmem:[%s5605_s26 + $0xf8] sm:$0xff]  ;;  %v3962_v53 = vld [vmem:[%s5605_s26 + $0x100] sm:$0xff]  ;;  %v3963_v54 = vld [vmem:[%s5605_s26 + $0x108] sm:$0xff]  ;;  %v308_v57 = vpack.c.bf16 %v284_v50, %v283_v49 }
  0x4c   : > { %4424 = vmatpush3.bf16.msra.mxu0 %v5642_v6  ;;  %4749 = vmatpush3.bf16.msra.mxu1 %v5642_v6  ;;  %v4010_v55 = vld [vmem:[%s5605_s26 + $0x200] sm:$0xff]  ;;  %v4011_v56 = vld [vmem:[%s5605_s26 + $0x208] sm:$0xff]  ;;  %v316_v58 = vpack.c.bf16 %v300_v52, %v299_v51  ;;  %v608_v59 = vpack.c.bf16 %v3963_v54, %v3962_v53  ;;  %v3964_v61 = vld [vmem:[%s5605_s26 + $0x110] sm:$0xff] }
  0x4d   : > { %4425 = vmatprep.subr.bf16.mxu0 %v5653_v10  ;;  %4743 = vmatprep.subr.bf16.mxu1 %v5653_v10  ;;  %v866_v60 = vpack.c.bf16 %v4011_v56, %v4010_v55  ;;  %v3965_v62 = vld [vmem:[%s5605_s26 + $0x118] sm:$0xff]  ;;  %v4012_v63 = vld [vmem:[%s5605_s26 + $0x210] sm:$0xff]  ;;  %v3966_v4 = vld [vmem:[%s5605_s26 + $0x120] sm:$0xff] }
  0x4e   : > { %v4013_v3 = vld [vmem:[%s5605_s26 + $0x218] sm:$0xff]  ;;  %v3967_v5 = vld [vmem:[%s5605_s26 + $0x128] sm:$0xff]  ;;  %v4014_v7 = vld [vmem:[%s5605_s26 + $0x220] sm:$0xff]  ;;  %v609_v9 = vpack.c.bf16 %v3965_v62, %v3964_v61 }
  0x4f   : > { %v4015_v8 = vld [vmem:[%s5605_s26 + $0x228] sm:$0xff]  ;;  %v867_v13 = vpack.c.bf16 %v4013_v3, %v4012_v63  ;;  %v610_v14 = vpack.c.bf16 %v3967_v5, %v3966_v4  ;;  %v3968_v16 = vld [vmem:[%s5605_s26 + $0x130] sm:$0xff]  ;;  %v3969_v17 = vld [vmem:[%s5605_s26 + $0x138] sm:$0xff] }
  0x50   : > { %4426 = vmatpush3.bf16.msra.mxu0 %v5653_v10  ;;  %4750 = vmatpush3.bf16.msra.mxu1 %v5653_v10  ;;  %v868_v15 = vpack.c.bf16 %v4015_v8, %v4014_v7  ;;  %v4016_v18 = vld [vmem:[%s5605_s26 + $0x230] sm:$0xff]  ;;  %v3971_v21 = vld [vmem:[%s5605_s26 + $0x148] sm:$0xff]  ;;  %v4018_v22 = vld [vmem:[%s5605_s26 + $0x240] sm:$0xff] }
  0x51   : > { %4427 = vmatprep.subr.bf16.mxu0 %v5663_v11  ;;  %4744 = vmatprep.subr.bf16.mxu1 %v5663_v11  ;;  %v3972_v28 = vld [vmem:[%s5605_s26 + $0x150] sm:$0xff]  ;;  %v3973_v29 = vld [vmem:[%s5605_s26 + $0x158] sm:$0xff]  ;;  %v3975_v33 = vld [vmem:[%s5605_s26 + $0x168] sm:$0xff] }
  0x52   : > { %v4020_v30 = vld [vmem:[%s5605_s26 + $0x250] sm:$0xff]  ;;  %v4022_v34 = vld [vmem:[%s5605_s26 + $0x260] sm:$0xff]  ;;  %v3977_v41 = vld [vmem:[%s5605_s26 + $0x178] sm:$0xff] }
  0x53   : > { %v3976_v40 = vld [vmem:[%s5605_s26 + $0x170] sm:$0xff]  ;;  %v4025_v43 = vld [vmem:[%s5605_s26 + $0x278] sm:$0xff]  ;;  %v3978_v44 = vld [vmem:[%s5605_s26 + $0x180] sm:$0xff] }
  0x54   : > { %4428 = vmatpush3.bf16.msra.mxu0 %v5663_v11  ;;  %4751 = vmatpush3.bf16.msra.mxu1 %v5663_v11  ;;  %v4024_v42 = vld [vmem:[%s5605_s26 + $0x270] sm:$0xff]  ;;  %v3981_v53 = vld [vmem:[%s5605_s26 + $0x198] sm:$0xff]  ;;  %v3982_v56 = vld [vmem:[%s5605_s26 + $0x1a0] sm:$0xff] }
  0x55   : > { %4429 = vmatprep.subr.bf16.mxu0 %v5672_v12  ;;  %4745 = vmatprep.subr.bf16.mxu1 %v5672_v12  ;;  %v873_v49 = vpack.c.bf16 %v4025_v43, %v4024_v42  ;;  %v3980_v52 = vld [vmem:[%s5605_s26 + $0x190] sm:$0xff]  ;;  %v4029_v55 = vld [vmem:[%s5605_s26 + $0x298] sm:$0xff]  ;;  %v3986_v8 = vld [vmem:[%s5605_s26 + $0x1c0] sm:$0xff] }
  0x56   : > { %v4028_v54 = vld [vmem:[%s5605_s26 + $0x290] sm:$0xff]  ;;  %v3985_v4 = vld [vmem:[%s5605_s26 + $0x1b8] sm:$0xff] }
  0x57   : > { %v875_v61 = vpack.c.bf16 %v4029_v55, %v4028_v54  ;;  %v3984_v3 = vld [vmem:[%s5605_s26 + $0x1b0] sm:$0xff]  ;;  %v4033_v7 = vld [vmem:[%s5605_s26 + $0x2b8] sm:$0xff] }
  0x58   : > { %4430 = vmatpush3.bf16.msra.mxu0 %v5672_v12  ;;  %4752 = vmatpush3.bf16.msra.mxu1 %v5672_v12  ;;  %v4032_v5 = vld [vmem:[%s5605_s26 + $0x2b0] sm:$0xff] }
  0x59   : > { %4463 = vmatprep.subr.bf16.mxu1 %v5614_v0  ;;  %4509 = vmatprep.subr.bf16.mxu0 %v5614_v0  ;;  %v4060_v43 = vld [vmem:[%s5605_s26 + $0x310] sm:$0xff] }
  0x5a   : > { %v4064_v55 = vld [vmem:[%s5605_s26 + $0x330] sm:$0xff] }
  0x5b   : > { %4432 = vmatmul.mubr.msk.bf16.vlgmr.msra.gmra.mrb[0].mxu0 %vm365_vm0, %v302_v19  ;;  %4448 = vmatmul.mubr.msk.bf16.vlgmr.msra.gmra.mrb[0].mxu1 %vm365_vm0, %v310_v20  ;;  %v4017_v19 = vld [vmem:[%s5605_s26 + $0x238] sm:$0xff]  ;;  %v3970_v20 = vld [vmem:[%s5605_s26 + $0x140] sm:$0xff] }
  0x5c   : > { %4464 = vmatpush3.bf16.msra.mxu1 %v5614_v0  ;;  %4510 = vmatpush3.bf16.msra.mxu0 %v5614_v0  ;;  %v869_v25 = vpack.c.bf16 %v4017_v19, %v4016_v18  ;;  %v612_v26 = vpack.c.bf16 %v3971_v21, %v3970_v20  ;;  %v3988_v19 = vld [vmem:[%s5605_s26 + $0x1d0] sm:$0xff]  ;;  %v3989_v20 = vld [vmem:[%s5605_s26 + $0x1d8] sm:$0xff] }
  0x5d   : > { %4465 = vmatprep.subr.bf16.mxu1 %v5619_v1  ;;  %4435 = vmatprep.mubr.msk.bf16.mxu0 %vm365_vm0, %v303_v23  ;;  %v4019_v23 = vld [vmem:[%s5605_s26 + $0x248] sm:$0xff]  ;;  %v4036_v21 = vld [vmem:[%s5605_s26 + $0x2d0] sm:$0xff] }
  0x5e   : > { %4451 = vmatprep.mubr.msk.bf16.mxu1 %vm365_vm0, %v311_v24  ;;  %4511 = vmatprep.subr.bf16.mxu0 %v5619_v1  ;;  %v611_v24 = vpack.c.bf16 %v3969_v17, %v3968_v16  ;;  %v870_v27 = vpack.c.bf16 %v4019_v23, %v4018_v22  ;;  %v877_v16 = vpack.c.bf16 %v4033_v7, %v4032_v5  ;;  %v4037_v22 = vld [vmem:[%s5605_s26 + $0x2d8] sm:$0xff]  ;;  %v3990_v23 = vld [vmem:[%s5605_s26 + $0x1e0] sm:$0xff]  ;;  %v4068_v5 = vld [vmem:[%s5605_s26 + $0x350] sm:$0xff] }
  0x5f   : > { %v4069_v7 = vld [vmem:[%s5605_s26 + $0x358] sm:$0xff] }
  0x60   : > { %4466 = vmatpush3.bf16.msra.mxu1 %v5619_v1  ;;  %4512 = vmatpush3.bf16.msra.mxu0 %v5619_v1 }
  0x61   : > { %4467 = vmatprep.subr.bf16.mxu1 %v5630_v2  ;;  %4513 = vmatprep.subr.bf16.mxu0 %v5630_v2 }
  0x63   : > { %4436 = vmatmul.mubr.msk.bf16.gmra.mrb[4].mxu0 %vm365_vm0, %v304_v31  ;;  %4452 = vmatmul.mubr.msk.bf16.gmra.mrb[4].mxu1 %vm365_vm0, %v312_v32  ;;  %v4021_v31 = vld [vmem:[%s5605_s26 + $0x258] sm:$0xff]  ;;  %v3974_v32 = vld [vmem:[%s5605_s26 + $0x160] sm:$0xff] }
  0x64   : > { %4468 = vmatpush3.bf16.msra.mxu1 %v5630_v2  ;;  %4514 = vmatpush3.bf16.msra.mxu0 %v5630_v2  ;;  %v871_v37 = vpack.c.bf16 %v4021_v31, %v4020_v30  ;;  %v614_v38 = vpack.c.bf16 %v3975_v33, %v3974_v32  ;;  %v3992_v31 = vld [vmem:[%s5605_s26 + $0x1f0] sm:$0xff]  ;;  %v3993_v32 = vld [vmem:[%s5605_s26 + $0x1f8] sm:$0xff] }
  0x65   : > { %4469 = vmatprep.subr.bf16.mxu1 %v5642_v6  ;;  %4439 = vmatprep.mubr.msk.bf16.mxu0 %vm365_vm0, %v305_v35  ;;  %v4023_v35 = vld [vmem:[%s5605_s26 + $0x268] sm:$0xff]  ;;  %v4040_v33 = vld [vmem:[%s5605_s26 + $0x2f0] sm:$0xff] }
  0x66   : > { %4455 = vmatprep.mubr.msk.bf16.mxu1 %vm365_vm0, %v313_v36  ;;  %4515 = vmatprep.subr.bf16.mxu0 %v5642_v6  ;;  %v613_v36 = vpack.c.bf16 %v3973_v29, %v3972_v28  ;;  %v872_v39 = vpack.c.bf16 %v4023_v35, %v4022_v34  ;;  %v879_v28 = vpack.c.bf16 %v4037_v22, %v4036_v21  ;;  %v4041_v34 = vld [vmem:[%s5605_s26 + $0x2f8] sm:$0xff]  ;;  %v4058_v35 = vld [vmem:[%s5605_s26 + $0x300] sm:$0xff]  ;;  %v4120_v21 = vld [vmem:[%s5605_s26 + $0x470] sm:$0xff] }
  0x67   : > { %v4121_v22 = vld [vmem:[%s5605_s26 + $0x478] sm:$0xff] }
  0x68   : > { %4470 = vmatpush3.bf16.msra.mxu1 %v5642_v6  ;;  %4516 = vmatpush3.bf16.msra.mxu0 %v5642_v6 }
  0x69   : > { %4471 = vmatprep.subr.bf16.mxu1 %v5653_v10  ;;  %4517 = vmatprep.subr.bf16.mxu0 %v5653_v10 }
  0x6b   : > { %4440 = vmatmul.mubr.msk.bf16.gmra.mrb[8].mxu0 %vm365_vm0, %v306_v45  ;;  %4456 = vmatmul.mubr.msk.bf16.gmra.mrb[8].mxu1 %vm365_vm0, %v314_v46  ;;  %v3979_v45 = vld [vmem:[%s5605_s26 + $0x188] sm:$0xff]  ;;  %v4026_v46 = vld [vmem:[%s5605_s26 + $0x280] sm:$0xff] }
  0x6c   : > { %4472 = vmatpush3.bf16.msra.mxu1 %v5653_v10  ;;  %4518 = vmatpush3.bf16.msra.mxu0 %v5653_v10  ;;  %v616_v50 = vpack.c.bf16 %v3979_v45, %v3978_v44  ;;  %v4061_v44 = vld [vmem:[%s5605_s26 + $0x318] sm:$0xff]  ;;  %v4108_v45 = vld [vmem:[%s5605_s26 + $0x410] sm:$0xff] }
  0x6d   : > { %4443 = vmatprep.mubr.msk.bf16.mxu0 %vm365_vm0, %v307_v47  ;;  %4459 = vmatprep.mubr.msk.bf16.mxu1 %vm365_vm0, %v315_v48  ;;  %v4027_v47 = vld [vmem:[%s5605_s26 + $0x288] sm:$0xff]  ;;  %v615_v48 = vpack.c.bf16 %v3977_v41, %v3976_v40  ;;  %v881_v40 = vpack.c.bf16 %v4041_v34, %v4040_v33  ;;  %v4078_v33 = vld [vmem:[%s5605_s26 + $0x3a0] sm:$0xff] }
  0x6e   : > { %4473 = vmatprep.subr.bf16.mxu1 %v5663_v11  ;;  %4519 = vmatprep.subr.bf16.mxu0 %v5663_v11  ;;  %v874_v51 = vpack.c.bf16 %v4027_v47, %v4026_v46  ;;  %v4109_v46 = vld [vmem:[%s5605_s26 + $0x418] sm:$0xff]  ;;  %v4062_v47 = vld [vmem:[%s5605_s26 + $0x320] sm:$0xff] }
  0x6f   : > { %v4126_v34 = vld [vmem:[%s5605_s26 + $0x4a0] sm:$0xff] }
  0x70   : > { %4474 = vmatpush3.bf16.msra.mxu1 %v5663_v11  ;;  %4520 = vmatpush3.bf16.msra.mxu0 %v5663_v11 }
  0x71   : > { %4475 = vmatprep.subr.bf16.mxu1 %v5672_v12  ;;  %4521 = vmatprep.subr.bf16.mxu0 %v5672_v12 }
  0x73   : > { %4444 = vmatmul.mubr.msk.bf16.gmra.mrb[12].mxu0 %vm365_vm0, %v308_v57  ;;  %4460 = vmatmul.mubr.msk.bf16.gmra.mrb[12].mxu1 %vm365_vm0, %v316_v58  ;;  %v3983_v57 = vld [vmem:[%s5605_s26 + $0x1a8] sm:$0xff]  ;;  %v4030_v58 = vld [vmem:[%s5605_s26 + $0x2a0] sm:$0xff] }
  0x74   : > { %4476 = vmatpush3.bf16.msra.mxu1 %v5672_v12  ;;  %4522 = vmatpush3.bf16.msra.mxu0 %v5672_v12  ;;  %v618_v62 = vpack.c.bf16 %v3983_v57, %v3982_v56  ;;  %v4065_v56 = vld [vmem:[%s5605_s26 + $0x338] sm:$0xff]  ;;  %v4112_v57 = vld [vmem:[%s5605_s26 + $0x430] sm:$0xff] }
  0x75   : > { %4477 = vmatprep.mubr.msk.bf16.mxu1 %vm365_vm0, %v608_v59  ;;  %4523 = vmatprep.mubr.msk.bf16.mxu0 %vm365_vm0, %v866_v60  ;;  %v4031_v59 = vld [vmem:[%s5605_s26 + $0x2a8] sm:$0xff]  ;;  %v617_v60 = vpack.c.bf16 %v3981_v53, %v3980_v52  ;;  %v1383_v52 = vpack.c.bf16 %v4109_v46, %v4108_v45  ;;  %v4130_v45 = vld [vmem:[%s5605_s26 + $0x4c0] sm:$0xff] }
  0x76   : > { %4555 = vmatprep.subr.bf16.mxu1 %v5614_v0  ;;  %4601 = vmatprep.subr.bf16.mxu0 %v5614_v0  ;;  %v876_v63 = vpack.c.bf16 %v4031_v59, %v4030_v58  ;;  %v4113_v58 = vld [vmem:[%s5605_s26 + $0x438] sm:$0xff]  ;;  %v4066_v59 = vld [vmem:[%s5605_s26 + $0x340] sm:$0xff]  ;;  %v4131_v46 = vld [vmem:[%s5605_s26 + $0x4c8] sm:$0xff] }
  0x7b   : > { %4478 = vmatmul.mubr.msk.bf16.vlgmr.msra.gmra.mrb[16].mxu1 %vm365_vm0, %v609_v9  ;;  %4524 = vmatmul.mubr.msk.bf16.vlgmr.msra.gmra.mrb[16].mxu0 %vm365_vm0, %v867_v13  ;;  %v3987_v9 = vld [vmem:[%s5605_s26 + $0x1c8] sm:$0xff]  ;;  %v4034_v13 = vld [vmem:[%s5605_s26 + $0x2c0] sm:$0xff] }
  0x7c   : > { %4556 = vmatpush3.bf16.msra.mxu1 %v5614_v0  ;;  %4602 = vmatpush3.bf16.msra.mxu0 %v5614_v0  ;;  %v620_v17 = vpack.c.bf16 %v3987_v9, %v3986_v8  ;;  %v4117_v8 = vld [vmem:[%s5605_s26 + $0x458] sm:$0xff]  ;;  %v4070_v9 = vld [vmem:[%s5605_s26 + $0x360] sm:$0xff] }
  0x7d   : > { %4481 = vmatprep.mubr.msk.bf16.mxu1 %vm365_vm0, %v610_v14  ;;  %4527 = vmatprep.mubr.msk.bf16.mxu0 %vm365_vm0, %v868_v15  ;;  %v4035_v14 = vld [vmem:[%s5605_s26 + $0x2c8] sm:$0xff]  ;;  %v619_v15 = vpack.c.bf16 %v3985_v4, %v3984_v3 }
  0x7e   : > { %4557 = vmatprep.subr.bf16.mxu1 %v5619_v1  ;;  %4603 = vmatprep.subr.bf16.mxu0 %v5619_v1  ;;  %v878_v18 = vpack.c.bf16 %v4035_v14, %v4034_v13  ;;  %v4071_v13 = vld [vmem:[%s5605_s26 + $0x368] sm:$0xff]  ;;  %v4118_v14 = vld [vmem:[%s5605_s26 + $0x460] sm:$0xff] }
  0x80   : > { %4558 = vmatpush3.bf16.msra.mxu1 %v5619_v1  ;;  %4604 = vmatpush3.bf16.msra.mxu0 %v5619_v1 }
  0x81   : > { %4559 = vmatprep.subr.bf16.mxu1 %v5630_v2  ;;  %4605 = vmatprep.subr.bf16.mxu0 %v5630_v2 }
  0x83   : > { %4482 = vmatmul.mubr.msk.bf16.gmra.mrb[20].mxu1 %vm365_vm0, %v611_v24  ;;  %4528 = vmatmul.mubr.msk.bf16.gmra.mrb[20].mxu0 %vm365_vm0, %v869_v25  ;;  %v3991_v24 = vld [vmem:[%s5605_s26 + $0x1e8] sm:$0xff]  ;;  %v4038_v25 = vld [vmem:[%s5605_s26 + $0x2e0] sm:$0xff] }
  0x84   : > { %4485 = vmatprep.mubr.msk.bf16.mxu1 %vm365_vm0, %v612_v26  ;;  %4531 = vmatprep.mubr.msk.bf16.mxu0 %vm365_vm0, %v870_v27  ;;  %v4039_v26 = vld [vmem:[%s5605_s26 + $0x2e8] sm:$0xff]  ;;  %v621_v27 = vpack.c.bf16 %v3989_v20, %v3988_v19  ;;  %v622_v29 = vpack.c.bf16 %v3991_v24, %v3990_v23  ;;  %v4073_v20 = vld [vmem:[%s5605_s26 + $0x378] sm:$0xff]  ;;  %v4074_v23 = vld [vmem:[%s5605_s26 + $0x380] sm:$0xff] }
  0x85   : > { %4560 = vmatpush3.bf16.msra.mxu1 %v5630_v2  ;;  %4606 = vmatpush3.bf16.msra.mxu0 %v5630_v2  ;;  %v880_v30 = vpack.c.bf16 %v4039_v26, %v4038_v25  ;;  %v4075_v24 = vld [vmem:[%s5605_s26 + $0x388] sm:$0xff]  ;;  %v4122_v25 = vld [vmem:[%s5605_s26 + $0x480] sm:$0xff] }
  0x86   : > { %4561 = vmatprep.subr.bf16.mxu1 %v5642_v6  ;;  %4607 = vmatprep.subr.bf16.mxu0 %v5642_v6 }
  0x89   : > { %4562 = vmatpush3.bf16.msra.mxu1 %v5642_v6  ;;  %4608 = vmatpush3.bf16.msra.mxu0 %v5642_v6 }
  0x8a   : > { %4563 = vmatprep.subr.bf16.mxu1 %v5653_v10  ;;  %4609 = vmatprep.subr.bf16.mxu0 %v5653_v10 }
  0x8b   : > { %4486 = vmatmul.mubr.msk.bf16.gmra.mrb[24].mxu1 %vm365_vm0, %v613_v36  ;;  %4532 = vmatmul.mubr.msk.bf16.gmra.mrb[24].mxu0 %vm365_vm0, %v871_v37  ;;  %v4059_v36 = vld [vmem:[%s5605_s26 + $0x308] sm:$0xff]  ;;  %v4106_v37 = vld [vmem:[%s5605_s26 + $0x400] sm:$0xff] }
  0x8c   : > { %4489 = vmatprep.mubr.msk.bf16.mxu1 %vm365_vm0, %v614_v38  ;;  %4535 = vmatprep.mubr.msk.bf16.mxu0 %vm365_vm0, %v872_v39  ;;  %v4107_v38 = vld [vmem:[%s5605_s26 + $0x408] sm:$0xff]  ;;  %v623_v39 = vpack.c.bf16 %v3993_v32, %v3992_v31  ;;  %v1124_v41 = vpack.c.bf16 %v4059_v36, %v4058_v35  ;;  %v4124_v31 = vld [vmem:[%s5605_s26 + $0x490] sm:$0xff]  ;;  %v4125_v32 = vld [vmem:[%s5605_s26 + $0x498] sm:$0xff] }
  0x8d   : > { %4564 = vmatpush3.bf16.msra.mxu1 %v5653_v10  ;;  %4610 = vmatpush3.bf16.msra.mxu0 %v5653_v10  ;;  %v1382_v42 = vpack.c.bf16 %v4107_v38, %v4106_v37  ;;  %v4127_v35 = vld [vmem:[%s5605_s26 + $0x4a8] sm:$0xff]  ;;  %v1391_v37 = vpack.c.bf16 %v4125_v32, %v4124_v31  ;;  %v4210_v31 = vld [vmem:[%s5605_s26 + $0x640] sm:$0xff] }
  0x8e   : > { %4565 = vmatprep.subr.bf16.mxu1 %v5663_v11  ;;  %4611 = vmatprep.subr.bf16.mxu0 %v5663_v11  ;;  %v4211_v32 = vld [vmem:[%s5605_s26 + $0x648] sm:$0xff] }
  0x91   : > { %4566 = vmatpush3.bf16.msra.mxu1 %v5663_v11  ;;  %4612 = vmatpush3.bf16.msra.mxu0 %v5663_v11 }
  0x92   : > { %4567 = vmatprep.subr.bf16.mxu1 %v5672_v12  ;;  %4613 = vmatprep.subr.bf16.mxu0 %v5672_v12 }
  0x93   : > { %4490 = vmatmul.mubr.msk.bf16.gmra.mrb[28].mxu1 %vm365_vm0, %v615_v48  ;;  %4536 = vmatmul.mubr.msk.bf16.gmra.mrb[28].mxu0 %vm365_vm0, %v873_v49  ;;  %v4063_v48 = vld [vmem:[%s5605_s26 + $0x328] sm:$0xff]  ;;  %v4110_v49 = vld [vmem:[%s5605_s26 + $0x420] sm:$0xff] }
  0x94   : > { %4493 = vmatprep.mubr.msk.bf16.mxu1 %vm365_vm0, %v616_v50  ;;  %4539 = vmatprep.mubr.msk.bf16.mxu0 %vm365_vm0, %v874_v51  ;;  %v4111_v50 = vld [vmem:[%s5605_s26 + $0x428] sm:$0xff]  ;;  %v1125_v51 = vpack.c.bf16 %v4061_v44, %v4060_v43  ;;  %v1126_v53 = vpack.c.bf16 %v4063_v48, %v4062_v47  ;;  %v4082_v43 = vld [vmem:[%s5605_s26 + $0x3c0] sm:$0xff] }
  0x95   : > { %4568 = vmatpush3.bf16.msra.mxu1 %v5672_v12  ;;  %4614 = vmatpush3.bf16.msra.mxu0 %v5672_v12  ;;  %v1384_v54 = vpack.c.bf16 %v4111_v50, %v4110_v49  ;;  %v4083_v44 = vld [vmem:[%s5605_s26 + $0x3c8] sm:$0xff]  ;;  %v1394_v50 = vpack.c.bf16 %v4131_v46, %v4130_v45 }
  0x96   : > { %4647 = vmatprep.subr.bf16.mxu1 %v5614_v0  ;;  %4693 = vmatprep.subr.bf16.mxu0 %v5614_v0  ;;  %v1136_v49 = vpack.c.bf16 %v4083_v44, %v4082_v43 }
  0x9b   : > { %4494 = vmatmul.mubr.msk.bf16.gmra.mrb[32].mxu1 %vm365_vm0, %v617_v60  ;;  %4540 = vmatmul.mubr.msk.bf16.gmra.mrb[32].mxu0 %vm365_vm0, %v875_v61  ;;  %v4067_v60 = vld [vmem:[%s5605_s26 + $0x348] sm:$0xff]  ;;  %v4114_v61 = vld [vmem:[%s5605_s26 + $0x440] sm:$0xff] }
  0x9c   : > { %4497 = vmatprep.mubr.msk.bf16.mxu1 %vm365_vm0, %v618_v62  ;;  %4543 = vmatprep.mubr.msk.bf16.mxu0 %vm365_vm0, %v876_v63  ;;  %v4115_v62 = vld [vmem:[%s5605_s26 + $0x448] sm:$0xff]  ;;  %v1127_v63 = vpack.c.bf16 %v4065_v56, %v4064_v55  ;;  %v1128_v3 = vpack.c.bf16 %v4067_v60, %v4066_v59  ;;  %v4086_v55 = vld [vmem:[%s5605_s26 + $0x3e0] sm:$0xff] }
  0x9d   : > { %v1386_v4 = vpack.c.bf16 %v4115_v62, %v4114_v61  ;;  %v4087_v56 = vld [vmem:[%s5605_s26 + $0x3e8] sm:$0xff] }
  0x9e   : > { %v1138_v61 = vpack.c.bf16 %v4087_v56, %v4086_v55 }
  0xa3   : > { %4498 = vmatmul.mubr.msk.bf16.gmra.mrb[36].mxu1 %vm365_vm0, %v619_v15  ;;  %4544 = vmatmul.mubr.msk.bf16.gmra.mrb[36].mxu0 %vm365_vm0, %v877_v16  ;;  %v4119_v15 = vld [vmem:[%s5605_s26 + $0x468] sm:$0xff]  ;;  %v1129_v16 = vpack.c.bf16 %v4069_v7, %v4068_v5  ;;  %v4154_v5 = vld [vmem:[%s5605_s26 + $0x500] sm:$0xff] }
  0xa4   : > { %4501 = vmatprep.mubr.msk.bf16.mxu1 %vm365_vm0, %v620_v17  ;;  %4547 = vmatprep.mubr.msk.bf16.mxu0 %vm365_vm0, %v878_v18  ;;  %v1130_v18 = vpack.c.bf16 %v4071_v13, %v4070_v9  ;;  %v1388_v19 = vpack.c.bf16 %v4119_v15, %v4118_v14  ;;  %v4155_v7 = vld [vmem:[%s5605_s26 + $0x508] sm:$0xff] }
  0xa5   : > { %v1640_v14 = vpack.c.bf16 %v4155_v7, %v4154_v5 }
  0xab   : > { %4502 = vmatmul.mubr.msk.bf16.gmra.mrb[40].mxu1 %vm365_vm0, %v621_v27  ;;  %4548 = vmatmul.mubr.msk.bf16.gmra.mrb[40].mxu0 %vm365_vm0, %v879_v28  ;;  %v1389_v27 = vpack.c.bf16 %v4121_v22, %v4120_v21  ;;  %v1132_v28 = vpack.c.bf16 %v4075_v24, %v4074_v23  ;;  %v4206_v21 = vld [vmem:[%s5605_s26 + $0x620] sm:$0xff]  ;;  %v4207_v22 = vld [vmem:[%s5605_s26 + $0x628] sm:$0xff] }
  0xac   : > { %4505 = vmatprep.mubr.msk.bf16.mxu1 %vm365_vm0, %v622_v29  ;;  %4551 = vmatprep.mubr.msk.bf16.mxu0 %vm365_vm0, %v880_v30  ;;  %v4077_v30 = vld [vmem:[%s5605_s26 + $0x398] sm:$0xff] }
  0xb3   : > { %4506 = vmatmul.mubr.msk.bf16.gmra.mrb[44].mxu1 %vm365_vm0, %v623_v39  ;;  %4552 = vmatmul.mubr.msk.bf16.gmra.mrb[44].mxu0 %vm365_vm0, %v881_v40  ;;  %v1392_v39 = vpack.c.bf16 %v4127_v35, %v4126_v34  ;;  %v4080_v40 = vld [vmem:[%s5605_s26 + $0x3b0] sm:$0xff]  ;;  %v1902_v35 = vpack.c.bf16 %v4211_v32, %v4210_v31 }
  0xb4   : > { %4569 = vmatprep.mubr.msk.bf16.mxu1 %vm365_vm0, %v1124_v41  ;;  %4615 = vmatprep.mubr.msk.bf16.mxu0 %vm365_vm0, %v1382_v42  ;;  %v4081_v41 = vld [vmem:[%s5605_s26 + $0x3b8] sm:$0xff]  ;;  %v4128_v42 = vld [vmem:[%s5605_s26 + $0x4b0] sm:$0xff] }
  0xb5   : > { %v1135_v47 = vpack.c.bf16 %v4081_v41, %v4080_v40  ;;  %v4166_v40 = vld [vmem:[%s5605_s26 + $0x560] sm:$0xff]  ;;  %v4167_v41 = vld [vmem:[%s5605_s26 + $0x568] sm:$0xff] }
  0xb6   : > { %v1646_v45 = vpack.c.bf16 %v4167_v41, %v4166_v40 }
  0xbb   : > { %4570 = vmatmul.mubr.msk.bf16.vlgmr.msra.gmra.mrb[48].mxu1 %vm365_vm0, %v1125_v51  ;;  %4616 = vmatmul.mubr.msk.bf16.vlgmr.msra.gmra.mrb[48].mxu0 %vm365_vm0, %v1383_v52  ;;  %v4084_v51 = vld [vmem:[%s5605_s26 + $0x3d0] sm:$0xff]  ;;  %v4085_v52 = vld [vmem:[%s5605_s26 + $0x3d8] sm:$0xff] }
  0xbc   : > { %4648 = vmatpush3.bf16.msra.mxu1 %v5614_v0  ;;  %4694 = vmatpush3.bf16.msra.mxu0 %v5614_v0  ;;  %v1385_v0 = vpack.c.bf16 %v4113_v58, %v4112_v57  ;;  %v4134_v57 = vld [vmem:[%s5605_s26 + $0x4e0] sm:$0xff]  ;;  %v4135_v58 = vld [vmem:[%s5605_s26 + $0x4e8] sm:$0xff]  ;;  %v1137_v59 = vpack.c.bf16 %v4085_v52, %v4084_v51 }
  0xbd   : > { %4573 = vmatprep.mubr.msk.bf16.mxu1 %vm365_vm0, %v1126_v53  ;;  %4619 = vmatprep.mubr.msk.bf16.mxu0 %vm365_vm0, %v1384_v54  ;;  %v4132_v53 = vld [vmem:[%s5605_s26 + $0x4d0] sm:$0xff]  ;;  %v4133_v54 = vld [vmem:[%s5605_s26 + $0x4d8] sm:$0xff]  ;;  %v1396_v62 = vpack.c.bf16 %v4135_v58, %v4134_v57  ;;  %v4170_v51 = vld [vmem:[%s5605_s26 + $0x580] sm:$0xff] }
  0xbe   : > { %4649 = vmatprep.subr.bf16.mxu1 %v5619_v1  ;;  %4695 = vmatprep.subr.bf16.mxu0 %v5619_v1  ;;  %v1395_v60 = vpack.c.bf16 %v4133_v54, %v4132_v53  ;;  %v4171_v52 = vld [vmem:[%s5605_s26 + $0x588] sm:$0xff]  ;;  %v4218_v53 = vld [vmem:[%s5605_s26 + $0x680] sm:$0xff] }
  0xbf   : > { %v4219_v54 = vld [vmem:[%s5605_s26 + $0x688] sm:$0xff]  ;;  %v1648_v57 = vpack.c.bf16 %v4171_v52, %v4170_v51 }
  0xc0   : > { %4650 = vmatpush3.bf16.msra.mxu1 %v5619_v1  ;;  %4696 = vmatpush3.bf16.msra.mxu0 %v5619_v1  ;;  %v4116_v1 = vld [vmem:[%s5605_s26 + $0x450] sm:$0xff]  ;;  %v1906_v58 = vpack.c.bf16 %v4219_v54, %v4218_v53 }
  0xc1   : > { %4651 = vmatprep.subr.bf16.mxu1 %v5630_v2  ;;  %4697 = vmatprep.subr.bf16.mxu0 %v5630_v2  ;;  %v1387_v17 = vpack.c.bf16 %v4117_v8, %v4116_v1  ;;  %v4202_v1 = vld [vmem:[%s5605_s26 + $0x600] sm:$0xff]  ;;  %v4203_v8 = vld [vmem:[%s5605_s26 + $0x608] sm:$0xff] }
  0xc2   : > { %v1898_v15 = vpack.c.bf16 %v4203_v8, %v4202_v1 }
  0xc3   : > { %4574 = vmatmul.mubr.msk.bf16.gmra.mrb[52].mxu1 %vm365_vm0, %v1127_v63  ;;  %4620 = vmatmul.mubr.msk.bf16.gmra.mrb[52].mxu0 %vm365_vm0, %v1385_v0  ;;  %v4088_v63 = vld [vmem:[%s5605_s26 + $0x3f0] sm:$0xff]  ;;  %v4089_v0 = vld [vmem:[%s5605_s26 + $0x3f8] sm:$0xff] }
  0xc4   : > { %4577 = vmatprep.mubr.msk.bf16.mxu1 %vm365_vm0, %v1128_v3  ;;  %4623 = vmatprep.mubr.msk.bf16.mxu0 %vm365_vm0, %v1386_v4  ;;  %v4136_v3 = vld [vmem:[%s5605_s26 + $0x4f0] sm:$0xff]  ;;  %v4137_v4 = vld [vmem:[%s5605_s26 + $0x4f8] sm:$0xff]  ;;  %v1139_v9 = vpack.c.bf16 %v4089_v0, %v4088_v63  ;;  %v4174_v63 = vld [vmem:[%s5605_s26 + $0x5a0] sm:$0xff] }
  0xc5   : > { %4652 = vmatpush3.bf16.msra.mxu1 %v5630_v2  ;;  %4698 = vmatpush3.bf16.msra.mxu0 %v5630_v2  ;;  %v4072_v2 = vld [vmem:[%s5605_s26 + $0x370] sm:$0xff]  ;;  %v1397_v13 = vpack.c.bf16 %v4137_v4, %v4136_v3  ;;  %v4175_v0 = vld [vmem:[%s5605_s26 + $0x5a8] sm:$0xff]  ;;  %v4222_v3 = vld [vmem:[%s5605_s26 + $0x6a0] sm:$0xff] }
  0xc6   : > { %4653 = vmatprep.subr.bf16.mxu1 %v5642_v6  ;;  %4699 = vmatprep.subr.bf16.mxu0 %v5642_v6  ;;  %v1131_v26 = vpack.c.bf16 %v4073_v20, %v4072_v2  ;;  %v4158_v2 = vld [vmem:[%s5605_s26 + $0x520] sm:$0xff]  ;;  %v4159_v20 = vld [vmem:[%s5605_s26 + $0x528] sm:$0xff]  ;;  %v1650_v1 = vpack.c.bf16 %v4175_v0, %v4174_v63 }
  0xc7   : > { %v4223_v4 = vld [vmem:[%s5605_s26 + $0x6a8] sm:$0xff] }
  0xc8   : > { %v1908_v8 = vpack.c.bf16 %v4223_v4, %v4222_v3 }
  0xc9   : > { %4654 = vmatpush3.bf16.msra.mxu1 %v5642_v6  ;;  %4700 = vmatpush3.bf16.msra.mxu0 %v5642_v6  ;;  %v4123_v6 = vld [vmem:[%s5605_s26 + $0x488] sm:$0xff] }
  0xca   : > { %4655 = vmatprep.subr.bf16.mxu1 %v5653_v10  ;;  %4701 = vmatprep.subr.bf16.mxu0 %v5653_v10  ;;  %v1390_v29 = vpack.c.bf16 %v4123_v6, %v4122_v25  ;;  %v1642_v25 = vpack.c.bf16 %v4159_v20, %v4158_v2  ;;  %v1900_v6 = vpack.c.bf16 %v4207_v22, %v4206_v21 }
  0xcb   : > { %4578 = vmatmul.mubr.msk.bf16.gmra.mrb[56].mxu1 %vm365_vm0, %v1129_v16  ;;  %4624 = vmatmul.mubr.msk.bf16.gmra.mrb[56].mxu0 %vm365_vm0, %v1387_v17  ;;  %v4156_v16 = vld [vmem:[%s5605_s26 + $0x510] sm:$0xff]  ;;  %v4157_v17 = vld [vmem:[%s5605_s26 + $0x518] sm:$0xff] }
  0xcc   : > { %4581 = vmatprep.mubr.msk.bf16.mxu1 %vm365_vm0, %v1130_v18  ;;  %4627 = vmatprep.mubr.msk.bf16.mxu0 %vm365_vm0, %v1388_v19  ;;  %v4204_v18 = vld [vmem:[%s5605_s26 + $0x610] sm:$0xff]  ;;  %v4205_v19 = vld [vmem:[%s5605_s26 + $0x618] sm:$0xff]  ;;  %v1641_v23 = vpack.c.bf16 %v4157_v17, %v4156_v16  ;;  %v4178_v16 = vld [vmem:[%s5605_s26 + $0x5c0] sm:$0xff] }
  0xcd   : > { %4656 = vmatpush3.bf16.msra.mxu1 %v5653_v10  ;;  %4702 = vmatpush3.bf16.msra.mxu0 %v5653_v10  ;;  %v4076_v10 = vld [vmem:[%s5605_s26 + $0x390] sm:$0xff]  ;;  %v1899_v24 = vpack.c.bf16 %v4205_v19, %v4204_v18  ;;  %v4179_v17 = vld [vmem:[%s5605_s26 + $0x5c8] sm:$0xff]  ;;  %v4226_v18 = vld [vmem:[%s5605_s26 + $0x6c0] sm:$0xff] }
  0xce   : > { %4657 = vmatprep.subr.bf16.mxu1 %v5663_v11  ;;  %4703 = vmatprep.subr.bf16.mxu0 %v5663_v11  ;;  %v1133_v36 = vpack.c.bf16 %v4077_v30, %v4076_v10  ;;  %v4162_v10 = vld [vmem:[%s5605_s26 + $0x540] sm:$0xff]  ;;  %v4163_v30 = vld [vmem:[%s5605_s26 + $0x548] sm:$0xff]  ;;  %v1652_v21 = vpack.c.bf16 %v4179_v17, %v4178_v16 }
  0xcf   : > { %v1644_v34 = vpack.c.bf16 %v4163_v30, %v4162_v10  ;;  %v4227_v19 = vld [vmem:[%s5605_s26 + $0x6c8] sm:$0xff] }
  0xd0   : > { %v1910_v22 = vpack.c.bf16 %v4227_v19, %v4226_v18 }
  0xd1   : > { %4658 = vmatpush3.bf16.msra.mxu1 %v5663_v11  ;;  %4704 = vmatpush3.bf16.msra.mxu0 %v5663_v11  ;;  %v4079_v11 = vld [vmem:[%s5605_s26 + $0x3a8] sm:$0xff] }
  0xd2   : > { %4659 = vmatprep.subr.bf16.mxu1 %v5672_v12  ;;  %4705 = vmatprep.subr.bf16.mxu0 %v5672_v12  ;;  %v1134_v38 = vpack.c.bf16 %v4079_v11, %v4078_v33 }
  0xd3   : > { %4582 = vmatmul.mubr.msk.bf16.gmra.mrb[60].mxu1 %vm365_vm0, %v1131_v26  ;;  %4628 = vmatmul.mubr.msk.bf16.gmra.mrb[60].mxu0 %vm365_vm0, %v1389_v27  ;;  %v4160_v26 = vld [vmem:[%s5605_s26 + $0x530] sm:$0xff]  ;;  %v4161_v27 = vld [vmem:[%s5605_s26 + $0x538] sm:$0xff] }
  0xd4   : > { %4585 = vmatprep.mubr.msk.bf16.mxu1 %vm365_vm0, %v1132_v28  ;;  %4631 = vmatprep.mubr.msk.bf16.mxu0 %vm365_vm0, %v1390_v29  ;;  %v4208_v28 = vld [vmem:[%s5605_s26 + $0x630] sm:$0xff]  ;;  %v4209_v29 = vld [vmem:[%s5605_s26 + $0x638] sm:$0xff]  ;;  %v1643_v33 = vpack.c.bf16 %v4161_v27, %v4160_v26  ;;  %v4182_v26 = vld [vmem:[%s5605_s26 + $0x5e0] sm:$0xff] }
  0xd5   : > { %4660 = vmatpush3.bf16.msra.mxu1 %v5672_v12  ;;  %4706 = vmatpush3.bf16.msra.mxu0 %v5672_v12  ;;  %v4129_v12 = vld [vmem:[%s5605_s26 + $0x4b8] sm:$0xff]  ;;  %v1901_v11 = vpack.c.bf16 %v4209_v29, %v4208_v28  ;;  %v4183_v27 = vld [vmem:[%s5605_s26 + $0x5e8] sm:$0xff]  ;;  %v4230_v28 = vld [vmem:[%s5605_s26 + $0x6e0] sm:$0xff] }
  0xd6   : > { %v1393_v48 = vpack.c.bf16 %v4129_v12, %v4128_v42  ;;  %v4214_v42 = vld [vmem:[%s5605_s26 + $0x660] sm:$0xff]  ;;  %v4215_v12 = vld [vmem:[%s5605_s26 + $0x668] sm:$0xff]  ;;  %v1654_v31 = vpack.c.bf16 %v4183_v27, %v4182_v26 }
  0xd7   : > { %v1904_v46 = vpack.c.bf16 %v4215_v12, %v4214_v42  ;;  %v4231_v29 = vld [vmem:[%s5605_s26 + $0x6e8] sm:$0xff] }
  0xd8   : > { %v1912_v32 = vpack.c.bf16 %v4231_v29, %v4230_v28 }
  0xdb   : > { %4586 = vmatmul.mubr.msk.bf16.gmra.mrb[64].mxu1 %vm365_vm0, %v1133_v36  ;;  %4632 = vmatmul.mubr.msk.bf16.gmra.mrb[64].mxu0 %vm365_vm0, %v1391_v37  ;;  %v4164_v36 = vld [vmem:[%s5605_s26 + $0x550] sm:$0xff]  ;;  %v4165_v37 = vld [vmem:[%s5605_s26 + $0x558] sm:$0xff] }
  0xdc   : > { %4589 = vmatprep.mubr.msk.bf16.mxu1 %vm365_vm0, %v1134_v38  ;;  %4635 = vmatprep.mubr.msk.bf16.mxu0 %vm365_vm0, %v1392_v39  ;;  %v4212_v38 = vld [vmem:[%s5605_s26 + $0x650] sm:$0xff]  ;;  %v4213_v39 = vld [vmem:[%s5605_s26 + $0x658] sm:$0xff]  ;;  %v1645_v43 = vpack.c.bf16 %v4165_v37, %v4164_v36 }
  0xdd   : > { %v1903_v44 = vpack.c.bf16 %v4213_v39, %v4212_v38 }
  0xe3   : > { %4590 = vmatmul.mubr.msk.bf16.gmra.mrb[68].mxu1 %vm365_vm0, %v1135_v47  ;;  %4636 = vmatmul.mubr.msk.bf16.gmra.mrb[68].mxu0 %vm365_vm0, %v1393_v48  ;;  %v4168_v47 = vld [vmem:[%s5605_s26 + $0x570] sm:$0xff]  ;;  %v4169_v48 = vld [vmem:[%s5605_s26 + $0x578] sm:$0xff] }
  0xe4   : > { %4593 = vmatprep.mubr.msk.bf16.mxu1 %vm365_vm0, %v1136_v49  ;;  %4639 = vmatprep.mubr.msk.bf16.mxu0 %vm365_vm0, %v1394_v50  ;;  %v4216_v49 = vld [vmem:[%s5605_s26 + $0x670] sm:$0xff]  ;;  %v4217_v50 = vld [vmem:[%s5605_s26 + $0x678] sm:$0xff]  ;;  %v1647_v55 = vpack.c.bf16 %v4169_v48, %v4168_v47 }
  0xe5   : > { %v1905_v56 = vpack.c.bf16 %v4217_v50, %v4216_v49 }
  0xeb   : > { %4594 = vmatmul.mubr.msk.bf16.gmra.mrb[72].mxu1 %vm365_vm0, %v1137_v59  ;;  %4640 = vmatmul.mubr.msk.bf16.gmra.mrb[72].mxu0 %vm365_vm0, %v1395_v60  ;;  %v4172_v59 = vld [vmem:[%s5605_s26 + $0x590] sm:$0xff]  ;;  %v4173_v60 = vld [vmem:[%s5605_s26 + $0x598] sm:$0xff] }
  0xec   : > { %4597 = vmatprep.mubr.msk.bf16.mxu1 %vm365_vm0, %v1138_v61  ;;  %4643 = vmatprep.mubr.msk.bf16.mxu0 %vm365_vm0, %v1396_v62  ;;  %v4220_v61 = vld [vmem:[%s5605_s26 + $0x690] sm:$0xff]  ;;  %v4221_v62 = vld [vmem:[%s5605_s26 + $0x698] sm:$0xff]  ;;  %v1649_v5 = vpack.c.bf16 %v4173_v60, %v4172_v59 }
  0xed   : > { %v1907_v7 = vpack.c.bf16 %v4221_v62, %v4220_v61 }
  0xf3   : > { %4598 = vmatmul.mubr.msk.bf16.gmra.mrb[76].mxu1 %vm365_vm0, %v1139_v9  ;;  %4644 = vmatmul.mubr.msk.bf16.gmra.mrb[76].mxu0 %vm365_vm0, %v1397_v13  ;;  %v4176_v9 = vld [vmem:[%s5605_s26 + $0x5b0] sm:$0xff]  ;;  %v4177_v13 = vld [vmem:[%s5605_s26 + $0x5b8] sm:$0xff] }
  0xf4   : > { %4661 = vmatprep.mubr.msk.bf16.mxu1 %vm365_vm0, %v1640_v14  ;;  %4707 = vmatprep.mubr.msk.bf16.mxu0 %vm365_vm0, %v1898_v15  ;;  %v4224_v14 = vld [vmem:[%s5605_s26 + $0x6b0] sm:$0xff]  ;;  %v4225_v15 = vld [vmem:[%s5605_s26 + $0x6b8] sm:$0xff]  ;;  %v1651_v2 = vpack.c.bf16 %v4177_v13, %v4176_v9 }
  0xf5   : > { %v1909_v20 = vpack.c.bf16 %v4225_v15, %v4224_v14 }
  0xfb   : > { %4662 = vmatmul.mubr.msk.bf16.vlgmr.msra.gmra.mrb[80].mxu1 %vm365_vm0, %v1641_v23  ;;  %4708 = vmatmul.mubr.msk.bf16.vlgmr.msra.gmra.mrb[80].mxu0 %vm365_vm0, %v1899_v24  ;;  %v4180_v23 = vld [vmem:[%s5605_s26 + $0x5d0] sm:$0xff]  ;;  %v4181_v24 = vld [vmem:[%s5605_s26 + $0x5d8] sm:$0xff] }
  0xfc   : > { %4665 = vmatprep.mubr.msk.bf16.mxu1 %vm365_vm0, %v1642_v25  ;;  %4711 = vmatprep.mubr.msk.bf16.mxu0 %vm365_vm0, %v1900_v6  ;;  %v4228_v25 = vld [vmem:[%s5605_s26 + $0x6d0] sm:$0xff]  ;;  %v4229_v6 = vld [vmem:[%s5605_s26 + $0x6d8] sm:$0xff]  ;;  %v1653_v10 = vpack.c.bf16 %v4181_v24, %v4180_v23 }
  0xfd   : > { %v1911_v30 = vpack.c.bf16 %v4229_v6, %v4228_v25 }
 0x103   : > { %4666 = vmatmul.mubr.msk.bf16.gmra.mrb[84].mxu1 %vm365_vm0, %v1643_v33  ;;  %4712 = vmatmul.mubr.msk.bf16.gmra.mrb[84].mxu0 %vm365_vm0, %v1901_v11  ;;  %v4184_v33 = vld [vmem:[%s5605_s26 + $0x5f0] sm:$0xff]  ;;  %v4185_v11 = vld [vmem:[%s5605_s26 + $0x5f8] sm:$0xff] }
 0x104   : > { %4669 = vmatprep.mubr.msk.bf16.mxu1 %vm365_vm0, %v1644_v34  ;;  %4715 = vmatprep.mubr.msk.bf16.mxu0 %vm365_vm0, %v1902_v35  ;;  %v4232_v34 = vld [vmem:[%s5605_s26 + $0x6f0] sm:$0xff]  ;;  %v4233_v35 = vld [vmem:[%s5605_s26 + $0x6f8] sm:$0xff]  ;;  %v1655_v40 = vpack.c.bf16 %v4185_v11, %v4184_v33  ;;  %s3794_s26 = scalar_lea.sflag [#allocation4], %s5601_s22 }
 0x105   : > { %v1913_v41 = vpack.c.bf16 %v4233_v35, %v4232_v34 }
 0x10b   : > { %4670 = vmatmul.mubr.msk.bf16.gmra.mrb[88].mxu1 %vm365_vm0, %v1645_v43  ;;  %4716 = vmatmul.mubr.msk.bf16.gmra.mrb[88].mxu0 %vm365_vm0, %v1903_v44 }
 0x10c   : > { %4673 = vmatprep.mubr.msk.bf16.mxu1 %vm365_vm0, %v1646_v45  ;;  %4719 = vmatprep.mubr.msk.bf16.mxu0 %vm365_vm0, %v1904_v46 }
 0x113   : > { %4674 = vmatmul.mubr.msk.bf16.gmra.mrb[92].mxu1 %vm365_vm0, %v1647_v55  ;;  %4720 = vmatmul.mubr.msk.bf16.gmra.mrb[92].mxu0 %vm365_vm0, %v1905_v56 }
 0x114   : > { %4677 = vmatprep.mubr.msk.bf16.mxu1 %vm365_vm0, %v1648_v57  ;;  %4723 = vmatprep.mubr.msk.bf16.mxu0 %vm365_vm0, %v1906_v58 }
 0x11b   : > { %4678 = vmatmul.mubr.msk.bf16.gmra.mrb[96].mxu1 %vm365_vm0, %v1649_v5  ;;  %4724 = vmatmul.mubr.msk.bf16.gmra.mrb[96].mxu0 %vm365_vm0, %v1907_v7 }
 0x11c   : > { %4681 = vmatprep.mubr.msk.bf16.mxu1 %vm365_vm0, %v1650_v1  ;;  %4727 = vmatprep.mubr.msk.bf16.mxu0 %vm365_vm0, %v1908_v8  ;;  %v6147_v1 = vld [vmem:[%s8269_s2] ss:$0 sm:$0xff] }
 0x123   : > { %4682 = vmatmul.mubr.msk.bf16.gmra.mrb[100].mxu1 %vm365_vm0, %v1651_v2  ;;  %4728 = vmatmul.mubr.msk.bf16.gmra.mrb[100].mxu0 %vm365_vm0, %v1909_v20 }
 0x124   : > { %4685 = vmatprep.mubr.msk.bf16.mxu1 %vm365_vm0, %v1652_v21  ;;  %4731 = vmatprep.mubr.msk.bf16.mxu0 %vm365_vm0, %v1910_v22 }
 0x12b   : > { %4686 = vmatmul.mubr.msk.bf16.gmra.mrb[104].mxu1 %vm365_vm0, %v1653_v10  ;;  %4732 = vmatmul.mubr.msk.bf16.gmra.mrb[104].mxu0 %vm365_vm0, %v1911_v30 }
 0x12c   : > { %4689 = vmatprep.mubr.msk.bf16.mxu1 %vm365_vm0, %v1654_v31  ;;  %4735 = vmatprep.mubr.msk.bf16.mxu0 %vm365_vm0, %v1912_v32 }
 0x12e   : > { %v4433_v36 = vpop.f32.mrb[0].mxu0  ;;  %v6092_v37 = vpop.f32.mrb[0].mxu1 }
 0x12f   : > { %v448_v38 = vpop.f32.mrb[1].mxu0  ;;  %v6094_v39 = vpop.f32.mrb[1].mxu1  ;;  %v6150_v13 = vadd.f32 %v4433_v36, %v6147_v1 }
 0x130   : > { %v4434_v42 = vpop.f32.mrb[2].mxu0  ;;  %v6096_v12 = vpop.f32.mrb[2].mxu1  ;;  %v6159_v18 = vadd.f32 %v6147_v1, %v448_v38 }
 0x131   : > { %v451_v43 = vpop.f32.mrb[3].mxu0  ;;  %v6098_v44 = vpop.f32.mrb[3].mxu1  ;;  %v6168_v22 = vadd.f32 %v4434_v42, %v6147_v1 }
 0x132   : > { %v6176_v26 = vadd.f32 %v6147_v1, %v451_v43 }
 0x133   : > { %4690 = vmatmul.mubr.msk.bf16.gmra.mrb[108].mxu1 %vm365_vm0, %v1655_v40  ;;  %4736 = vmatmul.mubr.msk.bf16.gmra.mrb[108].mxu0 %vm365_vm0, %v1913_v41 }
 0x136   : > { %v4437_v45 = vpop.f32.mrb[4].mxu0  ;;  %v6102_v46 = vpop.f32.mrb[4].mxu1 }
 0x137   : > { %v464_v47 = vpop.f32.mrb[5].mxu0  ;;  %v6104_v48 = vpop.f32.mrb[5].mxu1  ;;  %v6206_v38 = vadd.f32 %v4437_v45, %v6147_v1 }
 0x138   : > { %v4438_v49 = vpop.f32.mrb[6].mxu0  ;;  %v6106_v50 = vpop.f32.mrb[6].mxu1 }
 0x139   : > { %v6108_v51 = vpop.f32.mrb[7].mxu0  ;;  %v6110_v52 = vpop.f32.mrb[7].mxu1  ;;  %8568 = vst [vmem:[#allocation10_spill] sm:$0xff] %v6206_v38 }
 0x13e   : > { %v6112_v53 = vpop.f32.mrb[8].mxu0  ;;  %v6114_v54 = vpop.f32.mrb[8].mxu1 }
 0x13f   : > { %v6116_v55 = vpop.f32.mrb[9].mxu0  ;;  %v6118_v56 = vpop.f32.mrb[9].mxu1 }
 0x140   : > { %v6120_v57 = vpop.f32.mrb[10].mxu0  ;;  %v6122_v58 = vpop.f32.mrb[10].mxu1 }
 0x141   : > { %v6124_v59 = vpop.f32.mrb[11].mxu0  ;;  %v6126_v60 = vpop.f32.mrb[11].mxu1 }
 0x146   : > { %v6128_v61 = vpop.f32.mrb[12].mxu0  ;;  %v6130_v62 = vpop.f32.mrb[12].mxu1 }
 0x147   : > { %v6132_v63 = vpop.f32.mrb[13].mxu0  ;;  %v6134_v0 = vpop.f32.mrb[13].mxu1 }
 0x148   : > { %v6136_v3 = vpop.f32.mrb[14].mxu0  ;;  %v6138_v4 = vpop.f32.mrb[14].mxu1 }
 0x149   : > { %v6140_v5 = vpop.f32.mrb[15].mxu0  ;;  %v6142_v7 = vpop.f32.mrb[15].mxu1 }
 0x14e   : > { %v4479_v8 = vpop.f32.mrb[16].mxu1  ;;  %v4525_v9 = vpop.f32.mrb[16].mxu0 }
 0x14f   : > { %v6153_v14 = vadd.f32 %v4479_v8, %v6147_v1  ;;  %v6156_v15 = vadd.f32 %v4525_v9, %v6147_v1  ;;  %v706_v16 = vpop.f32.mrb[17].mxu1  ;;  %v964_v17 = vpop.f32.mrb[17].mxu0  ;;  %v6215_v8 = vadd.f32 %v6147_v1, %v464_v47 }
 0x150   : > { %v6162_v19 = vadd.f32 %v6147_v1, %v706_v16  ;;  %v6165_v2 = vadd.f32 %v6147_v1, %v964_v17  ;;  %v4480_v20 = vpop.f32.mrb[18].mxu1  ;;  %v4526_v21 = vpop.f32.mrb[18].mxu0 }
 0x151   : > { %v2125_v23 = vmax.f32 %v6150_v13, %v6153_v14  ;;  %v6173_v24 = vadd.f32 %v4480_v20, %v6147_v1  ;;  %v709_v25 = vpop.f32.mrb[19].mxu1  ;;  %v967_v6 = vpop.f32.mrb[19].mxu0  ;;  %v6189_v30 = vadd.f32 %v4526_v21, %v6147_v1  ;;  %8571 = vst [vmem:[#allocation13_spill] sm:$0xff] %v6215_v8  ;;  %v6224_v20 = vadd.f32 %v4438_v49, %v6147_v1 }
 0x152   : > { %v2123_v27 = vmax.f32 %v6159_v18, %v6162_v19  ;;  %v6181_v28 = vadd.f32 %v6147_v1, %v709_v25  ;;  %v6197_v33 = vadd.f32 %v6147_v1, %v967_v6  ;;  %v6233_v6 = vadd.f32 %v6147_v1, %v6108_v51 }
 0x153   : > { %v6184_v29 = vmax.f32 %v2125_v23, %v6156_v15  ;;  %v2126_v10 = vmax.f32 %v6168_v22, %v6173_v24  ;;  %8574 = vst [vmem:[#allocation16_spill] sm:$0xff] %v6224_v20 }
 0x154   : > { %8566 = vst [vmem:[#allocation8_spill] sm:$0xff] %v6181_v28  ;;  %v6192_v31 = vmax.f32 %v2123_v27, %v6165_v2  ;;  %v2124_v32 = vmax.f32 %v6176_v26, %v6181_v28  ;;  %8567 = vst [vmem:[#allocation9_spill] sm:$0xff] %v6197_v33 }
 0x155   : > { %v6200_v11 = vmax.f32 %v2126_v10, %v6189_v30  ;;  %8576 = vst [vmem:[#allocation18_spill] sm:$0xff] %v6233_v6 }
 0x156   : > { %v6203_v34 = vmax.f32 %v2124_v32, %v6197_v33  ;;  %v4483_v35 = vpop.f32.mrb[20].mxu1  ;;  %v4529_v36 = vpop.f32.mrb[20].mxu0 }
 0x157   : > { %v6209_v40 = vadd.f32 %v4483_v35, %v6147_v1  ;;  %v6212_v41 = vadd.f32 %v4529_v36, %v6147_v1  ;;  %v722_v42 = vpop.f32.mrb[21].mxu1  ;;  %v980_v43 = vpop.f32.mrb[21].mxu0 }
 0x158   : > { %v6218_v9 = vadd.f32 %v6147_v1, %v722_v42  ;;  %v6221_v16 = vadd.f32 %v6147_v1, %v980_v43  ;;  %v4484_v17 = vpop.f32.mrb[22].mxu1  ;;  %v4530_v45 = vpop.f32.mrb[22].mxu0 }
 0x159   : > { %8569 = vst [vmem:[#allocation11_spill] sm:$0xff] %v6209_v40  ;;  %8570 = vst [vmem:[#allocation12_spill] sm:$0xff] %v6212_v41  ;;  %v2129_v21 = vmax.f32 %v6206_v38, %v6209_v40  ;;  %v6229_v23 = vadd.f32 %v4484_v17, %v6147_v1  ;;  %v725_v25 = vpop.f32.mrb[23].mxu1  ;;  %v983_v47 = vpop.f32.mrb[23].mxu0  ;;  %v6246_v35 = vadd.f32 %v4530_v45, %v6147_v1 }
 0x15a   : > { %8572 = vst [vmem:[#allocation14_spill] sm:$0xff] %v6218_v9  ;;  %8573 = vst [vmem:[#allocation15_spill] sm:$0xff] %v6221_v16  ;;  %v2127_v27 = vmax.f32 %v6215_v8, %v6218_v9  ;;  %v6238_v10 = vadd.f32 %v6147_v1, %v725_v25  ;;  %v6254_v42 = vadd.f32 %v6147_v1, %v983_v47 }
 0x15b   : > { %8575 = vst [vmem:[#allocation17_spill] sm:$0xff] %v6229_v23  ;;  %v6241_v49 = vmax.f32 %v2129_v21, %v6212_v41  ;;  %v2130_v32 = vmax.f32 %v6224_v20, %v6229_v23  ;;  %8578 = vst [vmem:[#allocation20_spill] sm:$0xff] %v6246_v35  ;;  %v6264_v45 = vadd.f32 %v6112_v53, %v6147_v1 }
 0x15c   : > { %8577 = vst [vmem:[#allocation19_spill] sm:$0xff] %v6238_v10  ;;  %v6249_v36 = vmax.f32 %v2127_v27, %v6221_v16  ;;  %v2128_v51 = vmax.f32 %v6233_v6, %v6238_v10  ;;  %8579 = vst [vmem:[#allocation21_spill] sm:$0xff] %v6254_v42 }
 0x15d   : > { %v6257_v43 = vmax.f32 %v2130_v32, %v6246_v35  ;;  %8580 = vst [vmem:[#allocation22_spill] sm:$0xff] %v6264_v45  ;;  %v6274_v32 = vadd.f32 %v6147_v1, %v6116_v55 }
 0x15e   : > { %v6260_v17 = vmax.f32 %v2128_v51, %v6254_v42  ;;  %v4487_v21 = vpop.f32.mrb[24].mxu1  ;;  %v4533_v25 = vpop.f32.mrb[24].mxu0 }
 0x15f   : > { %v6267_v27 = vadd.f32 %v4487_v21, %v6147_v1  ;;  %v6270_v10 = vadd.f32 %v4533_v25, %v6147_v1  ;;  %v738_v47 = vpop.f32.mrb[25].mxu1  ;;  %v996_v6 = vpop.f32.mrb[25].mxu0  ;;  %8583 = vst [vmem:[#allocation25_spill] sm:$0xff] %v6274_v32  ;;  %v6284_v21 = vadd.f32 %v6120_v57, %v6147_v1 }
 0x160   : > { %v6277_v51 = vadd.f32 %v6147_v1, %v738_v47  ;;  %v6280_v42 = vadd.f32 %v6147_v1, %v996_v6  ;;  %v4488_v53 = vpop.f32.mrb[26].mxu1  ;;  %v4534_v35 = vpop.f32.mrb[26].mxu0  ;;  %v6293_v47 = vadd.f32 %v6147_v1, %v6124_v59 }
 0x161   : > { %8581 = vst [vmem:[#allocation23_spill] sm:$0xff] %v6267_v27  ;;  %8582 = vst [vmem:[#allocation24_spill] sm:$0xff] %v6270_v10  ;;  %v2133_v25 = vmax.f32 %v6264_v45, %v6267_v27  ;;  %v6289_v23 = vadd.f32 %v4488_v53, %v6147_v1  ;;  %v741_v55 = vpop.f32.mrb[27].mxu1  ;;  %v999_v20 = vpop.f32.mrb[27].mxu0  ;;  %v6306_v53 = vadd.f32 %v4534_v35, %v6147_v1 }
 0x162   : > { %8584 = vst [vmem:[#allocation26_spill] sm:$0xff] %v6277_v51  ;;  %8585 = vst [vmem:[#allocation27_spill] sm:$0xff] %v6280_v42  ;;  %v2131_v6 = vmax.f32 %v6274_v32, %v6277_v51  ;;  %v6298_v16 = vadd.f32 %v6147_v1, %v741_v55  ;;  %v6314_v51 = vadd.f32 %v6147_v1, %v999_v20 }
 0x163   : > { %8586 = vst [vmem:[#allocation28_spill] sm:$0xff] %v6284_v21  ;;  %8587 = vst [vmem:[#allocation29_spill] sm:$0xff] %v6289_v23  ;;  %v6301_v57 = vmax.f32 %v2133_v25, %v6270_v10  ;;  %v2134_v27 = vmax.f32 %v6284_v21, %v6289_v23  ;;  %v6324_v35 = vadd.f32 %v6128_v61, %v6147_v1 }
 0x164   : > { %8588 = vst [vmem:[#allocation30_spill] sm:$0xff] %v6293_v47  ;;  %8589 = vst [vmem:[#allocation31_spill] sm:$0xff] %v6298_v16  ;;  %v6309_v45 = vmax.f32 %v2131_v6, %v6280_v42  ;;  %v2132_v59 = vmax.f32 %v6293_v47, %v6298_v16 }
 0x165   : > { %8590 = vst [vmem:[#allocation32_spill] sm:$0xff] %v6306_v53  ;;  %8591 = vst [vmem:[#allocation33_spill] sm:$0xff] %v6314_v51  ;;  %v6317_v55 = vmax.f32 %v2134_v27, %v6306_v53  ;;  %v6334_v27 = vadd.f32 %v6147_v1, %v6132_v63 }
 0x166   : > { %v6320_v25 = vmax.f32 %v2132_v59, %v6314_v51  ;;  %v4491_v32 = vpop.f32.mrb[28].mxu1  ;;  %v4537_v23 = vpop.f32.mrb[28].mxu0  ;;  %8592 = vst [vmem:[#allocation34_spill] sm:$0xff] %v6324_v35 }
 0x167   : > { %v6327_v6 = vadd.f32 %v4491_v32, %v6147_v1  ;;  %v6330_v16 = vadd.f32 %v4537_v23, %v6147_v1  ;;  %v754_v20 = vpop.f32.mrb[29].mxu1  ;;  %v1012_v47 = vpop.f32.mrb[29].mxu0  ;;  %8595 = vst [vmem:[#allocation37_spill] sm:$0xff] %v6334_v27  ;;  %v6344_v32 = vadd.f32 %v6136_v3, %v6147_v1 }
 0x168   : > { %v6337_v59 = vadd.f32 %v6147_v1, %v754_v20  ;;  %v6340_v51 = vadd.f32 %v6147_v1, %v1012_v47  ;;  %v4492_v61 = vpop.f32.mrb[30].mxu1  ;;  %v4538_v53 = vpop.f32.mrb[30].mxu0  ;;  %v6353_v20 = vadd.f32 %v6147_v1, %v6140_v5 }
 0x169   : > { %8593 = vst [vmem:[#allocation35_spill] sm:$0xff] %v6327_v6  ;;  %8594 = vst [vmem:[#allocation36_spill] sm:$0xff] %v6330_v16  ;;  %v2137_v23 = vmax.f32 %v6324_v35, %v6327_v6  ;;  %v6349_v21 = vadd.f32 %v4492_v61, %v6147_v1  ;;  %v757_v63 = vpop.f32.mrb[31].mxu1  ;;  %v1015_v42 = vpop.f32.mrb[31].mxu0  ;;  %v6366_v61 = vadd.f32 %v4538_v53, %v6147_v1 }
 0x16a   : > { %8596 = vst [vmem:[#allocation38_spill] sm:$0xff] %v6337_v59  ;;  %8597 = vst [vmem:[#allocation39_spill] sm:$0xff] %v6340_v51  ;;  %v2135_v47 = vmax.f32 %v6334_v27, %v6337_v59  ;;  %v6358_v10 = vadd.f32 %v6147_v1, %v757_v63  ;;  %v6374_v59 = vadd.f32 %v6147_v1, %v1015_v42 }
 0x16b   : > { %8598 = vst [vmem:[#allocation40_spill] sm:$0xff] %v6344_v32  ;;  %8599 = vst [vmem:[#allocation41_spill] sm:$0xff] %v6349_v21  ;;  %v6361_v3 = vmax.f32 %v2137_v23, %v6330_v16  ;;  %v2138_v6 = vmax.f32 %v6344_v32, %v6349_v21  ;;  %v6384_v53 = vadd.f32 %v6092_v37, %v6147_v1 }
 0x16c   : > { %8600 = vst [vmem:[#allocation42_spill] sm:$0xff] %v6353_v20  ;;  %8601 = vst [vmem:[#allocation43_spill] sm:$0xff] %v6358_v10  ;;  %v6369_v35 = vmax.f32 %v2135_v47, %v6340_v51  ;;  %v2136_v5 = vmax.f32 %v6353_v20, %v6358_v10 }
 0x16d   : > { %8602 = vst [vmem:[#allocation44_spill] sm:$0xff] %v6366_v61  ;;  %8603 = vst [vmem:[#allocation45_spill] sm:$0xff] %v6374_v59  ;;  %v6377_v63 = vmax.f32 %v2138_v6, %v6366_v61  ;;  %v6394_v6 = vadd.f32 %v6147_v1, %v6094_v39 }
 0x16e   : > { %v6380_v23 = vmax.f32 %v2136_v5, %v6374_v59  ;;  %v4495_v27 = vpop.f32.mrb[32].mxu1  ;;  %v4541_v21 = vpop.f32.mrb[32].mxu0  ;;  %8604 = vst [vmem:[#allocation46_spill] sm:$0xff] %v6384_v53 }
 0x16f   : > { %v6387_v47 = vadd.f32 %v4495_v27, %v6147_v1  ;;  %v6390_v10 = vadd.f32 %v4541_v21, %v6147_v1  ;;  %v770_v42 = vpop.f32.mrb[33].mxu1  ;;  %v1028_v20 = vpop.f32.mrb[33].mxu0  ;;  %8607 = vst [vmem:[#allocation49_spill] sm:$0xff] %v6394_v6  ;;  %v6404_v27 = vadd.f32 %v6096_v12, %v6147_v1 }
 0x170   : > { %v6397_v5 = vadd.f32 %v6147_v1, %v770_v42  ;;  %v6400_v59 = vadd.f32 %v6147_v1, %v1028_v20  ;;  %v4496_v37 = vpop.f32.mrb[34].mxu1  ;;  %v4542_v61 = vpop.f32.mrb[34].mxu0  ;;  %v6413_v42 = vadd.f32 %v6147_v1, %v6098_v44 }
 0x171   : > { %8605 = vst [vmem:[#allocation47_spill] sm:$0xff] %v6387_v47  ;;  %8606 = vst [vmem:[#allocation48_spill] sm:$0xff] %v6390_v10  ;;  %v2141_v21 = vmax.f32 %v6384_v53, %v6387_v47  ;;  %v6409_v32 = vadd.f32 %v4496_v37, %v6147_v1  ;;  %v773_v39 = vpop.f32.mrb[35].mxu1  ;;  %v1031_v51 = vpop.f32.mrb[35].mxu0  ;;  %v6426_v37 = vadd.f32 %v4542_v61, %v6147_v1 }
 0x172   : > { %8608 = vst [vmem:[#allocation50_spill] sm:$0xff] %v6397_v5  ;;  %8609 = vst [vmem:[#allocation51_spill] sm:$0xff] %v6400_v59  ;;  %v2139_v20 = vmax.f32 %v6394_v6, %v6397_v5  ;;  %v6418_v16 = vadd.f32 %v6147_v1, %v773_v39  ;;  %v6434_v5 = vadd.f32 %v6147_v1, %v1031_v51 }
 0x173   : > { %8610 = vst [vmem:[#allocation52_spill] sm:$0xff] %v6404_v27  ;;  %8611 = vst [vmem:[#allocation53_spill] sm:$0xff] %v6409_v32  ;;  %v6421_v12 = vmax.f32 %v2141_v21, %v6390_v10  ;;  %v2142_v47 = vmax.f32 %v6404_v27, %v6409_v32  ;;  %v6444_v61 = vadd.f32 %v6102_v46, %v6147_v1 }
 0x174   : > { %8612 = vst [vmem:[#allocation54_spill] sm:$0xff] %v6413_v42  ;;  %8613 = vst [vmem:[#allocation55_spill] sm:$0xff] %v6418_v16  ;;  %v6429_v53 = vmax.f32 %v2139_v20, %v6400_v59  ;;  %v2140_v44 = vmax.f32 %v6413_v42, %v6418_v16 }
 0x175   : > { %8614 = vst [vmem:[#allocation56_spill] sm:$0xff] %v6426_v37  ;;  %8615 = vst [vmem:[#allocation57_spill] sm:$0xff] %v6434_v5  ;;  %v6437_v39 = vmax.f32 %v2142_v47, %v6426_v37  ;;  %v6454_v47 = vadd.f32 %v6147_v1, %v6104_v48 }
 0x176   : > { %v6440_v21 = vmax.f32 %v2140_v44, %v6434_v5  ;;  %v4499_v6 = vpop.f32.mrb[36].mxu1  ;;  %v4545_v32 = vpop.f32.mrb[36].mxu0  ;;  %8616 = vst [vmem:[#allocation58_spill] sm:$0xff] %v6444_v61 }
 0x177   : > { %v6447_v20 = vadd.f32 %v4499_v6, %v6147_v1  ;;  %v6450_v16 = vadd.f32 %v4545_v32, %v6147_v1  ;;  %v786_v51 = vpop.f32.mrb[37].mxu1  ;;  %v1044_v42 = vpop.f32.mrb[37].mxu0  ;;  %8619 = vst [vmem:[#allocation61_spill] sm:$0xff] %v6454_v47  ;;  %v6464_v6 = vadd.f32 %v6106_v50, %v6147_v1 }
 0x178   : > { %v6457_v44 = vadd.f32 %v6147_v1, %v786_v51  ;;  %v6460_v5 = vadd.f32 %v6147_v1, %v1044_v42  ;;  %v4500_v46 = vpop.f32.mrb[38].mxu1  ;;  %v4546_v37 = vpop.f32.mrb[38].mxu0  ;;  %v6473_v51 = vadd.f32 %v6147_v1, %v6110_v52 }
 0x179   : > { %8617 = vst [vmem:[#allocation59_spill] sm:$0xff] %v6447_v20  ;;  %8618 = vst [vmem:[#allocation60_spill] sm:$0xff] %v6450_v16  ;;  %v2145_v32 = vmax.f32 %v6444_v61, %v6447_v20  ;;  %v6469_v27 = vadd.f32 %v4500_v46, %v6147_v1  ;;  %v789_v48 = vpop.f32.mrb[39].mxu1  ;;  %v1047_v59 = vpop.f32.mrb[39].mxu0  ;;  %v6486_v46 = vadd.f32 %v4546_v37, %v6147_v1 }
 0x17a   : > { %8620 = vst [vmem:[#allocation62_spill] sm:$0xff] %v6457_v44  ;;  %8621 = vst [vmem:[#allocation63_spill] sm:$0xff] %v6460_v5  ;;  %v2143_v42 = vmax.f32 %v6454_v47, %v6457_v44  ;;  %v6478_v10 = vadd.f32 %v6147_v1, %v789_v48  ;;  %v6494_v44 = vadd.f32 %v6147_v1, %v1047_v59 }
 0x17b   : > { %8622 = vst [vmem:[#allocation64_spill] sm:$0xff] %v6464_v6  ;;  %8623 = vst [vmem:[#allocation65_spill] sm:$0xff] %v6469_v27  ;;  %v6481_v50 = vmax.f32 %v2145_v32, %v6450_v16  ;;  %v2146_v20 = vmax.f32 %v6464_v6, %v6469_v27  ;;  %v6504_v37 = vadd.f32 %v6114_v54, %v6147_v1 }
 0x17c   : > { %8624 = vst [vmem:[#allocation66_spill] sm:$0xff] %v6473_v51  ;;  %8625 = vst [vmem:[#allocation67_spill] sm:$0xff] %v6478_v10  ;;  %v6489_v61 = vmax.f32 %v2143_v42, %v6460_v5  ;;  %v2144_v52 = vmax.f32 %v6473_v51, %v6478_v10 }
 0x17d   : > { %8626 = vst [vmem:[#allocation68_spill] sm:$0xff] %v6486_v46  ;;  %8627 = vst [vmem:[#allocation69_spill] sm:$0xff] %v6494_v44  ;;  %v6497_v48 = vmax.f32 %v2146_v20, %v6486_v46  ;;  %v6514_v20 = vadd.f32 %v6147_v1, %v6118_v56 }
 0x17e   : > { %v6500_v32 = vmax.f32 %v2144_v52, %v6494_v44  ;;  %v4503_v47 = vpop.f32.mrb[40].mxu1  ;;  %v4549_v27 = vpop.f32.mrb[40].mxu0  ;;  %8628 = vst [vmem:[#allocation70_spill] sm:$0xff] %v6504_v37 }
 0x17f   : > { %v6507_v42 = vadd.f32 %v4503_v47, %v6147_v1  ;;  %v6510_v10 = vadd.f32 %v4549_v27, %v6147_v1  ;;  %v802_v59 = vpop.f32.mrb[41].mxu1  ;;  %v1060_v51 = vpop.f32.mrb[41].mxu0  ;;  %8631 = vst [vmem:[#allocation73_spill] sm:$0xff] %v6514_v20  ;;  %v6524_v47 = vadd.f32 %v6122_v58, %v6147_v1 }
 0x180   : > { %v6517_v52 = vadd.f32 %v6147_v1, %v802_v59  ;;  %v6520_v44 = vadd.f32 %v6147_v1, %v1060_v51  ;;  %v4504_v54 = vpop.f32.mrb[42].mxu1  ;;  %v4550_v46 = vpop.f32.mrb[42].mxu0  ;;  %v6533_v59 = vadd.f32 %v6147_v1, %v6126_v60 }
 0x181   : > { %8629 = vst [vmem:[#allocation71_spill] sm:$0xff] %v6507_v42  ;;  %8630 = vst [vmem:[#allocation72_spill] sm:$0xff] %v6510_v10  ;;  %v2149_v27 = vmax.f32 %v6504_v37, %v6507_v42  ;;  %v6529_v6 = vadd.f32 %v4504_v54, %v6147_v1  ;;  %v805_v56 = vpop.f32.mrb[43].mxu1  ;;  %v1063_v5 = vpop.f32.mrb[43].mxu0  ;;  %v6546_v54 = vadd.f32 %v4550_v46, %v6147_v1 }
 0x182   : > { %8632 = vst [vmem:[#allocation74_spill] sm:$0xff] %v6517_v52  ;;  %8633 = vst [vmem:[#allocation75_spill] sm:$0xff] %v6520_v44  ;;  %v2147_v51 = vmax.f32 %v6514_v20, %v6517_v52  ;;  %v6538_v16 = vadd.f32 %v6147_v1, %v805_v56  ;;  %v6554_v52 = vadd.f32 %v6147_v1, %v1063_v5 }
 0x183   : > { %8634 = vst [vmem:[#allocation76_spill] sm:$0xff] %v6524_v47  ;;  %8635 = vst [vmem:[#allocation77_spill] sm:$0xff] %v6529_v6  ;;  %v6541_v58 = vmax.f32 %v2149_v27, %v6510_v10  ;;  %v2150_v42 = vmax.f32 %v6524_v47, %v6529_v6  ;;  %v6564_v46 = vadd.f32 %v6130_v62, %v6147_v1 }
 0x184   : > { %8636 = vst [vmem:[#allocation78_spill] sm:$0xff] %v6533_v59  ;;  %8637 = vst [vmem:[#allocation79_spill] sm:$0xff] %v6538_v16  ;;  %v6549_v37 = vmax.f32 %v2147_v51, %v6520_v44  ;;  %v2148_v60 = vmax.f32 %v6533_v59, %v6538_v16 }
 0x185   : > { %8638 = vst [vmem:[#allocation80_spill] sm:$0xff] %v6546_v54  ;;  %8639 = vst [vmem:[#allocation81_spill] sm:$0xff] %v6554_v52  ;;  %v6557_v56 = vmax.f32 %v2150_v42, %v6546_v54  ;;  %v6574_v42 = vadd.f32 %v6147_v1, %v6134_v0 }
 0x186   : > { %v6560_v27 = vmax.f32 %v2148_v60, %v6554_v52  ;;  %v4507_v20 = vpop.f32.mrb[44].mxu1  ;;  %v4553_v6 = vpop.f32.mrb[44].mxu0  ;;  %8640 = vst [vmem:[#allocation82_spill] sm:$0xff] %v6564_v46 }
 0x187   : > { %v6567_v51 = vadd.f32 %v4507_v20, %v6147_v1  ;;  %v6570_v16 = vadd.f32 %v4553_v6, %v6147_v1  ;;  %v818_v5 = vpop.f32.mrb[45].mxu1  ;;  %v1076_v59 = vpop.f32.mrb[45].mxu0  ;;  %8643 = vst [vmem:[#allocation85_spill] sm:$0xff] %v6574_v42  ;;  %v6584_v20 = vadd.f32 %v6138_v4, %v6147_v1 }
 0x188   : > { %v6577_v60 = vadd.f32 %v6147_v1, %v818_v5  ;;  %v6580_v52 = vadd.f32 %v6147_v1, %v1076_v59  ;;  %v4508_v62 = vpop.f32.mrb[46].mxu1  ;;  %v4554_v54 = vpop.f32.mrb[46].mxu0  ;;  %v6593_v5 = vadd.f32 %v6147_v1, %v6142_v7 }
 0x189   : > { %8641 = vst [vmem:[#allocation83_spill] sm:$0xff] %v6567_v51  ;;  %8642 = vst [vmem:[#allocation84_spill] sm:$0xff] %v6570_v16  ;;  %v2153_v6 = vmax.f32 %v6564_v46, %v6567_v51  ;;  %v6589_v47 = vadd.f32 %v4508_v62, %v6147_v1  ;;  %v821_v0 = vpop.f32.mrb[47].mxu1  ;;  %v1079_v44 = vpop.f32.mrb[47].mxu0  ;;  %v6606_v62 = vadd.f32 %v4554_v54, %v6147_v1 }
 0x18a   : > { %8644 = vst [vmem:[#allocation86_spill] sm:$0xff] %v6577_v60  ;;  %8645 = vst [vmem:[#allocation87_spill] sm:$0xff] %v6580_v52  ;;  %v2151_v59 = vmax.f32 %v6574_v42, %v6577_v60  ;;  %v6598_v10 = vadd.f32 %v6147_v1, %v821_v0  ;;  %v6614_v60 = vadd.f32 %v6147_v1, %v1079_v44 }
 0x18b   : > { %8646 = vst [vmem:[#allocation88_spill] sm:$0xff] %v6584_v20  ;;  %8647 = vst [vmem:[#allocation89_spill] sm:$0xff] %v6589_v47  ;;  %v6601_v4 = vmax.f32 %v2153_v6, %v6570_v16  ;;  %v2154_v51 = vmax.f32 %v6584_v20, %v6589_v47 }
 0x18c   : > { %8648 = vst [vmem:[#allocation90_spill] sm:$0xff] %v6593_v5  ;;  %8649 = vst [vmem:[#allocation91_spill] sm:$0xff] %v6598_v10  ;;  %v6609_v46 = vmax.f32 %v2151_v59, %v6580_v52  ;;  %v2152_v7 = vmax.f32 %v6593_v5, %v6598_v10 }
 0x18d   : > { %8650 = vst [vmem:[#allocation92_spill] sm:$0xff] %v6606_v62  ;;  %8651 = vst [vmem:[#allocation93_spill] sm:$0xff] %v6614_v60  ;;  %v6617_v0 = vmax.f32 %v2154_v51, %v6606_v62 }
 0x18e   : > { %v6620_v6 = vmax.f32 %v2152_v7, %v6614_v60  ;;  %v4571_v42 = vpop.f32.mrb[48].mxu1  ;;  %v4617_v47 = vpop.f32.mrb[48].mxu0 }
 0x18f   : > { %v6623_v54 = vadd.f32 %v4571_v42, %v6147_v1  ;;  %v6626_v59 = vadd.f32 %v4617_v47, %v6147_v1  ;;  %v1222_v20 = vpop.f32.mrb[49].mxu1  ;;  %v1480_v52 = vpop.f32.mrb[49].mxu0 }
 0x190   : > { %v6629_v10 = vadd.f32 %v6147_v1, %v1222_v20  ;;  %v6632_v44 = vadd.f32 %v6147_v1, %v1480_v52  ;;  %v4572_v51 = vpop.f32.mrb[50].mxu1  ;;  %v4618_v5 = vpop.f32.mrb[50].mxu0 }
 0x191   : > { %v2189_v7 = vmax.f32 %v6184_v29, %v6623_v54  ;;  %v6637_v60 = vadd.f32 %v4572_v51, %v6147_v1  ;;  %v1225_v42 = vpop.f32.mrb[51].mxu1  ;;  %v1483_v62 = vpop.f32.mrb[51].mxu0  ;;  %v6650_v9 = vadd.f32 %v4618_v5, %v6147_v1 }
 0x192   : > { %v2187_v47 = vmax.f32 %v6192_v31, %v6629_v10  ;;  %v6642_v16 = vadd.f32 %v6147_v1, %v1225_v42  ;;  %v6658_v31 = vadd.f32 %v6147_v1, %v1483_v62 }
 0x193   : > { %v6645_v20 = vmax.f32 %v2189_v7, %v6626_v59  ;;  %v2190_v52 = vmax.f32 %v6200_v11, %v6637_v60 }
 0x194   : > { %8652 = vst [vmem:[#allocation94_spill] sm:$0xff] %v6642_v16  ;;  %v6653_v29 = vmax.f32 %v2187_v47, %v6632_v44  ;;  %v2188_v51 = vmax.f32 %v6203_v34, %v6642_v16  ;;  %8653 = vst [vmem:[#allocation95_spill] sm:$0xff] %v6658_v31 }
 0x195   : > { %v6661_v42 = vmax.f32 %v2190_v52, %v6650_v9 }
 0x196   : > { %v6664_v7 = vmax.f32 %v2188_v51, %v6658_v31  ;;  %v4575_v8 = vpop.f32.mrb[52].mxu1  ;;  %v4621_v11 = vpop.f32.mrb[52].mxu0 }
 0x197   : > { %v6667_v5 = vadd.f32 %v4575_v8, %v6147_v1  ;;  %v6670_v47 = vadd.f32 %v4621_v11, %v6147_v1  ;;  %v1238_v41 = vpop.f32.mrb[53].mxu1  ;;  %v1496_v40 = vpop.f32.mrb[53].mxu0 }
 0x198   : > { %v6673_v34 = vadd.f32 %v6147_v1, %v1238_v41  ;;  %v6676_v62 = vadd.f32 %v6147_v1, %v1496_v40  ;;  %v4576_v52 = vpop.f32.mrb[54].mxu1  ;;  %v4622_v38 = vpop.f32.mrb[54].mxu0 }
 0x199   : > { %v2193_v51 = vmax.f32 %v6241_v49, %v6667_v5  ;;  %v6681_v31 = vadd.f32 %v4576_v52, %v6147_v1  ;;  %v1241_v8 = vpop.f32.mrb[55].mxu1  ;;  %v1499_v16 = vpop.f32.mrb[55].mxu0  ;;  %v6694_v28 = vadd.f32 %v4622_v38, %v6147_v1 }
 0x19a   : > { %8654 = vst [vmem:[#allocation96_spill] sm:$0xff] %v6673_v34  ;;  %8655 = vst [vmem:[#allocation97_spill] sm:$0xff] %v6676_v62  ;;  %v2191_v11 = vmax.f32 %v6249_v36, %v6673_v34  ;;  %v6686_v33 = vadd.f32 %v6147_v1, %v1241_v8  ;;  %v6702_v36 = vadd.f32 %v6147_v1, %v1499_v16 }
 0x19b   : > { %8656 = vst [vmem:[#allocation98_spill] sm:$0xff] %v6681_v31  ;;  %v6689_v41 = vmax.f32 %v2193_v51, %v6670_v47  ;;  %v2194_v40 = vmax.f32 %v6257_v43, %v6681_v31  ;;  %8658 = vst [vmem:[#allocation100_spill] sm:$0xff] %v6694_v28 }
 0x19c   : > { %8657 = vst [vmem:[#allocation99_spill] sm:$0xff] %v6686_v33  ;;  %v6697_v49 = vmax.f32 %v2191_v11, %v6676_v62  ;;  %v2192_v52 = vmax.f32 %v6260_v17, %v6686_v33  ;;  %8660 = vst [vmem:[#allocation102_spill] sm:$0xff] %v6702_v36 }
 0x19d   : > { %v6705_v8 = vmax.f32 %v2194_v40, %v6694_v28 }
 0x19e   : > { %8659 = vst [vmem:[#allocation101_spill] sm:$0xff] %v6697_v49  ;;  %v6708_v51 = vmax.f32 %v2192_v52, %v6702_v36  ;;  %v4579_v34 = vpop.f32.mrb[56].mxu1  ;;  %v4625_v43 = vpop.f32.mrb[56].mxu0 }
 0x19f   : > { %8661 = vst [vmem:[#allocation103_spill] sm:$0xff] %v6705_v8  ;;  %v6711_v38 = vadd.f32 %v4579_v34, %v6147_v1  ;;  %v6714_v11 = vadd.f32 %v4625_v43, %v6147_v1  ;;  %v1254_v31 = vpop.f32.mrb[57].mxu1  ;;  %v1512_v62 = vpop.f32.mrb[57].mxu0 }
 0x1a0   : > { %8662 = vst [vmem:[#allocation104_spill] sm:$0xff] %v6708_v51  ;;  %v6717_v17 = vadd.f32 %v6147_v1, %v1254_v31  ;;  %v6720_v16 = vadd.f32 %v6147_v1, %v1512_v62  ;;  %v4580_v40 = vpop.f32.mrb[58].mxu1  ;;  %v4626_v33 = vpop.f32.mrb[58].mxu0 }
 0x1a1   : > { %8663 = vst [vmem:[#allocation105_spill] sm:$0xff] %v6711_v38  ;;  %8664 = vst [vmem:[#allocation106_spill] sm:$0xff] %v6714_v11  ;;  %v2197_v52 = vmax.f32 %v6301_v57, %v6711_v38  ;;  %v6725_v36 = vadd.f32 %v4580_v40, %v6147_v1  ;;  %v1257_v34 = vpop.f32.mrb[59].mxu1  ;;  %v1515_v28 = vpop.f32.mrb[59].mxu0  ;;  %v6738_v8 = vadd.f32 %v4626_v33, %v6147_v1 }
 0x1a2   : > { %8665 = vst [vmem:[#allocation107_spill] sm:$0xff] %v6717_v17  ;;  %8666 = vst [vmem:[#allocation108_spill] sm:$0xff] %v6720_v16  ;;  %v2195_v43 = vmax.f32 %v6309_v45, %v6717_v17  ;;  %v6730_v51 = vadd.f32 %v6147_v1, %v1257_v34  ;;  %v6746_v45 = vadd.f32 %v6147_v1, %v1515_v28 }
 0x1a3   : > { %8667 = vst [vmem:[#allocation109_spill] sm:$0xff] %v6725_v36  ;;  %v6733_v31 = vmax.f32 %v2197_v52, %v6714_v11  ;;  %v2198_v62 = vmax.f32 %v6317_v55, %v6725_v36  ;;  %8670 = vst [vmem:[#allocation112_spill] sm:$0xff] %v6738_v8 }
 0x1a4   : > { %8668 = vst [vmem:[#allocation110_spill] sm:$0xff] %v6730_v51  ;;  %v6741_v57 = vmax.f32 %v2195_v43, %v6720_v16  ;;  %v2196_v40 = vmax.f32 %v6320_v25, %v6730_v51  ;;  %8672 = vst [vmem:[#allocation114_spill] sm:$0xff] %v6746_v45 }
 0x1a5   : > { %8669 = vst [vmem:[#allocation111_spill] sm:$0xff] %v6733_v31  ;;  %v6749_v34 = vmax.f32 %v2198_v62, %v6738_v8 }
 0x1a6   : > { %8671 = vst [vmem:[#allocation113_spill] sm:$0xff] %v6741_v57  ;;  %v6752_v52 = vmax.f32 %v2196_v40, %v6746_v45  ;;  %v4583_v17 = vpop.f32.mrb[60].mxu1  ;;  %v4629_v55 = vpop.f32.mrb[60].mxu0 }
 0x1a7   : > { %8673 = vst [vmem:[#allocation115_spill] sm:$0xff] %v6749_v34  ;;  %v6755_v33 = vadd.f32 %v4583_v17, %v6147_v1  ;;  %v6758_v43 = vadd.f32 %v4629_v55, %v6147_v1  ;;  %v1270_v36 = vpop.f32.mrb[61].mxu1  ;;  %v1528_v16 = vpop.f32.mrb[61].mxu0 }
 0x1a8   : > { %8674 = vst [vmem:[#allocation116_spill] sm:$0xff] %v6752_v52  ;;  %v6761_v25 = vadd.f32 %v6147_v1, %v1270_v36  ;;  %v6764_v28 = vadd.f32 %v6147_v1, %v1528_v16  ;;  %v4584_v62 = vpop.f32.mrb[62].mxu1  ;;  %v4630_v51 = vpop.f32.mrb[62].mxu0 }
 0x1a9   : > { %8675 = vst [vmem:[#allocation117_spill] sm:$0xff] %v6755_v33  ;;  %8676 = vst [vmem:[#allocation118_spill] sm:$0xff] %v6758_v43  ;;  %v2201_v40 = vmax.f32 %v6361_v3, %v6755_v33  ;;  %v6769_v45 = vadd.f32 %v4584_v62, %v6147_v1  ;;  %v1273_v17 = vpop.f32.mrb[63].mxu1  ;;  %v1531_v8 = vpop.f32.mrb[63].mxu0  ;;  %v6782_v34 = vadd.f32 %v4630_v51, %v6147_v1 }
 0x1aa   : > { %8677 = vst [vmem:[#allocation119_spill] sm:$0xff] %v6761_v25  ;;  %8678 = vst [vmem:[#allocation120_spill] sm:$0xff] %v6764_v28  ;;  %v2199_v55 = vmax.f32 %v6369_v35, %v6761_v25  ;;  %v6774_v52 = vadd.f32 %v6147_v1, %v1273_v17  ;;  %v6790_v35 = vadd.f32 %v6147_v1, %v1531_v8 }
 0x1ab   : > { %8679 = vst [vmem:[#allocation121_spill] sm:$0xff] %v6769_v45  ;;  %v6777_v36 = vmax.f32 %v2201_v40, %v6758_v43  ;;  %v2202_v16 = vmax.f32 %v6377_v63, %v6769_v45  ;;  %8682 = vst [vmem:[#allocation124_spill] sm:$0xff] %v6782_v34 }
 0x1ac   : > { %8680 = vst [vmem:[#allocation122_spill] sm:$0xff] %v6774_v52  ;;  %v6785_v3 = vmax.f32 %v2199_v55, %v6764_v28  ;;  %v2200_v62 = vmax.f32 %v6380_v23, %v6774_v52  ;;  %8684 = vst [vmem:[#allocation126_spill] sm:$0xff] %v6790_v35 }
 0x1ad   : > { %8681 = vst [vmem:[#allocation123_spill] sm:$0xff] %v6777_v36  ;;  %v6793_v17 = vmax.f32 %v2202_v16, %v6782_v34 }
 0x1ae   : > { %8683 = vst [vmem:[#allocation125_spill] sm:$0xff] %v6785_v3  ;;  %v6796_v40 = vmax.f32 %v2200_v62, %v6790_v35  ;;  %v4587_v25 = vpop.f32.mrb[64].mxu1  ;;  %v4633_v63 = vpop.f32.mrb[64].mxu0 }
 0x1af   : > { %8685 = vst [vmem:[#allocation127_spill] sm:$0xff] %v6793_v17  ;;  %v6799_v51 = vadd.f32 %v4587_v25, %v6147_v1  ;;  %v6802_v55 = vadd.f32 %v4633_v63, %v6147_v1  ;;  %v1286_v45 = vpop.f32.mrb[65].mxu1  ;;  %v1544_v28 = vpop.f32.mrb[65].mxu0 }
 0x1b0   : > { %8686 = vst [vmem:[#allocation128_spill] sm:$0xff] %v6796_v40  ;;  %v6805_v23 = vadd.f32 %v6147_v1, %v1286_v45  ;;  %v6808_v8 = vadd.f32 %v6147_v1, %v1544_v28  ;;  %v4588_v16 = vpop.f32.mrb[66].mxu1  ;;  %v4634_v52 = vpop.f32.mrb[66].mxu0 }
 0x1b1   : > { %8687 = vst [vmem:[#allocation129_spill] sm:$0xff] %v6799_v51  ;;  %8688 = vst [vmem:[#allocation130_spill] sm:$0xff] %v6802_v55  ;;  %v2205_v62 = vmax.f32 %v6421_v12, %v6799_v51  ;;  %v6813_v35 = vadd.f32 %v4588_v16, %v6147_v1  ;;  %v1289_v25 = vpop.f32.mrb[67].mxu1  ;;  %v1547_v40 = vpop.f32.mrb[67].mxu0  ;;  %v6826_v17 = vadd.f32 %v4634_v52, %v6147_v1 }
 0x1b2   : > { %8689 = vst [vmem:[#allocation131_spill] sm:$0xff] %v6805_v23  ;;  %8690 = vst [vmem:[#allocation132_spill] sm:$0xff] %v6808_v8  ;;  %v2203_v63 = vmax.f32 %v6429_v53, %v6805_v23  ;;  %v6818_v34 = vadd.f32 %v6147_v1, %v1289_v25  ;;  %v6834_v53 = vadd.f32 %v6147_v1, %v1547_v40 }
 0x1b3   : > { %8691 = vst [vmem:[#allocation133_spill] sm:$0xff] %v6813_v35  ;;  %v6821_v45 = vmax.f32 %v2205_v62, %v6802_v55  ;;  %v2206_v28 = vmax.f32 %v6437_v39, %v6813_v35  ;;  %8694 = vst [vmem:[#allocation136_spill] sm:$0xff] %v6826_v17 }
 0x1b4   : > { %8692 = vst [vmem:[#allocation134_spill] sm:$0xff] %v6818_v34  ;;  %v6829_v12 = vmax.f32 %v2203_v63, %v6808_v8  ;;  %v2204_v16 = vmax.f32 %v6440_v21, %v6818_v34  ;;  %8696 = vst [vmem:[#allocation138_spill] sm:$0xff] %v6834_v53 }
 0x1b5   : > { %8693 = vst [vmem:[#allocation135_spill] sm:$0xff] %v6821_v45  ;;  %v6837_v25 = vmax.f32 %v2206_v28, %v6826_v17 }
 0x1b6   : > { %8695 = vst [vmem:[#allocation137_spill] sm:$0xff] %v6829_v12  ;;  %v6840_v62 = vmax.f32 %v2204_v16, %v6834_v53  ;;  %v4591_v23 = vpop.f32.mrb[68].mxu1  ;;  %v4637_v39 = vpop.f32.mrb[68].mxu0 }
 0x1b7   : > { %8697 = vst [vmem:[#allocation139_spill] sm:$0xff] %v6837_v25  ;;  %v6843_v52 = vadd.f32 %v4591_v23, %v6147_v1  ;;  %v6846_v63 = vadd.f32 %v4637_v39, %v6147_v1  ;;  %v1302_v35 = vpop.f32.mrb[69].mxu1  ;;  %v1560_v8 = vpop.f32.mrb[69].mxu0 }
 0x1b8   : > { %8698 = vst [vmem:[#allocation140_spill] sm:$0xff] %v6840_v62  ;;  %v6849_v21 = vadd.f32 %v6147_v1, %v1302_v35  ;;  %v6852_v40 = vadd.f32 %v6147_v1, %v1560_v8  ;;  %v4592_v28 = vpop.f32.mrb[70].mxu1  ;;  %v4638_v34 = vpop.f32.mrb[70].mxu0 }
 0x1b9   : > { %8699 = vst [vmem:[#allocation141_spill] sm:$0xff] %v6843_v52  ;;  %8700 = vst [vmem:[#allocation142_spill] sm:$0xff] %v6846_v63  ;;  %v2209_v16 = vmax.f32 %v6481_v50, %v6843_v52  ;;  %v6857_v53 = vadd.f32 %v4592_v28, %v6147_v1  ;;  %v1305_v23 = vpop.f32.mrb[71].mxu1  ;;  %v1563_v62 = vpop.f32.mrb[71].mxu0  ;;  %v6870_v25 = vadd.f32 %v4638_v34, %v6147_v1 }
 0x1ba   : > { %8701 = vst [vmem:[#allocation143_spill] sm:$0xff] %v6849_v21  ;;  %8702 = vst [vmem:[#allocation144_spill] sm:$0xff] %v6852_v40  ;;  %v2207_v39 = vmax.f32 %v6489_v61, %v6849_v21  ;;  %v6862_v17 = vadd.f32 %v6147_v1, %v1305_v23  ;;  %v6878_v61 = vadd.f32 %v6147_v1, %v1563_v62 }
 0x1bb   : > { %8703 = vst [vmem:[#allocation145_spill] sm:$0xff] %v6857_v53  ;;  %v6865_v35 = vmax.f32 %v2209_v16, %v6846_v63  ;;  %v2210_v8 = vmax.f32 %v6497_v48, %v6857_v53  ;;  %8706 = vst [vmem:[#allocation148_spill] sm:$0xff] %v6870_v25 }
 0x1bc   : > { %8704 = vst [vmem:[#allocation146_spill] sm:$0xff] %v6862_v17  ;;  %v6873_v50 = vmax.f32 %v2207_v39, %v6852_v40  ;;  %v2208_v28 = vmax.f32 %v6500_v32, %v6862_v17  ;;  %8708 = vst [vmem:[#allocation150_spill] sm:$0xff] %v6878_v61 }
 0x1bd   : > { %8705 = vst [vmem:[#allocation147_spill] sm:$0xff] %v6865_v35  ;;  %v6881_v23 = vmax.f32 %v2210_v8, %v6870_v25 }
 0x1be   : > { %8707 = vst [vmem:[#allocation149_spill] sm:$0xff] %v6873_v50  ;;  %v6884_v16 = vmax.f32 %v2208_v28, %v6878_v61  ;;  %v4595_v21 = vpop.f32.mrb[72].mxu1  ;;  %v4641_v48 = vpop.f32.mrb[72].mxu0 }
 0x1bf   : > { %8709 = vst [vmem:[#allocation151_spill] sm:$0xff] %v6881_v23  ;;  %v6887_v34 = vadd.f32 %v4595_v21, %v6147_v1  ;;  %v6890_v39 = vadd.f32 %v4641_v48, %v6147_v1  ;;  %v1318_v53 = vpop.f32.mrb[73].mxu1  ;;  %v1576_v40 = vpop.f32.mrb[73].mxu0 }
 0x1c0   : > { %8710 = vst [vmem:[#allocation152_spill] sm:$0xff] %v6884_v16  ;;  %v6893_v32 = vadd.f32 %v6147_v1, %v1318_v53  ;;  %v6896_v62 = vadd.f32 %v6147_v1, %v1576_v40  ;;  %v4596_v8 = vpop.f32.mrb[74].mxu1  ;;  %v4642_v17 = vpop.f32.mrb[74].mxu0 }
 0x1c1   : > { %8711 = vst [vmem:[#allocation153_spill] sm:$0xff] %v6887_v34  ;;  %8712 = vst [vmem:[#allocation154_spill] sm:$0xff] %v6890_v39  ;;  %v2213_v28 = vmax.f32 %v6541_v58, %v6887_v34  ;;  %v6901_v61 = vadd.f32 %v4596_v8, %v6147_v1  ;;  %v1321_v21 = vpop.f32.mrb[75].mxu1  ;;  %v1579_v16 = vpop.f32.mrb[75].mxu0  ;;  %v6914_v23 = vadd.f32 %v4642_v17, %v6147_v1 }
 0x1c2   : > { %8713 = vst [vmem:[#allocation155_spill] sm:$0xff] %v6893_v32  ;;  %8714 = vst [vmem:[#allocation156_spill] sm:$0xff] %v6896_v62  ;;  %v2211_v48 = vmax.f32 %v6549_v37, %v6893_v32  ;;  %v6906_v25 = vadd.f32 %v6147_v1, %v1321_v21  ;;  %v6922_v37 = vadd.f32 %v6147_v1, %v1579_v16 }
 0x1c3   : > { %8715 = vst [vmem:[#allocation157_spill] sm:$0xff] %v6901_v61  ;;  %v6909_v53 = vmax.f32 %v2213_v28, %v6890_v39  ;;  %v2214_v40 = vmax.f32 %v6557_v56, %v6901_v61  ;;  %8718 = vst [vmem:[#allocation160_spill] sm:$0xff] %v6914_v23 }
 0x1c4   : > { %8716 = vst [vmem:[#allocation158_spill] sm:$0xff] %v6906_v25  ;;  %v6917_v58 = vmax.f32 %v2211_v48, %v6896_v62  ;;  %v2212_v8 = vmax.f32 %v6560_v27, %v6906_v25  ;;  %8720 = vst [vmem:[#allocation162_spill] sm:$0xff] %v6922_v37 }
 0x1c5   : > { %8717 = vst [vmem:[#allocation159_spill] sm:$0xff] %v6909_v53  ;;  %v6925_v21 = vmax.f32 %v2214_v40, %v6914_v23 }
 0x1c6   : > { %8719 = vst [vmem:[#allocation161_spill] sm:$0xff] %v6917_v58  ;;  %v6928_v28 = vmax.f32 %v2212_v8, %v6922_v37  ;;  %v4599_v32 = vpop.f32.mrb[76].mxu1  ;;  %v4645_v56 = vpop.f32.mrb[76].mxu0 }
 0x1c7   : > { %8721 = vst [vmem:[#allocation163_spill] sm:$0xff] %v6925_v21  ;;  %v6931_v17 = vadd.f32 %v4599_v32, %v6147_v1  ;;  %v6934_v48 = vadd.f32 %v4645_v56, %v6147_v1  ;;  %v1334_v61 = vpop.f32.mrb[77].mxu1  ;;  %v1592_v62 = vpop.f32.mrb[77].mxu0 }
 0x1c8   : > { %8722 = vst [vmem:[#allocation164_spill] sm:$0xff] %v6928_v28  ;;  %v6937_v27 = vadd.f32 %v6147_v1, %v1334_v61  ;;  %v6940_v16 = vadd.f32 %v6147_v1, %v1592_v62  ;;  %v4600_v40 = vpop.f32.mrb[78].mxu1  ;;  %v4646_v25 = vpop.f32.mrb[78].mxu0 }
 0x1c9   : > { %8723 = vst [vmem:[#allocation165_spill] sm:$0xff] %v6931_v17  ;;  %8724 = vst [vmem:[#allocation166_spill] sm:$0xff] %v6934_v48  ;;  %v2217_v8 = vmax.f32 %v6601_v4, %v6931_v17  ;;  %v6945_v37 = vadd.f32 %v4600_v40, %v6147_v1  ;;  %v1337_v32 = vpop.f32.mrb[79].mxu1  ;;  %v1595_v28 = vpop.f32.mrb[79].mxu0  ;;  %v6958_v21 = vadd.f32 %v4646_v25, %v6147_v1 }
 0x1ca   : > { %8725 = vst [vmem:[#allocation167_spill] sm:$0xff] %v6937_v27  ;;  %8726 = vst [vmem:[#allocation168_spill] sm:$0xff] %v6940_v16  ;;  %v2215_v56 = vmax.f32 %v6609_v46, %v6937_v27  ;;  %v6950_v23 = vadd.f32 %v6147_v1, %v1337_v32  ;;  %v6966_v46 = vadd.f32 %v6147_v1, %v1595_v28 }
 0x1cb   : > { %8727 = vst [vmem:[#allocation169_spill] sm:$0xff] %v6945_v37  ;;  %v6953_v61 = vmax.f32 %v2217_v8, %v6934_v48  ;;  %v2218_v62 = vmax.f32 %v6617_v0, %v6945_v37  ;;  %8730 = vst [vmem:[#allocation172_spill] sm:$0xff] %v6958_v21 }
 0x1cc   : > { %8728 = vst [vmem:[#allocation170_spill] sm:$0xff] %v6950_v23  ;;  %v6961_v4 = vmax.f32 %v2215_v56, %v6940_v16  ;;  %v2216_v40 = vmax.f32 %v6620_v6, %v6950_v23  ;;  %8732 = vst [vmem:[#allocation174_spill] sm:$0xff] %v6966_v46 }
 0x1cd   : > { %8729 = vst [vmem:[#allocation171_spill] sm:$0xff] %v6953_v61  ;;  %v6969_v32 = vmax.f32 %v2218_v62, %v6958_v21 }
 0x1ce   : > { %8731 = vst [vmem:[#allocation173_spill] sm:$0xff] %v6961_v4  ;;  %v6972_v8 = vmax.f32 %v2216_v40, %v6966_v46  ;;  %v4663_v27 = vpop.f32.mrb[80].mxu1  ;;  %v4709_v0 = vpop.f32.mrb[80].mxu0 }
 0x1cf   : > { %8733 = vst [vmem:[#allocation175_spill] sm:$0xff] %v6969_v32  ;;  %v6975_v25 = vadd.f32 %v4663_v27, %v6147_v1  ;;  %v6978_v56 = vadd.f32 %v4709_v0, %v6147_v1  ;;  %v1738_v37 = vpop.f32.mrb[81].mxu1  ;;  %v1996_v16 = vpop.f32.mrb[81].mxu0 }
 0x1d0   : > { %8734 = vst [vmem:[#allocation176_spill] sm:$0xff] %v6972_v8  ;;  %v6981_v6 = vadd.f32 %v6147_v1, %v1738_v37  ;;  %v6984_v28 = vadd.f32 %v6147_v1, %v1996_v16  ;;  %v4664_v62 = vpop.f32.mrb[82].mxu1  ;;  %v4710_v23 = vpop.f32.mrb[82].mxu0 }
 0x1d1   : > { %v2253_v40 = vmax.f32 %v6645_v20, %v6975_v25  ;;  %v6989_v46 = vadd.f32 %v4664_v62, %v6147_v1  ;;  %v1741_v27 = vpop.f32.mrb[83].mxu1  ;;  %v1999_v21 = vpop.f32.mrb[83].mxu0  ;;  %v7001_v20 = vadd.f32 %v4710_v23, %v6147_v1 }
 0x1d2   : > { %v2251_v0 = vmax.f32 %v6653_v29, %v6981_v6  ;;  %v6994_v8 = vadd.f32 %v6147_v1, %v1741_v27  ;;  %v7006_v48 = vadd.f32 %v6147_v1, %v1999_v21 }
 0x1d3   : > { %v2285_v37 = vmax.f32 %v2253_v40, %v6978_v56  ;;  %v2254_v16 = vmax.f32 %v6661_v42, %v6989_v46 }
 0x1d4   : > { %v2283_v32 = vmax.f32 %v2251_v0, %v6984_v28  ;;  %v2252_v62 = vmax.f32 %v6664_v7, %v6994_v8 }
 0x1d5   : > { %v2317_v29 = vsub.f32 %v6150_v13, %v2285_v37  ;;  %v2509_v27 = vsub.f32 %v6153_v14, %v2285_v37  ;;  %v2701_v40 = vsub.f32 %v6156_v15, %v2285_v37  ;;  %v2893_v17 = vsub.f32 %v6623_v54, %v2285_v37 }
 0x1d6   : > { %v3085_v42 = vsub.f32 %v6626_v59, %v2285_v37  ;;  %v3277_v0 = vsub.f32 %v6975_v25, %v2285_v37  ;;  %v3469_v23 = vsub.f32 %v6978_v56, %v2285_v37  ;;  %v2315_v4 = vsub.f32 %v6159_v18, %v2283_v32  ;;  %v7016_v7 = vpop.f32.mrb[84].mxu1  ;;  %v7018_v1 = vpop.f32.mrb[84].mxu0 }
 0x1d7   : > { %v2351_v21 = vmul.f32 1.442695, %v2317_v29  ;;  %v2543_v61 = vmul.f32 1.442695, %v2509_v27  ;;  %v2735_v39 = vmul.f32 1.442695, %v2701_v40  ;;  %v2507_v34 = vsub.f32 %v6162_v19, %v2283_v32 }
 0x1d8   : > { %v2927_v58 = vmul.f32 1.442695, %v2893_v17  ;;  %v3119_v53 = vmul.f32 1.442695, %v3085_v42  ;;  %v3311_v50 = vmul.f32 1.442695, %v3277_v0  ;;  %v2699_v63 = vsub.f32 %v6165_v2, %v2283_v32 }
 0x1d9   : > { %4829 = vpow2.f32 %v2351_v21  ;;  %v3503_v52 = vmul.f32 1.442695, %v3469_v23  ;;  %v2347_v35 = vmul.f32 1.442695, %v2315_v4  ;;  %v2539_v37 = vmul.f32 1.442695, %v2507_v34 }
 0x1da   : > { %4831 = vpow2.f32 %v2543_v61  ;;  %v2731_v12 = vmul.f32 1.442695, %v2699_v63  ;;  %v2891_v55 = vsub.f32 %v6629_v10, %v2283_v32  ;;  %v3083_v51 = vsub.f32 %v6632_v44, %v2283_v32  ;;  %v7024_v29 = vpop.f32.mrb[85].mxu1  ;;  %v7026_v27 = vpop.f32.mrb[85].mxu0 }
 0x1db   : > { %8735 = vst [vmem:[#allocation177_spill] sm:$0xff] %v7026_v27  ;;  %4833 = vpow2.f32 %v2735_v39  ;;  %v3275_v17 = vsub.f32 %v6981_v6, %v2283_v32  ;;  %v3467_v40 = vsub.f32 %v6984_v28, %v2283_v32  ;;  %v2286_v42 = vmax.f32 %v2254_v16, %v7001_v20  ;;  %v7031_v0 = vpop.f32.mrb[86].mxu1  ;;  %v7033_v34 = vpop.f32.mrb[86].mxu0 }
 0x1dc   : > { %8736 = vst [vmem:[#allocation178_spill] sm:$0xff] %v7031_v0  ;;  %8737 = vst [vmem:[#allocation179_spill] sm:$0xff] %v7033_v34  ;;  %4835 = vpow2.f32 %v2927_v58  ;;  %v2923_v63 = vmul.f32 1.442695, %v2891_v55  ;;  %v3115_v61 = vmul.f32 1.442695, %v3083_v51  ;;  %v7036_v4 = vmax.f32 %v2252_v62, %v7006_v48 }
 0x1dd   : > { %v7038_v23 = vpop.f32.mrb[87].mxu1  ;;  %v7040_v21 = vpop.f32.mrb[87].mxu0  ;;  %4837 = vpow2.f32 %v3119_v53  ;;  %v3307_v39 = vmul.f32 1.442695, %v3275_v17  ;;  %v3499_v45 = vmul.f32 1.442695, %v3467_v40  ;;  %v2318_v32 = vsub.f32 %v6168_v22, %v2286_v42 }
 0x1de   : > { %8738 = vst [vmem:[#allocation180_spill] sm:$0xff] %v7038_v23  ;;  %8739 = vst [vmem:[#allocation181_spill] sm:$0xff] %v7040_v21  ;;  %4839 = vpow2.f32 %v3311_v50  ;;  %v2510_v16 = vsub.f32 %v6173_v24, %v2286_v42  ;;  %v2702_v43 = vsub.f32 %v6189_v30, %v2286_v42  ;;  %v2894_v55 = vsub.f32 %v6637_v60, %v2286_v42  ;;  %v7046_v51 = vpop.f32.mrb[88].mxu1  ;;  %v7048_v58 = vpop.f32.mrb[88].mxu0 }
 0x1df   : > { %8740 = vst [vmem:[#allocation182_spill] sm:$0xff] %v7046_v51  ;;  %8741 = vst [vmem:[#allocation183_spill] sm:$0xff] %v7048_v58  ;;  %4841 = vpow2.f32 %v3503_v52  ;;  %v2353_v62 = vmul.f32 1.442695, %v2318_v32  ;;  %v3086_v33 = vsub.f32 %v6650_v9, %v2286_v42  ;;  %v3278_v53 = vsub.f32 %v6989_v46, %v2286_v42  ;;  %v7052_v17 = vpop.f32.mrb[89].mxu1  ;;  %v7054_v40 = vpop.f32.mrb[89].mxu0 }
 0x1e0   : > { %8742 = vst [vmem:[#allocation184_spill] sm:$0xff] %v7052_v17  ;;  %8743 = vst [vmem:[#allocation185_spill] sm:$0xff] %v7054_v40  ;;  %4843 = vpow2.f32 %v2347_v35  ;;  %v2545_v50 = vmul.f32 1.442695, %v2510_v16  ;;  %v2737_v3 = vmul.f32 1.442695, %v2702_v43  ;;  %v3470_v57 = vsub.f32 %v7001_v20, %v2286_v42 }
 0x1e1   : > { %v2929_v36 = vmul.f32 1.442695, %v2894_v55  ;;  %4845 = vpow2.f32 %v2539_v37  ;;  %v3121_v11 = vmul.f32 1.442695, %v3086_v33  ;;  %v7056_v38 = vmul.f32 1.442695, %v3278_v53 }
 0x1e2   : > { %v7059_v52 = vpop.f32.mrb[90].mxu1  ;;  %v7061_v32 = vpop.f32.mrb[90].mxu0  ;;  %4847 = vpow2.f32 %v2731_v12  ;;  %v2316_v17 = vsub.f32 %v6176_v26, %v7036_v4  ;;  %v8746_v40 = vld [vmem:[#allocation8_spill] sm:$0xff]  ;;  %v8747_v43 = vld [vmem:[#allocation9_spill] sm:$0xff]  ;;  %v3505_v42 = vmul.f32 1.442695, %v3470_v57 }
 0x1e3   : > { %8744 = vst [vmem:[#allocation186_spill] sm:$0xff] %v7059_v52  ;;  %8745 = vst [vmem:[#allocation187_spill] sm:$0xff] %v7061_v32  ;;  %v2508_v35 = vsub.f32 %v8746_v40, %v7036_v4  ;;  %v2700_v16 = vsub.f32 %v8747_v43, %v7036_v4  ;;  %v7069_v37 = vpop.f32.mrb[91].mxu1  ;;  %v7071_v33 = vpop.f32.mrb[91].mxu0  ;;  %4849 = vpow2.f32 %v2923_v63  ;;  %v8750_v53 = vld [vmem:[#allocation94_spill] sm:$0xff]  ;;  %v8751_v12 = vld [vmem:[#allocation95_spill] sm:$0xff] }
 0x1e4   : > { %8748 = vst [vmem:[#allocation8_spill] sm:$0xff] %v7069_v37  ;;  %8749 = vst [vmem:[#allocation9_spill] sm:$0xff] %v7071_v33  ;;  %v4830_v55 = vpop.eup %4829  ;;  %v2892_v32 = vsub.f32 %v8750_v53, %v7036_v4  ;;  %v3084_v52 = vsub.f32 %v8751_v12, %v7036_v4  ;;  %4851 = vpow2.f32 %v3115_v61  ;;  %v2349_v51 = vmul.f32 1.442695, %v2316_v17 }
 0x1e5   : > { %v4832_v58 = vpop.eup %4831  ;;  %v2445_v31 = vmul.f32 %v4830_v55, %v6150_v13  ;;  %v2541_v21 = vmul.f32 1.442695, %v2508_v35  ;;  %4853 = vpow2.f32 %v3307_v39  ;;  %v2733_v33 = vmul.f32 1.442695, %v2700_v16 }
 0x1e6   : > { %v4834_v23 = vpop.eup %4833  ;;  %v2605_v34 = vadd.f32 %v4832_v58, %v4830_v55  ;;  %v2637_v37 = vmul.f32 %v4832_v58, %v6153_v14  ;;  %4855 = vpow2.f32 %v3499_v45  ;;  %v7080_v0 = vmul.f32 1.442695, %v2892_v32  ;;  %v7084_v49 = vpop.f32.mrb[92].mxu1 }
 0x1e7   : > { %v4836_v63 = vpop.eup %4835  ;;  %v2829_v57 = vmul.f32 %v4834_v23, %v6156_v15  ;;  %v7082_v27 = vmul.f32 1.442695, %v3084_v52  ;;  %v7086_v13 = vpop.f32.mrb[92].mxu0  ;;  %4857 = vpow2.f32 %v2353_v62  ;;  %v3276_v58 = vsub.f32 %v6994_v8, %v7036_v4 }
 0x1e8   : > { %8752 = vst [vmem:[#allocation94_spill] sm:$0xff] %v7086_v13  ;;  %v4838_v61 = vpop.eup %4837  ;;  %v2669_v17 = vadd.f32 %v2637_v37, %v2445_v31  ;;  %v2797_v35 = vadd.f32 %v4834_v23, %v2605_v34  ;;  %v3021_v55 = vmul.f32 %v4836_v63, %v6623_v54  ;;  %v7089_v14 = vpop.f32.mrb[93].mxu1  ;;  %4859 = vpow2.f32 %v2545_v50 }
 0x1e9   : > { %8753 = vst [vmem:[#allocation95_spill] sm:$0xff] %v7089_v14  ;;  %v7091_v39 = vpop.f32.mrb[93].mxu0  ;;  %v4840_v15 = vpop.eup %4839  ;;  %v3213_v45 = vmul.f32 %v4838_v61, %v6626_v59  ;;  %v3468_v52 = vsub.f32 %v7006_v48, %v7036_v4  ;;  %4861 = vpow2.f32 %v2737_v3  ;;  %v3309_v50 = vmul.f32 1.442695, %v3276_v58  ;;  %v7110_v3 = vld [vmem:[%s8269_s2] ss:$0 sm:$0xff] }
 0x1ea   : > { %8754 = vst [vmem:[#allocation188_spill] sm:$0xff] %v7091_v39  ;;  %v7098_v32 = vpop.f32.mrb[94].mxu1  ;;  %v7100_v31 = vpop.f32.mrb[94].mxu0  ;;  %v2861_v34 = vadd.f32 %v2829_v57, %v2669_v17  ;;  %v2989_v23 = vadd.f32 %v4836_v63, %v2797_v35  ;;  %v3405_v62 = vmul.f32 %v4840_v15, %v6975_v25  ;;  %4863 = vpow2.f32 %v2929_v36 }
 0x1eb   : > { %8755 = vst [vmem:[#allocation189_spill] sm:$0xff] %v7098_v32  ;;  %8756 = vst [vmem:[#allocation190_spill] sm:$0xff] %v7100_v31  ;;  %v4842_v54 = vpop.eup %4841  ;;  %v3501_v37 = vmul.f32 1.442695, %v3468_v52  ;;  %4865 = vpow2.f32 %v3121_v11  ;;  %v7114_v36 = vadd.f32 %v7110_v3, %v7016_v7 }
 0x1ec   : > { %v4844_v16 = vpop.eup %4843  ;;  %v3597_v59 = vmul.f32 %v4842_v54, %v6978_v56  ;;  %v3053_v14 = vadd.f32 %v3021_v55, %v2861_v34  ;;  %v3181_v13 = vadd.f32 %v4838_v61, %v2989_v23  ;;  %4867 = vpow2.f32 %v7056_v38 }
 0x1ed   : > { %v4846_v39 = vpop.eup %4845  ;;  %v2443_v4 = vmul.f32 %v4844_v16, %v6159_v18  ;;  %4869 = vpow2.f32 %v3505_v42 }
 0x1ee   : > { %v4848_v32 = vpop.eup %4847  ;;  %v2603_v31 = vadd.f32 %v4846_v39, %v4844_v16  ;;  %v2635_v57 = vmul.f32 %v4846_v39, %v6162_v19  ;;  %v3245_v56 = vadd.f32 %v3213_v45, %v3053_v14  ;;  %v3373_v63 = vadd.f32 %v4840_v15, %v3181_v13 }
 0x1ef   : > { %v4850_v25 = vpop.eup %4849  ;;  %v2827_v18 = vmul.f32 %v4848_v32, %v6165_v2  ;;  %4871 = vpow2.f32 %v2349_v51  ;;  %v7120_v2 = vpop.f32.mrb[95].mxu1  ;;  %v2257_v51 = vmax.f32 %v6689_v41, %v7114_v36 }
 0x1f0   : > { %v4852_v11 = vpop.eup %4851  ;;  %v2667_v61 = vadd.f32 %v2635_v57, %v2443_v4  ;;  %v2795_v19 = vadd.f32 %v4848_v32, %v2603_v31  ;;  %v3019_v38 = vmul.f32 %v4850_v25, %v6629_v10  ;;  %v3437_v35 = vadd.f32 %v3405_v62, %v3245_v56  ;;  %v7139_v4 = vpop.f32.mrb[95].mxu0 }
 0x1f1   : > { %v4854_v17 = vpop.eup %4853  ;;  %v3565_v55 = vadd.f32 %v4842_v54, %v3373_v63  ;;  %v3211_v39 = vmul.f32 %v4852_v11, %v6632_v44  ;;  %4873 = vpow2.f32 %v2541_v21  ;;  %v7131_v31 = vadd.f32 %v7110_v3, %v7018_v1  ;;  %v8757_v63 = vld [vmem:[#allocation10_spill] sm:$0xff] }
 0x1f2   : > { %v4856_v7 = vpop.eup %4855  ;;  %v2859_v58 = vadd.f32 %v2827_v18, %v2667_v61  ;;  %v2987_v52 = vadd.f32 %v4850_v25, %v2795_v19  ;;  %v3403_v13 = vmul.f32 %v4854_v17, %v6981_v6  ;;  %4875 = vpow2.f32 %v2733_v33 }
 0x1f3   : > { %v4858_v42 = vpop.eup %4857  ;;  %v3629_v14 = vadd.f32 %v3597_v59, %v3437_v35  ;;  %4877 = vrcp.f32 %v3565_v55  ;;  %v3595_v10 = vmul.f32 %v4856_v7, %v6984_v28  ;;  %v7137_v1 = vmax.f32 %v2257_v51, %v7131_v31 }
 0x1f4   : > { %v4860_v15 = vpop.eup %4859  ;;  %v3051_v45 = vadd.f32 %v3019_v38, %v2859_v58  ;;  %v3179_v44 = vadd.f32 %v4852_v11, %v2987_v52  ;;  %v2446_v21 = vmul.f32 %v4858_v42, %v6168_v22  ;;  %4879 = vpow2.f32 %v7080_v0 }
 0x1f5   : > { %v4862_v32 = vpop.eup %4861  ;;  %v2606_v6 = vadd.f32 %v4860_v15, %v4858_v42  ;;  %v2638_v33 = vmul.f32 %v4860_v15, %v6173_v24  ;;  %4881 = vpow2.f32 %v7082_v27  ;;  %v7144_v56 = vadd.f32 %v7110_v3, %v7024_v29 }
 0x1f6   : > { %v4864_v28 = vpop.eup %4863  ;;  %v3243_v54 = vadd.f32 %v3211_v39, %v3051_v45  ;;  %v3371_v41 = vadd.f32 %v4854_v17, %v3179_v44  ;;  %v2830_v34 = vmul.f32 %v4862_v32, %v6189_v30  ;;  %4883 = vpow2.f32 %v3309_v50 }
 0x1f7   : > { %v4866_v23 = vpop.eup %4865  ;;  %v2670_v22 = vadd.f32 %v2638_v33, %v2446_v21  ;;  %v2798_v0 = vadd.f32 %v4862_v32, %v2606_v6  ;;  %v3022_v62 = vmul.f32 %v4864_v28, %v6637_v60  ;;  %4885 = vpow2.f32 %v3501_v37 }
 0x1f8   : > { %v4868_v24 = vpop.eup %4867  ;;  %v3435_v16 = vadd.f32 %v3403_v13, %v3243_v54  ;;  %v3563_v27 = vadd.f32 %v4856_v7, %v3371_v41  ;;  %v3214_v59 = vmul.f32 %v4866_v23, %v6650_v9  ;;  %v2321_v18 = vsub.f32 %v8757_v63, %v7137_v1  ;;  %v8759_v7 = vld [vmem:[#allocation12_spill] sm:$0xff] }
 0x1f9   : > { %v4870_v57 = vpop.eup %4869  ;;  %v2862_v30 = vadd.f32 %v2830_v34, %v2670_v22  ;;  %v2990_v50 = vadd.f32 %v4864_v28, %v2798_v0  ;;  %v3406_v25 = vmul.f32 %v4868_v24, %v6989_v46  ;;  %v8758_v46 = vld [vmem:[#allocation11_spill] sm:$0xff]  ;;  %v2705_v58 = vsub.f32 %v8759_v7, %v7137_v1 }
 0x1fa   : > { %v4872_v60 = vpop.eup %4871  ;;  %v3627_v37 = vadd.f32 %v3595_v10, %v3435_v16  ;;  %4887 = vrcp.f32 %v3563_v27  ;;  %v3598_v9 = vmul.f32 %v4870_v57, %v7001_v20  ;;  %v2513_v17 = vsub.f32 %v8758_v46, %v7137_v1 }
 0x1fb   : > { %v4874_v11 = vpop.eup %4873  ;;  %v3054_v61 = vadd.f32 %v3022_v62, %v2862_v30  ;;  %v3182_v19 = vadd.f32 %v4866_v23, %v2990_v50  ;;  %v2444_v38 = vmul.f32 %v4872_v60, %v6176_v26  ;;  %v2359_v39 = vmul.f32 1.442695, %v2321_v18  ;;  %v8761_v50 = vld [vmem:[#allocation177_spill] sm:$0xff]  ;;  %v7186_v18 = vpop.f32.mrb[96].mxu1 }
 0x1fc   : > { %v4876_v35 = vpop.eup %4875  ;;  %v2604_v29 = vadd.f32 %v4874_v11, %v4872_v60  ;;  %v2636_v55 = vmul.f32 %v4874_v11, %v8746_v40  ;;  %v2551_v10 = vmul.f32 1.442695, %v2513_v17  ;;  %v2743_v28 = vmul.f32 1.442695, %v2705_v58  ;;  %v7188_v11 = vpop.f32.mrb[96].mxu0  ;;  %v8762_v17 = vld [vmem:[#allocation178_spill] sm:$0xff] }
 0x1fd   : > { %v4878_v20 = vpop.eup %4877  ;;  %v3246_v52 = vadd.f32 %v3214_v59, %v3054_v61  ;;  %v3374_v13 = vadd.f32 %v4868_v24, %v3182_v19  ;;  %v2828_v42 = vmul.f32 %v4876_v35, %v8747_v43  ;;  %4889 = vpow2.f32 %v2359_v39 }
 0x1fe   : > { %v4880_v51 = vpop.eup %4879  ;;  %v7157_v26 = vmul.f32 %v4878_v20, %v3629_v14  ;;  %v2668_v15 = vadd.f32 %v2636_v55, %v2444_v38  ;;  %v2796_v45 = vadd.f32 %v4876_v35, %v2604_v29  ;;  %4891 = vpow2.f32 %v2551_v10  ;;  %v8763_v35 = vld [vmem:[#allocation179_spill] sm:$0xff]  ;;  %v8764_v55 = vld [vmem:[#allocation180_spill] sm:$0xff] }
 0x1ff   : > { %v4882_v44 = vpop.eup %4881  ;;  %v3438_v21 = vadd.f32 %v3406_v25, %v3246_v52  ;;  %v3566_v40 = vadd.f32 %v4870_v57, %v3374_v13  ;;  %v3020_v32 = vmul.f32 %v4880_v51, %v8750_v53  ;;  %v2897_v53 = vsub.f32 %v6667_v5, %v7137_v1  ;;  %v8760_v57 = vld [vmem:[#allocation101_spill] sm:$0xff] }
 0x200   : > { %v4884_v6 = vpop.eup %4883  ;;  %3725 = vst.msk [vmem:[%s7162_s27 + $0x10] sm:$0xff] %vm365_vm0, %v7157_v26  ;;  %v2860_v43 = vadd.f32 %v2828_v42, %v2668_v15  ;;  %v2988_v14 = vadd.f32 %v4880_v51, %v2796_v45  ;;  %v3212_v33 = vmul.f32 %v4882_v44, %v8751_v12  ;;  %v3089_v24 = vsub.f32 %v6670_v47, %v7137_v1  ;;  %v8765_v52 = vld [vmem:[#allocation13_spill] sm:$0xff]  ;;  %v8766_v42 = vld [vmem:[#allocation14_spill] sm:$0xff]  ;;  %v8767_v45 = vld [vmem:[#allocation15_spill] sm:$0xff] }
 0x201   : > { %v4886_v54 = vpop.eup %4885  ;;  %v3630_v41 = vadd.f32 %v3598_v9, %v3438_v21  ;;  %4893 = vrcp.f32 %v3566_v40  ;;  %v3404_v34 = vmul.f32 %v4884_v6, %v6994_v8  ;;  %v2935_v62 = vmul.f32 1.442695, %v2897_v53  ;;  %v8768_v21 = vld [vmem:[#allocation96_spill] sm:$0xff] }
 0x202   : > { %v3052_v23 = vadd.f32 %v3020_v32, %v2860_v43  ;;  %v3180_v22 = vadd.f32 %v4882_v44, %v2988_v14  ;;  %v3596_v0 = vmul.f32 %v4886_v54, %v7006_v48  ;;  %4895 = vpow2.f32 %v2743_v28  ;;  %v7211_v32 = vpop.f32.mrb[97].mxu1 }
 0x203   : > { %v3281_v12 = vsub.f32 %v7114_v36, %v7137_v1  ;;  %v3473_v16 = vsub.f32 %v7131_v31, %v7137_v1  ;;  %v2255_v30 = vmax.f32 %v8760_v57, %v7144_v56  ;;  %v7182_v48 = vadd.f32 %v7110_v3, %v8761_v50  ;;  %v8771_v50 = vld [vmem:[#allocation104_spill] sm:$0xff] }
 0x204   : > { %v4888_v8 = vpop.eup %4887  ;;  %v3244_v27 = vadd.f32 %v3212_v33, %v3052_v23  ;;  %v3372_v59 = vadd.f32 %v4884_v6, %v3180_v22  ;;  %4897 = vpow2.f32 %v2935_v62  ;;  %v3127_v60 = vmul.f32 1.442695, %v3089_v24  ;;  %v7214_v33 = vpop.f32.mrb[97].mxu0 }
 0x205   : > { %v7184_v25 = vmul.f32 %v4888_v8, %v3627_v37  ;;  %v3319_v9 = vmul.f32 1.442695, %v3281_v12  ;;  %v3511_v19 = vmul.f32 1.442695, %v3473_v16  ;;  %v2287_v38 = vmax.f32 %v2255_v30, %v7182_v48 }
 0x206   : > { %v3436_v1 = vadd.f32 %v3404_v34, %v3244_v27  ;;  %v3564_v61 = vadd.f32 %v4886_v54, %v3372_v59  ;;  %4899 = vpow2.f32 %v3127_v60  ;;  %v7196_v37 = vadd.f32 %v7110_v3, %v8762_v17  ;;  %v8770_v59 = vld [vmem:[#allocation103_spill] sm:$0xff] }
 0x207   : > { %3723 = vst.msk [vmem:[%s7162_s27] sm:$0xff] %vm365_vm0, %v7184_v25  ;;  %v7200_v29 = vadd.f32 %v7110_v3, %v8763_v35  ;;  %v7204_v39 = vadd.f32 %v7110_v3, %v8764_v55  ;;  %v4890_v58 = vpop.eup %4889  ;;  %v2319_v13 = vsub.f32 %v8765_v52, %v2287_v38  ;;  %v2511_v10 = vsub.f32 %v8766_v42, %v2287_v38  ;;  %v8773_v55 = vld [vmem:[#allocation182_spill] sm:$0xff] }
 0x208   : > { %v3628_v20 = vadd.f32 %v3596_v0, %v3436_v1  ;;  %4901 = vrcp.f32 %v3564_v61  ;;  %v4892_v51 = vpop.eup %4891  ;;  %v2449_v15 = vmul.f32 %v4890_v58, %v8757_v63  ;;  %v2703_v44 = vsub.f32 %v8767_v45, %v2287_v38  ;;  %v8769_v63 = vld [vmem:[#allocation97_spill] sm:$0xff] }
 0x209   : > { %4903 = vpow2.f32 %v3319_v9  ;;  %v2895_v40 = vsub.f32 %v8768_v21, %v2287_v38  ;;  %v2609_v6 = vadd.f32 %v4892_v51, %v4890_v58  ;;  %v2641_v43 = vmul.f32 %v4892_v51, %v8758_v46  ;;  %v8772_v9 = vld [vmem:[#allocation181_spill] sm:$0xff] }
 0x20a   : > { %4905 = vpow2.f32 %v3511_v19  ;;  %v2355_v14 = vmul.f32 1.442695, %v2319_v13  ;;  %v2547_v54 = vmul.f32 1.442695, %v2511_v10  ;;  %v2739_v34 = vmul.f32 1.442695, %v2703_v44 }
 0x20b   : > { %v4894_v28 = vpop.eup %4893  ;;  %v2931_v53 = vmul.f32 1.442695, %v2895_v40  ;;  %v3087_v23 = vsub.f32 %v8769_v63, %v2287_v38  ;;  %v2673_v62 = vadd.f32 %v2641_v43, %v2449_v15  ;;  %v3279_v24 = vsub.f32 %v7144_v56, %v2287_v38  ;;  %v8774_v40 = vld [vmem:[#allocation16_spill] sm:$0xff]  ;;  %v8775_v43 = vld [vmem:[#allocation17_spill] sm:$0xff] }
 0x20c   : > { %v4896_v22 = vpop.eup %4895  ;;  %v7217_v0 = vmul.f32 %v4894_v28, %v3630_v41  ;;  %4907 = vpow2.f32 %v2355_v14  ;;  %v3471_v27 = vsub.f32 %v7182_v48, %v2287_v38  ;;  %v2258_v41 = vmax.f32 %v8770_v59, %v7196_v37  ;;  %v8776_v28 = vld [vmem:[#allocation20_spill] sm:$0xff] }
 0x20d   : > { %v2801_v12 = vadd.f32 %v4896_v22, %v2609_v6  ;;  %v2833_v46 = vmul.f32 %v4896_v22, %v8759_v7  ;;  %4909 = vpow2.f32 %v2547_v54  ;;  %v3123_v16 = vmul.f32 1.442695, %v3087_v23 }
 0x20e   : > { %3726 = vst.msk [vmem:[%s7162_s27 + $0x18] sm:$0xff] %vm365_vm0, %v7217_v0  ;;  %4911 = vpow2.f32 %v2739_v34  ;;  %v3315_v8 = vmul.f32 1.442695, %v3279_v24  ;;  %v4898_v57 = vpop.eup %4897  ;;  %v2256_v60 = vmax.f32 %v8771_v50, %v7204_v39  ;;  %v7231_v7 = vadd.f32 %v7110_v3, %v8772_v9  ;;  %v8778_v9 = vld [vmem:[#allocation100_spill] sm:$0xff] }
 0x20f   : > { %v2865_v30 = vadd.f32 %v2833_v46, %v2673_v62  ;;  %4913 = vpow2.f32 %v2931_v53  ;;  %v2993_v1 = vadd.f32 %v4898_v57, %v2801_v12  ;;  %v3025_v61 = vmul.f32 %v4898_v57, %v6667_v5  ;;  %v8777_v62 = vld [vmem:[#allocation98_spill] sm:$0xff]  ;;  %v7248_v12 = vpop.f32.mrb[98].mxu1  ;;  %v7250_v46 = vpop.f32.mrb[98].mxu0 }
 0x210   : > { %4915 = vpow2.f32 %v3123_v16  ;;  %v3507_v19 = vmul.f32 1.442695, %v3471_v27  ;;  %v4900_v17 = vpop.eup %4899  ;;  %v2290_v38 = vmax.f32 %v2258_v41, %v7200_v29  ;;  %v7236_v35 = vmax.f32 %v2256_v60, %v7231_v7 }
 0x211   : > { %4917 = vpow2.f32 %v3315_v8  ;;  %v7240_v58 = vadd.f32 %v7110_v3, %v8773_v55  ;;  %v3057_v10 = vadd.f32 %v3025_v61, %v2865_v30  ;;  %v3185_v51 = vadd.f32 %v4900_v17, %v2993_v1 }
 0x212   : > { %v4902_v13 = vpop.eup %4901  ;;  %v3217_v15 = vmul.f32 %v4900_v17, %v6670_v47  ;;  %4919 = vpow2.f32 %v3507_v19  ;;  %v2322_v6 = vsub.f32 %v8774_v40, %v2290_v38  ;;  %v2514_v14 = vsub.f32 %v8775_v43, %v2290_v38 }
 0x213   : > { %v4904_v5 = vpop.eup %4903  ;;  %v3692_v44 = vmul.f32 %v4902_v13, %v3628_v20  ;;  %v2706_v54 = vsub.f32 %v8776_v28, %v2290_v38  ;;  %v2898_v24 = vsub.f32 %v8777_v62, %v2290_v38  ;;  %v3090_v1 = vsub.f32 %v8778_v9, %v2290_v38 }
 0x214   : > { %v4906_v34 = vpop.eup %4905  ;;  %v3249_v53 = vadd.f32 %v3217_v15, %v3057_v10  ;;  %v3377_v23 = vadd.f32 %v4904_v5, %v3185_v51  ;;  %v3409_v22 = vmul.f32 %v4904_v5, %v7114_v36  ;;  %v2361_v16 = vmul.f32 1.442695, %v2322_v6 }
 0x215   : > { %3724 = vst.msk [vmem:[%s7162_s27 + $0x8] sm:$0xff] %vm365_vm0, %v3692_v44  ;;  %v3755_v47 = vadd.f32 %v3692_v44, %v7184_v25  ;;  %v3601_v20 = vmul.f32 %v4906_v34, %v7131_v31  ;;  %v2553_v8 = vmul.f32 1.442695, %v2514_v14  ;;  %v2745_v57 = vmul.f32 1.442695, %v2706_v54 }
 0x216   : > { %v4908_v27 = vpop.eup %4907  ;;  %v3441_v59 = vadd.f32 %v3409_v22, %v3249_v53  ;;  %v3569_v41 = vadd.f32 %v4906_v34, %v3377_v23  ;;  %v2937_v30 = vmul.f32 1.442695, %v2898_v24  ;;  %4921 = vpow2.f32 %v2361_v16 }
 0x217   : > { %v4910_v36 = vpop.eup %4909  ;;  %v3756_v50 = vadd.f32 %v3755_v47, %v7157_v26  ;;  %v2447_v60 = vmul.f32 %v4908_v27, %v8765_v52  ;;  %v3129_v10 = vmul.f32 1.442695, %v3090_v1  ;;  %v3474_v6 = vsub.f32 %v7200_v29, %v2290_v38  ;;  %v8780_v47 = vld [vmem:[#allocation19_spill] sm:$0xff] }
 0x218   : > { %v4912_v61 = vpop.eup %4911  ;;  %v3633_v19 = vadd.f32 %v3601_v20, %v3441_v59  ;;  %4923 = vrcp.f32 %v3569_v41  ;;  %v2607_v25 = vadd.f32 %v4910_v36, %v4908_v27  ;;  %v2639_v31 = vmul.f32 %v4910_v36, %v8766_v42 }
 0x219   : > { %v4914_v17 = vpop.eup %4913  ;;  %v2831_v55 = vmul.f32 %v4912_v61, %v8767_v45  ;;  %v7262_v13 = vadd.f32 %v3756_v50, %v7217_v0  ;;  %4925 = vpow2.f32 %v2553_v8  ;;  %v3282_v42 = vsub.f32 %v7196_v37, %v2290_v38  ;;  %v8781_v38 = vld [vmem:[#allocation21_spill] sm:$0xff] }
 0x21a   : > { %v4916_v26 = vpop.eup %4915  ;;  %v2671_v51 = vadd.f32 %v2639_v31, %v2447_v60  ;;  %v2799_v52 = vadd.f32 %v4912_v61, %v2607_v25  ;;  %v3023_v15 = vmul.f32 %v4914_v17, %v8768_v21  ;;  %4927 = vpow2.f32 %v2745_v57  ;;  %v8779_v21 = vld [vmem:[#allocation18_spill] sm:$0xff] }
 0x21b   : > { %v4918_v5 = vpop.eup %4917  ;;  %v3215_v44 = vmul.f32 %v4916_v26, %v8769_v63  ;;  %4929 = vpow2.f32 %v2937_v30  ;;  %v3321_v53 = vmul.f32 1.442695, %v3282_v42  ;;  %v3513_v23 = vmul.f32 1.442695, %v3474_v6 }
 0x21c   : > { %v4920_v45 = vpop.eup %4919  ;;  %v2863_v14 = vadd.f32 %v2831_v55, %v2671_v51  ;;  %v2991_v0 = vadd.f32 %v4914_v17, %v2799_v52  ;;  %v3407_v54 = vmul.f32 %v4918_v5, %v7144_v56  ;;  %4931 = vpow2.f32 %v3129_v10  ;;  %v8782_v56 = vld [vmem:[#allocation99_spill] sm:$0xff]  ;;  %v7281_v55 = vpop.f32.mrb[99].mxu1 }
 0x21d   : > { %v3599_v34 = vmul.f32 %v4920_v45, %v7182_v48  ;;  %v2320_v22 = vsub.f32 %v8779_v21, %v7236_v35  ;;  %v2512_v20 = vsub.f32 %v8780_v47, %v7236_v35  ;;  %v2704_v16 = vsub.f32 %v8781_v38, %v7236_v35  ;;  %v8783_v48 = vld [vmem:[#allocation102_spill] sm:$0xff] }
 0x21e   : > { %v3055_v24 = vadd.f32 %v3023_v15, %v2863_v14  ;;  %v3183_v63 = vadd.f32 %v4916_v26, %v2991_v0  ;;  %4933 = vpow2.f32 %v3321_v53  ;;  %v2896_v27 = vsub.f32 %v8782_v56, %v7236_v35 }
 0x21f   : > { %v2357_v8 = vmul.f32 1.442695, %v2320_v22  ;;  %v3088_v59 = vsub.f32 %v8783_v48, %v7236_v35  ;;  %4935 = vpow2.f32 %v3513_v23  ;;  %v2549_v30 = vmul.f32 1.442695, %v2512_v20  ;;  %v8785_v23 = vld [vmem:[#allocation183_spill] sm:$0xff] }
 0x220   : > { %v3247_v41 = vadd.f32 %v3215_v44, %v3055_v24  ;;  %v3375_v57 = vadd.f32 %v4918_v5, %v3183_v63  ;;  %v4922_v36 = vpop.eup %4921  ;;  %v2741_v50 = vmul.f32 1.442695, %v2704_v16  ;;  %v2933_v60 = vmul.f32 1.442695, %v2896_v27  ;;  %v8786_v63 = vld [vmem:[#allocation184_spill] sm:$0xff]  ;;  %v7306_v16 = vpop.f32.mrb[99].mxu0 }
 0x221   : > { %4937 = vpow2.f32 %v2357_v8  ;;  %v3125_v1 = vmul.f32 1.442695, %v3088_v59  ;;  %v2450_v17 = vmul.f32 %v4922_v36, %v8774_v40  ;;  %v3280_v51 = vsub.f32 %v7204_v39, %v7236_v35  ;;  %v8787_v8 = vld [vmem:[#allocation185_spill] sm:$0xff]  ;;  %v8788_v59 = vld [vmem:[#allocation186_spill] sm:$0xff] }
 0x222   : > { %v4924_v61 = vpop.eup %4923  ;;  %v3439_v25 = vadd.f32 %v3407_v54, %v3247_v41  ;;  %v3567_v31 = vadd.f32 %v4920_v45, %v3375_v57  ;;  %4939 = vpow2.f32 %v2549_v30  ;;  %v3472_v52 = vsub.f32 %v7231_v7, %v7236_v35  ;;  %v8789_v57 = vld [vmem:[#allocation187_spill] sm:$0xff] }
 0x223   : > { %v4926_v10 = vpop.eup %4925  ;;  %v7283_v26 = vmul.f32 %v4924_v61, %v3633_v19  ;;  %4941 = vpow2.f32 %v2741_v50  ;;  %v3317_v6 = vmul.f32 1.442695, %v3280_v51  ;;  %v7300_v22 = vadd.f32 %v7110_v3, %v8785_v23  ;;  %v8790_v61 = vld [vmem:[#allocation113_spill] sm:$0xff] }
 0x224   : > { %v4928_v15 = vpop.eup %4927  ;;  %v3631_v5 = vadd.f32 %v3599_v34, %v3439_v25  ;;  %4943 = vrcp.f32 %v3567_v31  ;;  %v2610_v44 = vadd.f32 %v4926_v10, %v4922_v36  ;;  %v2642_v42 = vmul.f32 %v4926_v10, %v8775_v43  ;;  %v8784_v43 = vld [vmem:[#allocation111_spill] sm:$0xff]  ;;  %v8791_v10 = vld [vmem:[#allocation22_spill] sm:$0xff] }
 0x225   : > { %v4930_v40 = vpop.eup %4929  ;;  %3729 = vst.msk [vmem:[%s7162_s27 + $0x30] sm:$0xff] %vm365_vm0, %v7283_v26  ;;  %v2834_v19 = vmul.f32 %v4928_v15, %v8776_v28  ;;  %4945 = vpow2.f32 %v2933_v60  ;;  %v3509_v45 = vmul.f32 1.442695, %v3472_v52  ;;  %v2261_v53 = vmax.f32 %v8784_v43, %v7240_v58  ;;  %v8792_v52 = vld [vmem:[#allocation23_spill] sm:$0xff] }
 0x226   : > { %v4932_v14 = vpop.eup %4931  ;;  %v2674_v0 = vadd.f32 %v2642_v42, %v2450_v17  ;;  %v2802_v54 = vadd.f32 %v4928_v15, %v2610_v44  ;;  %v3026_v35 = vmul.f32 %v4930_v40, %v8777_v62  ;;  %4947 = vpow2.f32 %v3125_v1  ;;  %v8793_v44 = vld [vmem:[#allocation24_spill] sm:$0xff] }
 0x227   : > { %v3218_v34 = vmul.f32 %v4932_v14, %v8778_v9  ;;  %4949 = vpow2.f32 %v3317_v6  ;;  %v7304_v20 = vadd.f32 %v7110_v3, %v8786_v63  ;;  %v7309_v9 = vmax.f32 %v2261_v53, %v7300_v22 }
 0x228   : > { %v2866_v28 = vadd.f32 %v2834_v19, %v2674_v0  ;;  %v2994_v24 = vadd.f32 %v4930_v40, %v2802_v54  ;;  %4951 = vpow2.f32 %v3509_v45  ;;  %v4934_v62 = vpop.eup %4933  ;;  %v7313_v27 = vadd.f32 %v7110_v3, %v8787_v8  ;;  %v8794_v45 = vld [vmem:[#allocation105_spill] sm:$0xff] }
 0x229   : > { %v7317_v41 = vadd.f32 %v7110_v3, %v8788_v59  ;;  %v7321_v30 = vadd.f32 %v7110_v3, %v8789_v57  ;;  %v4936_v36 = vpop.eup %4935  ;;  %v3410_v1 = vmul.f32 %v4934_v62, %v7196_v37  ;;  %v2259_v25 = vmax.f32 %v8790_v61, %v7304_v20 }
 0x22a   : > { %v3058_v50 = vadd.f32 %v3026_v35, %v2866_v28  ;;  %v3186_v60 = vadd.f32 %v4932_v14, %v2994_v24  ;;  %v3602_v17 = vmul.f32 %v4936_v36, %v7200_v29  ;;  %v2325_v51 = vsub.f32 %v8791_v10, %v7309_v9 }
 0x22b   : > { %v4938_v31 = vpop.eup %4937  ;;  %v2517_v15 = vsub.f32 %v8792_v52, %v7309_v9  ;;  %v2709_v42 = vsub.f32 %v8793_v44, %v7309_v9  ;;  %v2901_v14 = vsub.f32 %v8794_v45, %v7309_v9 }
 0x22c   : > { %v4940_v40 = vpop.eup %4939  ;;  %v3250_v19 = vadd.f32 %v3218_v34, %v3058_v50  ;;  %v3378_v6 = vadd.f32 %v4934_v62, %v3186_v60  ;;  %v2448_v37 = vmul.f32 %v4938_v31, %v8779_v21  ;;  %v2367_v35 = vmul.f32 1.442695, %v2325_v51 }
 0x22d   : > { %v4942_v0 = vpop.eup %4941  ;;  %v2608_v54 = vadd.f32 %v4940_v40, %v4938_v31  ;;  %v2640_v29 = vmul.f32 %v4940_v40, %v8780_v47  ;;  %v2559_v43 = vmul.f32 1.442695, %v2517_v15  ;;  %v2751_v63 = vmul.f32 1.442695, %v2709_v42 }
 0x22e   : > { %v4944_v53 = vpop.eup %4943  ;;  %v3442_v23 = vadd.f32 %v3410_v1, %v3250_v19  ;;  %v3570_v28 = vadd.f32 %v4936_v36, %v3378_v6  ;;  %v2832_v24 = vmul.f32 %v4942_v0, %v8781_v38  ;;  %4953 = vpow2.f32 %v2367_v35  ;;  %v7353_v19 = vpop.f32.mrb[100].mxu0  ;;  %v8797_v35 = vld [vmem:[#allocation8_spill] sm:$0xff] }
 0x22f   : > { %v4946_v34 = vpop.eup %4945  ;;  %v3695_v62 = vmul.f32 %v4944_v53, %v3631_v5  ;;  %v2672_v8 = vadd.f32 %v2640_v29, %v2448_v37  ;;  %v2800_v21 = vadd.f32 %v4942_v0, %v2608_v54  ;;  %v2943_v47 = vmul.f32 1.442695, %v2901_v14  ;;  %v8796_v54 = vld [vmem:[#allocation115_spill] sm:$0xff]  ;;  %v8798_v53 = vld [vmem:[#allocation9_spill] sm:$0xff] }
 0x230   : > { %v4948_v59 = vpop.eup %4947  ;;  %v3634_v57 = vadd.f32 %v3602_v17, %v3442_v23  ;;  %4955 = vrcp.f32 %v3570_v28  ;;  %v3024_v50 = vmul.f32 %v4946_v34, %v8782_v56  ;;  %v8795_v17 = vld [vmem:[#allocation106_spill] sm:$0xff]  ;;  %v3285_v56 = vsub.f32 %v7240_v58, %v7309_v9 }
 0x231   : > { %v4950_v60 = vpop.eup %4949  ;;  %3727 = vst.msk [vmem:[%s7162_s27 + $0x20] sm:$0xff] %vm365_vm0, %v3695_v62  ;;  %v7342_v1 = vadd.f32 %v7262_v13, %v3695_v62  ;;  %v2864_v36 = vadd.f32 %v2832_v24, %v2672_v8  ;;  %v2992_v38 = vadd.f32 %v4946_v34, %v2800_v21  ;;  %v3216_v61 = vmul.f32 %v4948_v59, %v8783_v48  ;;  %v7351_v13 = vpop.f32.mrb[100].mxu1  ;;  %v8801_v62 = vld [vmem:[#allocation27_spill] sm:$0xff] }
 0x232   : > { %v4952_v5 = vpop.eup %4951  ;;  %v3408_v31 = vmul.f32 %v4950_v60, %v7204_v39  ;;  %4957 = vpow2.f32 %v2559_v43  ;;  %v3093_v51 = vsub.f32 %v8795_v17, %v7309_v9  ;;  %v3327_v6 = vmul.f32 1.442695, %v3285_v56  ;;  %v8802_v21 = vld [vmem:[#allocation107_spill] sm:$0xff] }
 0x233   : > { %v3056_v15 = vadd.f32 %v3024_v50, %v2864_v36  ;;  %v3184_v42 = vadd.f32 %v4948_v59, %v2992_v38  ;;  %v3600_v40 = vmul.f32 %v4952_v5, %v7231_v7  ;;  %4959 = vpow2.f32 %v2751_v63  ;;  %v7372_v50 = vpop.f32.mrb[101].mxu1  ;;  %v8803_v38 = vld [vmem:[#allocation108_spill] sm:$0xff] }
 0x234   : > { %4961 = vpow2.f32 %v2943_v47  ;;  %v3135_v48 = vmul.f32 1.442695, %v3093_v51  ;;  %v3477_v39 = vsub.f32 %v7300_v22, %v7309_v9  ;;  %v2291_v0 = vmax.f32 %v2259_v25, %v7313_v27  ;;  %v8799_v9 = vld [vmem:[#allocation25_spill] sm:$0xff]  ;;  %v8800_v25 = vld [vmem:[#allocation26_spill] sm:$0xff] }
 0x235   : > { %v3248_v37 = vadd.f32 %v3216_v61, %v3056_v15  ;;  %v3376_v14 = vadd.f32 %v4950_v60, %v3184_v42  ;;  %v2262_v29 = vmax.f32 %v8796_v54, %v7317_v41  ;;  %v7362_v43 = vadd.f32 %v7110_v3, %v8797_v35  ;;  %v8804_v54 = vld [vmem:[#allocation116_spill] sm:$0xff] }
 0x236   : > { %4963 = vpow2.f32 %v3135_v48  ;;  %v3519_v7 = vmul.f32 1.442695, %v3477_v39  ;;  %v7366_v23 = vadd.f32 %v7110_v3, %v8798_v53  ;;  %v2323_v63 = vsub.f32 %v8799_v9, %v2291_v0 }
 0x237   : > { %v3440_v28 = vadd.f32 %v3408_v31, %v3248_v37  ;;  %v3568_v24 = vadd.f32 %v4952_v5, %v3376_v14  ;;  %4965 = vpow2.f32 %v3327_v6  ;;  %v2515_v34 = vsub.f32 %v8800_v25, %v2291_v0  ;;  %v7375_v31 = vpop.f32.mrb[101].mxu0 }
 0x238   : > { %4967 = vpow2.f32 %v3519_v7  ;;  %v2707_v8 = vsub.f32 %v8801_v62, %v2291_v0  ;;  %v2899_v59 = vsub.f32 %v8802_v21, %v2291_v0  ;;  %v4954_v47 = vpop.eup %4953  ;;  %v2363_v36 = vmul.f32 1.442695, %v2323_v63 }
 0x239   : > { %v3632_v60 = vadd.f32 %v3600_v40, %v3440_v28  ;;  %4969 = vrcp.f32 %v3568_v24  ;;  %v3091_v61 = vsub.f32 %v8803_v38, %v2291_v0  ;;  %v2453_v51 = vmul.f32 %v4954_v47, %v8791_v10 }
 0x23a   : > { %v4956_v5 = vpop.eup %4955  ;;  %v2555_v56 = vmul.f32 1.442695, %v2515_v34  ;;  %v2747_v15 = vmul.f32 1.442695, %v2707_v8  ;;  %v2939_v42 = vmul.f32 1.442695, %v2899_v59  ;;  %4971 = vpow2.f32 %v2363_v36 }
 0x23b   : > { %v7378_v48 = vmul.f32 %v4956_v5, %v3634_v57  ;;  %v3131_v6 = vmul.f32 1.442695, %v3091_v61  ;;  %v3283_v39 = vsub.f32 %v7304_v20, %v2291_v0  ;;  %v3475_v37 = vsub.f32 %v7313_v27, %v2291_v0  ;;  %v8807_v5 = vld [vmem:[#allocation32_spill] sm:$0xff] }
 0x23c   : > { %v4958_v40 = vpop.eup %4957  ;;  %4973 = vpow2.f32 %v2555_v56  ;;  %v7383_v14 = vmax.f32 %v2262_v29, %v7321_v30  ;;  %v2260_v7 = vmax.f32 %v8804_v54, %v7362_v43  ;;  %v8805_v29 = vld [vmem:[#allocation28_spill] sm:$0xff]  ;;  %v8812_v54 = vld [vmem:[#allocation31_spill] sm:$0xff] }
 0x23d   : > { %v4960_v10 = vpop.eup %4959  ;;  %3730 = vst.msk [vmem:[%s7162_s27 + $0x38] sm:$0xff] %vm365_vm0, %v7378_v48  ;;  %v2613_v57 = vadd.f32 %v4958_v40, %v4954_v47  ;;  %v2645_v35 = vmul.f32 %v4958_v40, %v8792_v52  ;;  %4975 = vpow2.f32 %v2747_v15  ;;  %v3323_v53 = vmul.f32 1.442695, %v3283_v39  ;;  %v8806_v52 = vld [vmem:[#allocation29_spill] sm:$0xff] }
 0x23e   : > { %v4962_v28 = vpop.eup %4961  ;;  %v2837_v24 = vmul.f32 %v4960_v10, %v8793_v44  ;;  %4977 = vpow2.f32 %v2939_v42  ;;  %v3515_v0 = vmul.f32 1.442695, %v3475_v37  ;;  %v2326_v63 = vsub.f32 %v8805_v29, %v7383_v14 }
 0x23f   : > { %v2677_v34 = vadd.f32 %v2645_v35, %v2453_v51  ;;  %v2805_v8 = vadd.f32 %v4960_v10, %v2613_v57  ;;  %v3029_v59 = vmul.f32 %v4962_v28, %v8794_v45  ;;  %4979 = vpow2.f32 %v3131_v6 }
 0x240   : > { %v4964_v36 = vpop.eup %4963  ;;  %4981 = vpow2.f32 %v3323_v53  ;;  %v2369_v47 = vmul.f32 1.442695, %v2326_v63  ;;  %v2518_v61 = vsub.f32 %v8806_v52, %v7383_v14  ;;  %v2710_v56 = vsub.f32 %v8807_v5, %v7383_v14  ;;  %v8808_v53 = vld [vmem:[#allocation109_spill] sm:$0xff] }
 0x241   : > { %v4966_v44 = vpop.eup %4965  ;;  %v2869_v15 = vadd.f32 %v2837_v24, %v2677_v34  ;;  %v2997_v42 = vadd.f32 %v4962_v28, %v2805_v8  ;;  %v3221_v39 = vmul.f32 %v4964_v36, %v8795_v17  ;;  %4983 = vpow2.f32 %v3515_v0  ;;  %v8809_v17 = vld [vmem:[#allocation112_spill] sm:$0xff] }
 0x242   : > { %v4968_v51 = vpop.eup %4967  ;;  %v3413_v40 = vmul.f32 %v4966_v44, %v7240_v58  ;;  %4985 = vpow2.f32 %v2369_v47  ;;  %v2561_v45 = vmul.f32 1.442695, %v2518_v61  ;;  %v2753_v6 = vmul.f32 1.442695, %v2710_v56  ;;  %v7408_v47 = vpop.f32.mrb[102].mxu1 }
 0x243   : > { %v4970_v37 = vpop.eup %4969  ;;  %v3061_v10 = vadd.f32 %v3029_v59, %v2869_v15  ;;  %v3189_v57 = vadd.f32 %v4964_v36, %v2997_v42  ;;  %v3605_v35 = vmul.f32 %v4968_v51, %v7300_v22  ;;  %v2902_v63 = vsub.f32 %v8808_v53, %v7383_v14  ;;  %v7410_v36 = vpop.f32.mrb[102].mxu0 }
 0x244   : > { %v3696_v24 = vmul.f32 %v4970_v37, %v3632_v60  ;;  %4987 = vpow2.f32 %v2561_v45  ;;  %v3094_v28 = vsub.f32 %v8809_v17, %v7383_v14  ;;  %v3286_v58 = vsub.f32 %v7317_v41, %v7383_v14  ;;  %v4972_v0 = vpop.eup %4971 }
 0x245   : > { %v3253_v34 = vadd.f32 %v3221_v39, %v3061_v10  ;;  %v3381_v8 = vadd.f32 %v4966_v44, %v3189_v57  ;;  %4989 = vpow2.f32 %v2753_v6  ;;  %v2945_v59 = vmul.f32 1.442695, %v2902_v63 }
 0x246   : > { %v4974_v22 = vpop.eup %4973  ;;  %3728 = vst.msk [vmem:[%s7162_s27 + $0x28] sm:$0xff] %vm365_vm0, %v3696_v24  ;;  %v3759_v60 = vadd.f32 %v7342_v1, %v3696_v24  ;;  %v2451_v61 = vmul.f32 %v4972_v0, %v8799_v9  ;;  %v3137_v56 = vmul.f32 1.442695, %v3094_v28  ;;  %v3329_v15 = vmul.f32 1.442695, %v3286_v58 }
 0x247   : > { %v4976_v42 = vpop.eup %4975  ;;  %v3445_v45 = vadd.f32 %v3413_v40, %v3253_v34  ;;  %v3573_v37 = vadd.f32 %v4968_v51, %v3381_v8  ;;  %v2611_v39 = vadd.f32 %v4974_v22, %v4972_v0  ;;  %v2643_v44 = vmul.f32 %v4974_v22, %v8800_v25 }
 0x248   : > { %v4978_v6 = vpop.eup %4977  ;;  %v3760_v10 = vadd.f32 %v3759_v60, %v7283_v26  ;;  %v2835_v57 = vmul.f32 %v4976_v42, %v8801_v62  ;;  %4991 = vpow2.f32 %v2945_v59  ;;  %v3478_v63 = vsub.f32 %v7321_v30, %v7383_v14 }
 0x249   : > { %v4980_v1 = vpop.eup %4979  ;;  %v3637_v24 = vadd.f32 %v3605_v35, %v3445_v45  ;;  %4993 = vrcp.f32 %v3573_v37  ;;  %v2675_v9 = vadd.f32 %v2643_v44, %v2451_v61  ;;  %v2803_v28 = vadd.f32 %v4976_v42, %v2611_v39  ;;  %v8811_v61 = vld [vmem:[#allocation30_spill] sm:$0xff]  ;;  %v7449_v42 = vpop.f32.mrb[103].mxu1 }
 0x24a   : > { %v4982_v58 = vpop.eup %4981  ;;  %v3027_v51 = vmul.f32 %v4978_v6, %v8802_v21  ;;  %v3219_v40 = vmul.f32 %v4980_v1, %v8803_v38  ;;  %v7424_v25 = vadd.f32 %v3760_v10, %v7378_v48  ;;  %4995 = vpow2.f32 %v3137_v56 }
 0x24b   : > { %v4984_v26 = vpop.eup %4983  ;;  %v2867_v62 = vadd.f32 %v2835_v57, %v2675_v9  ;;  %v2995_v0 = vadd.f32 %v4978_v6, %v2803_v28  ;;  %v3411_v34 = vmul.f32 %v4982_v58, %v7304_v20  ;;  %4997 = vpow2.f32 %v3329_v15  ;;  %v8810_v20 = vld [vmem:[#allocation94_spill] sm:$0xff]  ;;  %v8813_v15 = vld [vmem:[#allocation33_spill] sm:$0xff] }
 0x24c   : > { %v4986_v14 = vpop.eup %4985  ;;  %v3603_v35 = vmul.f32 %v4984_v26, %v7313_v27  ;;  %v3521_v8 = vmul.f32 1.442695, %v3478_v63  ;;  %v7432_v21 = vmax.f32 %v2260_v7, %v7366_v23  ;;  %v7436_v38 = vadd.f32 %v7110_v3, %v7084_v49 }
 0x24d   : > { %v3059_v48 = vadd.f32 %v3027_v51, %v2867_v62  ;;  %v3187_v59 = vadd.f32 %v4980_v1, %v2995_v0  ;;  %v2454_v22 = vmul.f32 %v4986_v14, %v8805_v29  ;;  %v7441_v60 = vadd.f32 %v7110_v3, %v8810_v20  ;;  %v7453_v51 = vpop.f32.mrb[103].mxu0  ;;  %v8815_v0 = vld [vmem:[#allocation110_spill] sm:$0xff] }
 0x24e   : > { %v4988_v27 = vpop.eup %4987  ;;  %4999 = vpow2.f32 %v3521_v8  ;;  %v2324_v56 = vsub.f32 %v8811_v61, %v7432_v21  ;;  %v2516_v7 = vsub.f32 %v8812_v54, %v7432_v21  ;;  %v2708_v49 = vsub.f32 %v8813_v15, %v7432_v21  ;;  %8814 = vst [vmem:[#allocation10_spill] sm:$0xff] %v7453_v51 }
 0x24f   : > { %v4990_v45 = vpop.eup %4989  ;;  %v3251_v37 = vadd.f32 %v3219_v40, %v3059_v48  ;;  %v3379_v29 = vadd.f32 %v4982_v58, %v3187_v59  ;;  %v2614_v39 = vadd.f32 %v4988_v27, %v4986_v14  ;;  %v2646_v3 = vmul.f32 %v4988_v27, %v8806_v52  ;;  %v8816_v58 = vld [vmem:[#allocation114_spill] sm:$0xff] }
 0x250   : > { %v2838_v44 = vmul.f32 %v4990_v45, %v8807_v5  ;;  %v2365_v6 = vmul.f32 1.442695, %v2324_v56  ;;  %v2557_v10 = vmul.f32 1.442695, %v2516_v7  ;;  %v2749_v57 = vmul.f32 1.442695, %v2708_v49 }
 0x251   : > { %v3443_v63 = vadd.f32 %v3411_v34, %v3251_v37  ;;  %v3571_v1 = vadd.f32 %v4984_v26, %v3379_v29  ;;  %v2678_v9 = vadd.f32 %v2646_v3, %v2454_v22  ;;  %v2806_v28 = vadd.f32 %v4990_v45, %v2614_v39  ;;  %v8817_v29 = vld [vmem:[#allocation123_spill] sm:$0xff] }
 0x252   : > { %v4992_v62 = vpop.eup %4991  ;;  %5001 = vpow2.f32 %v2365_v6  ;;  %v2900_v40 = vsub.f32 %v8815_v0, %v7432_v21  ;;  %v3092_v14 = vsub.f32 %v8816_v58, %v7432_v21  ;;  %v3284_v52 = vsub.f32 %v7362_v43, %v7432_v21  ;;  %v8818_v6 = vld [vmem:[#allocation95_spill] sm:$0xff] }
 0x253   : > { %v4994_v5 = vpop.eup %4993  ;;  %v3635_v8 = vadd.f32 %v3603_v35, %v3443_v63  ;;  %5003 = vrcp.f32 %v3571_v1  ;;  %v2870_v26 = vadd.f32 %v2838_v44, %v2678_v9  ;;  %v2998_v34 = vadd.f32 %v4992_v62, %v2806_v28  ;;  %v7476_v44 = vld [vmem:[%s8269_s2] ss:$0 sm:$0xff] }
 0x254   : > { %v4996_v48 = vpop.eup %4995  ;;  %v7461_v59 = vmul.f32 %v4994_v5, %v3637_v24  ;;  %v3030_v22 = vmul.f32 %v4992_v62, %v8808_v53  ;;  %5005 = vpow2.f32 %v2557_v10  ;;  %v2941_v20 = vmul.f32 1.442695, %v2900_v40  ;;  %v8819_v10 = vld [vmem:[#allocation188_spill] sm:$0xff]  ;;  %v8820_v62 = vld [vmem:[#allocation125_spill] sm:$0xff]  ;;  %v8822_v5 = vld [vmem:[#allocation190_spill] sm:$0xff] }
 0x255   : > { %v4998_v27 = vpop.eup %4997  ;;  %v3190_v56 = vadd.f32 %v4996_v48, %v2998_v34  ;;  %v3222_v7 = vmul.f32 %v4996_v48, %v8809_v17  ;;  %5007 = vpow2.f32 %v2749_v57  ;;  %v3133_v49 = vmul.f32 1.442695, %v3092_v14  ;;  %v8821_v14 = vld [vmem:[#allocation189_spill] sm:$0xff]  ;;  %v8823_v34 = vld [vmem:[#allocation34_spill] sm:$0xff] }
 0x256   : > { %3733 = vst.msk [vmem:[%s7162_s27 + $0x50] sm:$0xff] %vm365_vm0, %v7461_v59  ;;  %v3062_v35 = vadd.f32 %v3030_v22, %v2870_v26  ;;  %v3414_v45 = vmul.f32 %v4998_v27, %v7317_v41  ;;  %5009 = vpow2.f32 %v2941_v20  ;;  %v3325_v37 = vmul.f32 1.442695, %v3284_v52  ;;  %v8824_v22 = vld [vmem:[#allocation35_spill] sm:$0xff]  ;;  %v8825_v20 = vld [vmem:[#allocation36_spill] sm:$0xff] }
 0x257   : > { %v3382_v24 = vadd.f32 %v4998_v27, %v3190_v56  ;;  %5011 = vpow2.f32 %v3133_v49  ;;  %v3476_v53 = vsub.f32 %v7366_v23, %v7432_v21  ;;  %v2265_v39 = vmax.f32 %v8817_v29, %v7436_v38  ;;  %v8826_v49 = vld [vmem:[#allocation117_spill] sm:$0xff] }
 0x258   : > { %v5000_v3 = vpop.eup %4999  ;;  %v3254_v17 = vadd.f32 %v3222_v7, %v3062_v35  ;;  %5013 = vpow2.f32 %v3325_v37  ;;  %v7480_v41 = vadd.f32 %v7476_v44, %v8818_v6  ;;  %v7484_v57 = vadd.f32 %v7476_v44, %v8819_v10 }
 0x259   : > { %v3574_v21 = vadd.f32 %v5000_v3, %v3382_v24  ;;  %v3606_v63 = vmul.f32 %v5000_v3, %v7321_v30  ;;  %v3517_v1 = vmul.f32 1.442695, %v3476_v53  ;;  %v2297_v9 = vmax.f32 %v2265_v39, %v7441_v60 }
 0x25a   : > { %v3446_v28 = vadd.f32 %v3414_v45, %v3254_v17  ;;  %v2263_v40 = vmax.f32 %v8820_v62, %v7480_v41  ;;  %v7492_v52 = vadd.f32 %v7476_v44, %v8821_v14  ;;  %v7496_v26 = vadd.f32 %v7476_v44, %v8822_v5  ;;  %v8827_v45 = vld [vmem:[#allocation118_spill] sm:$0xff] }
 0x25b   : > { %5015 = vrcp.f32 %v3574_v21  ;;  %v2329_v48 = vsub.f32 %v8823_v34, %v2297_v9  ;;  %v2521_v30 = vsub.f32 %v8824_v22, %v2297_v9  ;;  %v2713_v27 = vsub.f32 %v8825_v20, %v2297_v9 }
 0x25c   : > { %v5002_v56 = vpop.eup %5001  ;;  %v3638_v7 = vadd.f32 %v3606_v63, %v3446_v28  ;;  %5017 = vpow2.f32 %v3517_v1  ;;  %v2905_v35 = vsub.f32 %v8826_v49, %v2297_v9  ;;  %v3097_v37 = vsub.f32 %v8827_v45, %v2297_v9 }
 0x25d   : > { %v5004_v24 = vpop.eup %5003  ;;  %v2452_v53 = vmul.f32 %v5002_v56, %v8811_v61  ;;  %v2375_v29 = vmul.f32 1.442695, %v2329_v48  ;;  %v2567_v39 = vmul.f32 1.442695, %v2521_v30  ;;  %v2759_v3 = vmul.f32 1.442695, %v2713_v27 }
 0x25e   : > { %v5006_v17 = vpop.eup %5005  ;;  %v3699_v6 = vmul.f32 %v5004_v24, %v3635_v8  ;;  %v2951_v10 = vmul.f32 1.442695, %v2905_v35  ;;  %v3143_v21 = vmul.f32 1.442695, %v3097_v37  ;;  %v3289_v62 = vsub.f32 %v7436_v38, %v2297_v9  ;;  %v7516_v37 = vpop.f32.mrb[104].mxu0 }
 0x25f   : > { %v5008_v14 = vpop.eup %5007  ;;  %v2612_v63 = vadd.f32 %v5006_v17, %v5002_v56  ;;  %v2644_v1 = vmul.f32 %v5006_v17, %v8812_v54  ;;  %5019 = vpow2.f32 %v2375_v29  ;;  %v3481_v28 = vsub.f32 %v7441_v60, %v2297_v9  ;;  %v7514_v54 = vpop.f32.mrb[104].mxu1  ;;  %8829 = vst [vmem:[#allocation12_spill] sm:$0xff] %v7516_v37 }
 0x260   : > { %v5010_v5 = vpop.eup %5009  ;;  %3731 = vst.msk [vmem:[%s7162_s27 + $0x40] sm:$0xff] %vm365_vm0, %v3699_v6  ;;  %v7510_v61 = vadd.f32 %v7424_v25, %v3699_v6  ;;  %v2836_v48 = vmul.f32 %v5008_v14, %v8813_v15  ;;  %5021 = vpow2.f32 %v2567_v39  ;;  %v3335_v8 = vmul.f32 1.442695, %v3289_v62  ;;  %8828 = vst [vmem:[#allocation11_spill] sm:$0xff] %v7514_v54  ;;  %v8832_v62 = vld [vmem:[#allocation39_spill] sm:$0xff] }
 0x261   : > { %v5012_v30 = vpop.eup %5011  ;;  %v2676_v27 = vadd.f32 %v2644_v1, %v2452_v53  ;;  %v2804_v35 = vadd.f32 %v5008_v14, %v2612_v63  ;;  %v3028_v56 = vmul.f32 %v5010_v5, %v8815_v0  ;;  %5023 = vpow2.f32 %v2759_v3  ;;  %v8830_v53 = vld [vmem:[#allocation37_spill] sm:$0xff]  ;;  %v8831_v3 = vld [vmem:[#allocation38_spill] sm:$0xff] }
 0x262   : > { %v5014_v9 = vpop.eup %5013  ;;  %v3220_v24 = vmul.f32 %v5012_v30, %v8816_v58  ;;  %5025 = vpow2.f32 %v2951_v10  ;;  %v3527_v25 = vmul.f32 1.442695, %v3481_v28  ;;  %v2295_v29 = vmax.f32 %v2263_v40, %v7484_v57  ;;  %v8833_v10 = vld [vmem:[#allocation119_spill] sm:$0xff] }
 0x263   : > { %v2868_v15 = vadd.f32 %v2836_v48, %v2676_v27  ;;  %v2996_v39 = vadd.f32 %v5010_v5, %v2804_v35  ;;  %v3412_v17 = vmul.f32 %v5014_v9, %v7362_v43  ;;  %5027 = vpow2.f32 %v3143_v21 }
 0x264   : > { %5029 = vpow2.f32 %v3335_v8  ;;  %v2327_v0 = vsub.f32 %v8830_v53, %v2295_v29  ;;  %v2519_v6 = vsub.f32 %v8831_v3, %v2295_v29  ;;  %v2711_v14 = vsub.f32 %v8832_v62, %v2295_v29 }
 0x265   : > { %v5016_v63 = vpop.eup %5015  ;;  %v3060_v1 = vadd.f32 %v3028_v56, %v2868_v15  ;;  %v3188_v58 = vadd.f32 %v5012_v30, %v2996_v39  ;;  %5031 = vpow2.f32 %v3527_v25  ;;  %v2903_v28 = vsub.f32 %v8833_v10, %v2295_v29  ;;  %v8834_v56 = vld [vmem:[#allocation120_spill] sm:$0xff] }
 0x266   : > { %v5018_v40 = vpop.eup %5017  ;;  %v7525_v48 = vmul.f32 %v5016_v63, %v3638_v7  ;;  %v2371_v5 = vmul.f32 1.442695, %v2327_v0  ;;  %v2563_v43 = vmul.f32 1.442695, %v2519_v6  ;;  %v2755_v21 = vmul.f32 1.442695, %v2711_v14 }
 0x267   : > { %v3252_v8 = vadd.f32 %v3220_v24, %v3060_v1  ;;  %v3380_v27 = vadd.f32 %v5014_v9, %v3188_v58  ;;  %v3604_v35 = vmul.f32 %v5018_v40, %v7366_v23  ;;  %v2947_v37 = vmul.f32 1.442695, %v2903_v28  ;;  %v8835_v24 = vld [vmem:[#allocation127_spill] sm:$0xff]  ;;  %v7536_v6 = vpop.f32.mrb[105].mxu1  ;;  %v7538_v23 = vpop.f32.mrb[105].mxu0 }
 0x268   : > { %3734 = vst.msk [vmem:[%s7162_s27 + $0x58] sm:$0xff] %vm365_vm0, %v7525_v48  ;;  %5033 = vpow2.f32 %v2371_v5  ;;  %v3095_v30 = vsub.f32 %v8834_v56, %v2295_v29  ;;  %v3287_v25 = vsub.f32 %v7480_v41, %v2295_v29  ;;  %v3479_v15 = vsub.f32 %v7484_v57, %v2295_v29  ;;  %8836 = vst [vmem:[#allocation101_spill] sm:$0xff] %v7536_v6 }
 0x269   : > { %v5020_v7 = vpop.eup %5019  ;;  %v3444_v39 = vadd.f32 %v3412_v17, %v3252_v8  ;;  %v3572_v0 = vadd.f32 %v5018_v40, %v3380_v27  ;;  %5035 = vpow2.f32 %v2563_v43  ;;  %v2266_v9 = vmax.f32 %v8835_v24, %v7492_v52  ;;  %8837 = vst [vmem:[#allocation177_spill] sm:$0xff] %v7538_v23 }
 0x26a   : > { %v5022_v14 = vpop.eup %5021  ;;  %v2457_v63 = vmul.f32 %v5020_v7, %v8823_v34  ;;  %5037 = vpow2.f32 %v2755_v21  ;;  %v3139_v1 = vmul.f32 1.442695, %v3095_v30  ;;  %v3331_v58 = vmul.f32 1.442695, %v3287_v25 }
 0x26b   : > { %v5024_v28 = vpop.eup %5023  ;;  %v3636_v5 = vadd.f32 %v3604_v35, %v3444_v39  ;;  %5039 = vrcp.f32 %v3572_v0  ;;  %v2617_v29 = vadd.f32 %v5022_v14, %v5020_v7  ;;  %v2649_v17 = vmul.f32 %v5022_v14, %v8824_v22  ;;  %v8838_v22 = vld [vmem:[#allocation40_spill] sm:$0xff] }
 0x26c   : > { %v5026_v40 = vpop.eup %5025  ;;  %v2841_v43 = vmul.f32 %v5024_v28, %v8825_v20  ;;  %5041 = vpow2.f32 %v2947_v37  ;;  %v3523_v8 = vmul.f32 1.442695, %v3479_v15  ;;  %v7544_v27 = vmax.f32 %v2266_v9, %v7496_v26  ;;  %v8839_v20 = vld [vmem:[#allocation41_spill] sm:$0xff] }
 0x26d   : > { %v5028_v24 = vpop.eup %5027  ;;  %v2681_v23 = vadd.f32 %v2649_v17, %v2457_v63  ;;  %v2809_v34 = vadd.f32 %v5024_v28, %v2617_v29  ;;  %v3033_v21 = vmul.f32 %v5026_v40, %v8826_v49  ;;  %5043 = vpow2.f32 %v3139_v1  ;;  %v8840_v63 = vld [vmem:[#allocation44_spill] sm:$0xff]  ;;  %v8841_v28 = vld [vmem:[#allocation121_spill] sm:$0xff] }
 0x26e   : > { %v5030_v30 = vpop.eup %5029  ;;  %v3225_v35 = vmul.f32 %v5028_v24, %v8827_v45  ;;  %5045 = vpow2.f32 %v3331_v58  ;;  %v2330_v25 = vsub.f32 %v8838_v22, %v7544_v27  ;;  %v2522_v37 = vsub.f32 %v8839_v20, %v7544_v27  ;;  %v8842_v17 = vld [vmem:[#allocation124_spill] sm:$0xff] }
 0x26f   : > { %v5032_v15 = vpop.eup %5031  ;;  %v2873_v7 = vadd.f32 %v2841_v43, %v2681_v23  ;;  %v3001_v39 = vadd.f32 %v5026_v40, %v2809_v34  ;;  %v3417_v0 = vmul.f32 %v5030_v30, %v7436_v38  ;;  %5047 = vpow2.f32 %v3523_v8  ;;  %v7564_v43 = vpop.f32.mrb[106].mxu1 }
 0x270   : > { %v3609_v9 = vmul.f32 %v5032_v15, %v7441_v60  ;;  %v2377_v49 = vmul.f32 1.442695, %v2330_v25  ;;  %v2569_v14 = vmul.f32 1.442695, %v2522_v37  ;;  %v2714_v45 = vsub.f32 %v8840_v63, %v7544_v27  ;;  %8843 = vst [vmem:[#allocation178_spill] sm:$0xff] %v7564_v43  ;;  %v7567_v25 = vpop.f32.mrb[106].mxu0 }
 0x271   : > { %v3065_v1 = vadd.f32 %v3033_v21, %v2873_v7  ;;  %v3193_v58 = vadd.f32 %v5028_v24, %v3001_v39  ;;  %v2906_v29 = vsub.f32 %v8841_v28, %v7544_v27  ;;  %v3098_v6 = vsub.f32 %v8842_v17, %v7544_v27 }
 0x272   : > { %v5034_v23 = vpop.eup %5033  ;;  %5049 = vpow2.f32 %v2377_v49  ;;  %v2761_v40 = vmul.f32 1.442695, %v2714_v45  ;;  %v3290_v38 = vsub.f32 %v7492_v52, %v7544_v27  ;;  %v3482_v60 = vsub.f32 %v7496_v26, %v7544_v27 }
 0x273   : > { %v5036_v8 = vpop.eup %5035  ;;  %v3257_v34 = vadd.f32 %v3225_v35, %v3065_v1  ;;  %v3385_v24 = vadd.f32 %v5030_v30, %v3193_v58  ;;  %v2455_v21 = vmul.f32 %v5034_v23, %v8830_v53  ;;  %5051 = vpow2.f32 %v2569_v14 }
 0x274   : > { %v5038_v37 = vpop.eup %5037  ;;  %v2615_v7 = vadd.f32 %v5036_v8, %v5034_v23  ;;  %v2647_v39 = vmul.f32 %v5036_v8, %v8831_v3  ;;  %5053 = vpow2.f32 %v2761_v40  ;;  %v2953_v49 = vmul.f32 1.442695, %v2906_v29 }
 0x275   : > { %v5040_v45 = vpop.eup %5039  ;;  %v3449_v54 = vadd.f32 %v3417_v0, %v3257_v34  ;;  %v3577_v27 = vadd.f32 %v5032_v15, %v3385_v24  ;;  %v2839_v43 = vmul.f32 %v5038_v37, %v8832_v62  ;;  %v3145_v51 = vmul.f32 1.442695, %v3098_v6 }
 0x276   : > { %v5042_v35 = vpop.eup %5041  ;;  %v3700_v30 = vmul.f32 %v5040_v45, %v3636_v5  ;;  %v2679_v1 = vadd.f32 %v2647_v39, %v2455_v21  ;;  %v2807_v53 = vadd.f32 %v5038_v37, %v2615_v7  ;;  %5055 = vpow2.f32 %v2953_v49  ;;  %v8845_v37 = vld [vmem:[#allocation135_spill] sm:$0xff] }
 0x277   : > { %v5044_v14 = vpop.eup %5043  ;;  %v3641_v58 = vadd.f32 %v3609_v9, %v3449_v54  ;;  %5057 = vrcp.f32 %v3577_v27  ;;  %v3031_v23 = vmul.f32 %v5042_v35, %v8833_v10  ;;  %v3337_v3 = vmul.f32 1.442695, %v3290_v38 }
 0x278   : > { %v5046_v40 = vpop.eup %5045  ;;  %3732 = vst.msk [vmem:[%s7162_s27 + $0x48] sm:$0xff] %vm365_vm0, %v3700_v30  ;;  %v3763_v0 = vadd.f32 %v7510_v61, %v3700_v30  ;;  %v2871_v15 = vadd.f32 %v2839_v43, %v2679_v1  ;;  %v2999_v29 = vadd.f32 %v5042_v35, %v2807_v53  ;;  %v3223_v62 = vmul.f32 %v5044_v14, %v8834_v56  ;;  %v8844_v61 = vld [vmem:[#allocation128_spill] sm:$0xff]  ;;  %v8846_v35 = vld [vmem:[#allocation42_spill] sm:$0xff]  ;;  %v8848_v53 = vld [vmem:[#allocation45_spill] sm:$0xff] }
 0x279   : > { %v5048_v6 = vpop.eup %5047  ;;  %v3415_v5 = vmul.f32 %v5046_v40, %v7480_v41  ;;  %5059 = vpow2.f32 %v3145_v51  ;;  %v3529_v8 = vmul.f32 1.442695, %v3482_v60  ;;  %v7579_v54 = vadd.f32 %v7476_v44, %v7120_v2 }
 0x27a   : > { %v3764_v10 = vadd.f32 %v3763_v0, %v7461_v59  ;;  %v3063_v9 = vadd.f32 %v3031_v23, %v2871_v15  ;;  %v3191_v38 = vadd.f32 %v5044_v14, %v2999_v29  ;;  %v3607_v34 = vmul.f32 %v5048_v6, %v7484_v57  ;;  %v7609_v0 = vpop.f32.mrb[107].mxu1 }
 0x27b   : > { %5061 = vpow2.f32 %v3337_v3  ;;  %v2264_v43 = vmax.f32 %v8844_v61, %v7579_v54  ;;  %v7587_v56 = vadd.f32 %v7476_v44, %v7139_v4  ;;  %v7591_v51 = vadd.f32 %v7476_v44, %v7186_v18 }
 0x27c   : > { %v5050_v2 = vpop.eup %5049  ;;  %v3255_v41 = vadd.f32 %v3223_v62, %v3063_v9  ;;  %v3383_v60 = vadd.f32 %v5046_v40, %v3191_v38  ;;  %v7594_v59 = vadd.f32 %v3764_v10, %v7525_v48  ;;  %5063 = vpow2.f32 %v3529_v8  ;;  %v8849_v10 = vld [vmem:[#allocation122_spill] sm:$0xff] }
 0x27d   : > { %v5052_v57 = vpop.eup %5051  ;;  %v2458_v24 = vmul.f32 %v5050_v2, %v8838_v22  ;;  %v2296_v21 = vmax.f32 %v2264_v43, %v7587_v56  ;;  %v2269_v4 = vmax.f32 %v8845_v37, %v7591_v51  ;;  %v7602_v7 = vadd.f32 %v7476_v44, %v7188_v11  ;;  %v8847_v22 = vld [vmem:[#allocation43_spill] sm:$0xff] }
 0x27e   : > { %v5054_v18 = vpop.eup %5053  ;;  %v3447_v39 = vadd.f32 %v3415_v5, %v3255_v41  ;;  %v3575_v49 = vadd.f32 %v5048_v6, %v3383_v60  ;;  %v2618_v45 = vadd.f32 %v5052_v57, %v5050_v2  ;;  %v2650_v48 = vmul.f32 %v5052_v57, %v8839_v20 }
 0x27f   : > { %v2842_v27 = vmul.f32 %v5054_v18, %v8840_v63  ;;  %v2328_v30 = vsub.f32 %v8846_v35, %v2296_v21  ;;  %v2520_v1 = vsub.f32 %v8847_v22, %v2296_v21  ;;  %v2712_v14 = vsub.f32 %v8848_v53, %v2296_v21 }
 0x280   : > { %v5056_v23 = vpop.eup %5055  ;;  %v3639_v3 = vadd.f32 %v3607_v34, %v3447_v39  ;;  %5065 = vrcp.f32 %v3575_v49  ;;  %v2682_v40 = vadd.f32 %v2650_v48, %v2458_v24  ;;  %v2810_v11 = vadd.f32 %v5054_v18, %v2618_v45  ;;  %v8850_v34 = vld [vmem:[#allocation126_spill] sm:$0xff] }
 0x281   : > { %v5058_v15 = vpop.eup %5057  ;;  %v3034_v29 = vmul.f32 %v5056_v23, %v8841_v28  ;;  %v2373_v20 = vmul.f32 1.442695, %v2328_v30  ;;  %v2565_v62 = vmul.f32 1.442695, %v2520_v1  ;;  %v2757_v63 = vmul.f32 1.442695, %v2712_v14 }
 0x282   : > { %v7612_v6 = vmul.f32 %v5058_v15, %v3641_v58  ;;  %v2874_v5 = vadd.f32 %v2842_v27, %v2682_v40  ;;  %v3002_v8 = vadd.f32 %v5056_v23, %v2810_v11  ;;  %v2904_v9 = vsub.f32 %v8849_v10, %v2296_v21  ;;  %v8852_v11 = vld [vmem:[#allocation47_spill] sm:$0xff] }
 0x283   : > { %v5060_v38 = vpop.eup %5059  ;;  %5067 = vpow2.f32 %v2373_v20  ;;  %v3096_v61 = vsub.f32 %v8850_v34, %v2296_v21  ;;  %v3288_v43 = vsub.f32 %v7579_v54, %v2296_v21  ;;  %v3480_v2 = vsub.f32 %v7587_v56, %v2296_v21  ;;  %v7623_v21 = vpop.f32.mrb[107].mxu0 }
 0x284   : > { %3737 = vst.msk [vmem:[%s7162_s27 + $0x70] sm:$0xff] %vm365_vm0, %v7612_v6  ;;  %v3066_v28 = vadd.f32 %v3034_v29, %v2874_v5  ;;  %v3194_v41 = vadd.f32 %v5060_v38, %v3002_v8  ;;  %v3226_v58 = vmul.f32 %v5060_v38, %v8842_v17  ;;  %5069 = vpow2.f32 %v2565_v62 }
 0x285   : > { %v5062_v60 = vpop.eup %5061  ;;  %5071 = vpow2.f32 %v2757_v63  ;;  %v2949_v57 = vmul.f32 1.442695, %v2904_v9  ;;  %v3141_v24 = vmul.f32 1.442695, %v3096_v61  ;;  %v3333_v37 = vmul.f32 1.442695, %v3288_v43 }
 0x286   : > { %v5064_v18 = vpop.eup %5063  ;;  %v3258_v39 = vadd.f32 %v3226_v58, %v3066_v28  ;;  %v3386_v49 = vadd.f32 %v5062_v60, %v3194_v41  ;;  %v3418_v45 = vmul.f32 %v5062_v60, %v7492_v52  ;;  %v3525_v48 = vmul.f32 1.442695, %v3480_v2  ;;  %v8851_v52 = vld [vmem:[#allocation46_spill] sm:$0xff]  ;;  %v8856_v60 = vld [vmem:[#allocation137_spill] sm:$0xff] }
 0x287   : > { %v3610_v27 = vmul.f32 %v5064_v18, %v7496_v26  ;;  %5073 = vpow2.f32 %v2949_v57  ;;  %v2301_v30 = vmax.f32 %v2269_v4, %v7602_v7  ;;  %v7629_v17 = vadd.f32 %v7476_v44, %v7211_v32  ;;  %v8853_v26 = vld [vmem:[#allocation48_spill] sm:$0xff]  ;;  %v8854_v32 = vld [vmem:[#allocation129_spill] sm:$0xff]  ;;  %v8855_v63 = vld [vmem:[#allocation130_spill] sm:$0xff] }
 0x288   : > { %v3450_v1 = vadd.f32 %v3418_v45, %v3258_v39  ;;  %v3578_v14 = vadd.f32 %v5064_v18, %v3386_v49  ;;  %5075 = vpow2.f32 %v3141_v24  ;;  %v7633_v23 = vadd.f32 %v7476_v44, %v7214_v33 }
 0x289   : > { %5077 = vpow2.f32 %v3333_v37  ;;  %v2333_v40 = vsub.f32 %v8851_v52, %v2301_v30  ;;  %v2525_v15 = vsub.f32 %v8852_v11, %v2301_v30  ;;  %v2717_v29 = vsub.f32 %v8853_v26, %v2301_v30 }
 0x28a   : > { %v5066_v4 = vpop.eup %5065  ;;  %v3642_v20 = vadd.f32 %v3610_v27, %v3450_v1  ;;  %5079 = vrcp.f32 %v3578_v14  ;;  %v2909_v62 = vsub.f32 %v8854_v32, %v2301_v30  ;;  %v3101_v5 = vsub.f32 %v8855_v63, %v2301_v30 }
 0x28b   : > { %v3703_v8 = vmul.f32 %v5066_v4, %v3639_v3  ;;  %5081 = vpow2.f32 %v3525_v48  ;;  %v2383_v9 = vmul.f32 1.442695, %v2333_v40  ;;  %v2575_v33 = vmul.f32 1.442695, %v2525_v15  ;;  %v8859_v4 = vld [vmem:[#allocation50_spill] sm:$0xff] }
 0x28c   : > { %v2767_v38 = vmul.f32 1.442695, %v2717_v29  ;;  %v2959_v61 = vmul.f32 1.442695, %v2909_v62  ;;  %v3151_v43 = vmul.f32 1.442695, %v3101_v5  ;;  %v3293_v2 = vsub.f32 %v7591_v51, %v2301_v30 }
 0x28d   : > { %v5068_v28 = vpop.eup %5067  ;;  %3735 = vst.msk [vmem:[%s7162_s27 + $0x60] sm:$0xff] %vm365_vm0, %v3703_v8  ;;  %v7644_v41 = vadd.f32 %v7594_v59, %v3703_v8  ;;  %5083 = vpow2.f32 %v2383_v9  ;;  %v3485_v58 = vsub.f32 %v7602_v7, %v2301_v30  ;;  %v2267_v3 = vmax.f32 %v8856_v60, %v7629_v17  ;;  %v7670_v5 = vpop.f32.mrb[108].mxu1 }
 0x28e   : > { %v5070_v57 = vpop.eup %5069  ;;  %v2456_v24 = vmul.f32 %v5068_v28, %v8846_v35  ;;  %5085 = vpow2.f32 %v2575_v33  ;;  %v3343_v37 = vmul.f32 1.442695, %v3293_v2  ;;  %v7652_v18 = vadd.f32 %v7476_v44, %v7248_v12  ;;  %v8857_v35 = vld [vmem:[#allocation139_spill] sm:$0xff]  ;;  %v7672_v8 = vpop.f32.mrb[108].mxu0 }
 0x28f   : > { %v5072_v39 = vpop.eup %5071  ;;  %v2616_v49 = vadd.f32 %v5070_v57, %v5068_v28  ;;  %v2648_v59 = vmul.f32 %v5070_v57, %v8847_v22  ;;  %5087 = vpow2.f32 %v2767_v38  ;;  %v3535_v45 = vmul.f32 1.442695, %v3485_v58  ;;  %v8860_v28 = vld [vmem:[#allocation51_spill] sm:$0xff] }
 0x290   : > { %v2840_v48 = vmul.f32 %v5072_v39, %v8848_v53  ;;  %5089 = vpow2.f32 %v2959_v61  ;;  %v7657_v27 = vmax.f32 %v2267_v3, %v7633_v23  ;;  %v2270_v30 = vmax.f32 %v8857_v35, %v7652_v18  ;;  %v8858_v53 = vld [vmem:[#allocation49_spill] sm:$0xff] }
 0x291   : > { %v5074_v1 = vpop.eup %5073  ;;  %v2680_v14 = vadd.f32 %v2648_v59, %v2456_v24  ;;  %v2808_v40 = vadd.f32 %v5072_v39, %v2616_v49  ;;  %5091 = vpow2.f32 %v3151_v43  ;;  %v7663_v12 = vadd.f32 %v7476_v44, %v7250_v46  ;;  %v8862_v59 = vld [vmem:[#allocation132_spill] sm:$0xff] }
 0x292   : > { %v5076_v22 = vpop.eup %5075  ;;  %v3032_v15 = vmul.f32 %v5074_v1, %v8849_v10  ;;  %5093 = vpow2.f32 %v3343_v37  ;;  %v2331_v29 = vsub.f32 %v8858_v53, %v7657_v27  ;;  %v2523_v62 = vsub.f32 %v8859_v4, %v7657_v27  ;;  %v8861_v37 = vld [vmem:[#allocation131_spill] sm:$0xff] }
 0x293   : > { %v5078_v9 = vpop.eup %5077  ;;  %v2872_v33 = vadd.f32 %v2840_v48, %v2680_v14  ;;  %v3000_v38 = vadd.f32 %v5074_v1, %v2808_v40  ;;  %v3224_v46 = vmul.f32 %v5076_v22, %v8850_v34  ;;  %5095 = vpow2.f32 %v3535_v45 }
 0x294   : > { %v5080_v61 = vpop.eup %5079  ;;  %v3416_v10 = vmul.f32 %v5078_v9, %v7579_v54  ;;  %v2379_v43 = vmul.f32 1.442695, %v2331_v29  ;;  %v2571_v2 = vmul.f32 1.442695, %v2523_v62  ;;  %v2715_v58 = vsub.f32 %v8860_v28, %v7657_v27  ;;  %v7693_v29 = vpop.f32.mrb[109].mxu0 }
 0x295   : > { %v5082_v60 = vpop.eup %5081  ;;  %v7678_v3 = vmul.f32 %v5080_v61, %v3642_v20  ;;  %v3064_v57 = vadd.f32 %v3032_v15, %v2872_v33  ;;  %v3192_v24 = vadd.f32 %v5076_v22, %v3000_v38  ;;  %v2907_v39 = vsub.f32 %v8861_v37, %v7657_v27  ;;  %v7691_v15 = vpop.f32.mrb[109].mxu1 }
 0x296   : > { %v3608_v34 = vmul.f32 %v5082_v60, %v7587_v56  ;;  %5097 = vpow2.f32 %v2379_v43  ;;  %v2763_v49 = vmul.f32 1.442695, %v2715_v58  ;;  %v3099_v54 = vsub.f32 %v8862_v59, %v7657_v27 }
 0x297   : > { %v5084_v45 = vpop.eup %5083  ;;  %3738 = vst.msk [vmem:[%s7162_s27 + $0x78] sm:$0xff] %vm365_vm0, %v7678_v3  ;;  %v3256_v48 = vadd.f32 %v3224_v46, %v3064_v57  ;;  %v3384_v1 = vadd.f32 %v5078_v9, %v3192_v24  ;;  %5099 = vpow2.f32 %v2571_v2  ;;  %v2955_v20 = vmul.f32 1.442695, %v2907_v39 }
 0x298   : > { %v5086_v14 = vpop.eup %5085  ;;  %v2461_v40 = vmul.f32 %v5084_v45, %v8851_v52  ;;  %5101 = vpow2.f32 %v2763_v49  ;;  %v3147_v22 = vmul.f32 1.442695, %v3099_v54  ;;  %v3291_v56 = vsub.f32 %v7629_v17, %v7657_v27 }
 0x299   : > { %v5088_v62 = vpop.eup %5087  ;;  %v3448_v33 = vadd.f32 %v3416_v10, %v3256_v48  ;;  %v3576_v38 = vadd.f32 %v5082_v60, %v3384_v1  ;;  %v2621_v61 = vadd.f32 %v5086_v14, %v5084_v45  ;;  %v2653_v9 = vmul.f32 %v5086_v14, %v8852_v11  ;;  %v8863_v14 = vld [vmem:[#allocation52_spill] sm:$0xff] }
 0x29a   : > { %v5090_v46 = vpop.eup %5089  ;;  %v2845_v43 = vmul.f32 %v5088_v62, %v8853_v26  ;;  %5103 = vpow2.f32 %v2955_v20  ;;  %v3339_v52 = vmul.f32 1.442695, %v3291_v56  ;;  %v3483_v2 = vsub.f32 %v7633_v23, %v7657_v27 }
 0x29b   : > { %v5092_v58 = vpop.eup %5091  ;;  %v3640_v57 = vadd.f32 %v3608_v34, %v3448_v33  ;;  %5105 = vrcp.f32 %v3576_v38  ;;  %v2685_v24 = vadd.f32 %v2653_v9, %v2461_v40  ;;  %v2813_v39 = vadd.f32 %v5088_v62, %v2621_v61  ;;  %v8866_v62 = vld [vmem:[#allocation133_spill] sm:$0xff] }
 0x29c   : > { %v5094_v49 = vpop.eup %5093  ;;  %v3037_v10 = vmul.f32 %v5090_v46, %v8854_v32  ;;  %v3229_v60 = vmul.f32 %v5092_v58, %v8855_v63  ;;  %5107 = vpow2.f32 %v3147_v22  ;;  %v3531_v11 = vmul.f32 1.442695, %v3483_v2  ;;  %v8864_v22 = vld [vmem:[#allocation53_spill] sm:$0xff] }
 0x29d   : > { %v5096_v54 = vpop.eup %5095  ;;  %v2877_v45 = vadd.f32 %v2845_v43, %v2685_v24  ;;  %v3005_v26 = vadd.f32 %v5090_v46, %v2813_v39  ;;  %v3421_v48 = vmul.f32 %v5094_v49, %v7591_v51  ;;  %5109 = vpow2.f32 %v3339_v52  ;;  %v7725_v43 = vpop.f32.mrb[110].mxu1 }
 0x29e   : > { %v3613_v27 = vmul.f32 %v5096_v54, %v7602_v7  ;;  %5111 = vpow2.f32 %v3531_v11  ;;  %v2302_v34 = vmax.f32 %v2270_v30, %v7663_v12  ;;  %v7709_v32 = vadd.f32 %v7476_v44, %v7281_v55  ;;  %v8865_v30 = vld [vmem:[#allocation56_spill] sm:$0xff]  ;;  %8868 = vst [vmem:[#allocation179_spill] sm:$0xff] %v7725_v43 }
 0x29f   : > { %v3069_v63 = vadd.f32 %v3037_v10, %v2877_v45  ;;  %v3197_v1 = vadd.f32 %v5092_v58, %v3005_v26  ;;  %v7713_v20 = vadd.f32 %v7476_v44, %v7306_v16  ;;  %v7717_v51 = vadd.f32 %v7476_v44, %v7351_v13  ;;  %v8867_v16 = vld [vmem:[#allocation136_spill] sm:$0xff]  ;;  %v7729_v26 = vpop.f32.mrb[110].mxu0 }
 0x2a0   : > { %v5098_v7 = vpop.eup %5097  ;;  %v2334_v40 = vsub.f32 %v8863_v14, %v2302_v34  ;;  %v2526_v35 = vsub.f32 %v8864_v22, %v2302_v34  ;;  %v2718_v56 = vsub.f32 %v8865_v30, %v2302_v34  ;;  %v2910_v55 = vsub.f32 %v8866_v62, %v2302_v34 }
 0x2a1   : > { %v5100_v33 = vpop.eup %5099  ;;  %v3261_v38 = vadd.f32 %v3229_v60, %v3069_v63  ;;  %v3389_v61 = vadd.f32 %v5094_v49, %v3197_v1  ;;  %v2459_v9 = vmul.f32 %v5098_v7, %v8858_v53  ;;  %v3102_v46 = vsub.f32 %v8867_v16, %v2302_v34 }
 0x2a2   : > { %v5102_v13 = vpop.eup %5101  ;;  %v2619_v52 = vadd.f32 %v5100_v33, %v5098_v7  ;;  %v2651_v2 = vmul.f32 %v5100_v33, %v8859_v4  ;;  %v2385_v58 = vmul.f32 1.442695, %v2334_v40  ;;  %v2577_v24 = vmul.f32 1.442695, %v2526_v35 }
 0x2a3   : > { %v3453_v39 = vadd.f32 %v3421_v48, %v3261_v38  ;;  %v3581_v10 = vadd.f32 %v5096_v54, %v3389_v61  ;;  %v2843_v11 = vmul.f32 %v5102_v13, %v8860_v28  ;;  %v2769_v45 = vmul.f32 1.442695, %v2718_v56 }
 0x2a4   : > { %v5104_v49 = vpop.eup %5103  ;;  %v2683_v60 = vadd.f32 %v2651_v2, %v2459_v9  ;;  %v2811_v53 = vadd.f32 %v5102_v13, %v2619_v52  ;;  %5113 = vpow2.f32 %v2385_v58  ;;  %v2961_v63 = vmul.f32 1.442695, %v2910_v55 }
 0x2a5   : > { %v5106_v1 = vpop.eup %5105  ;;  %v3645_v43 = vadd.f32 %v3613_v27, %v3453_v39  ;;  %5115 = vrcp.f32 %v3581_v10  ;;  %v3035_v4 = vmul.f32 %v5104_v49, %v8861_v37  ;;  %v3153_v7 = vmul.f32 1.442695, %v3102_v46 }
 0x2a6   : > { %v5108_v40 = vpop.eup %5107  ;;  %v3704_v48 = vmul.f32 %v5106_v1, %v3640_v57  ;;  %v2875_v54 = vadd.f32 %v2843_v11, %v2683_v60  ;;  %v3003_v35 = vadd.f32 %v5104_v49, %v2811_v53  ;;  %5117 = vpow2.f32 %v2577_v24 }
 0x2a7   : > { %v5110_v28 = vpop.eup %5109  ;;  %v3227_v56 = vmul.f32 %v5108_v40, %v8862_v59  ;;  %5119 = vpow2.f32 %v2769_v45  ;;  %v3294_v33 = vsub.f32 %v7652_v18, %v2302_v34  ;;  %v3486_v55 = vsub.f32 %v7663_v12, %v2302_v34  ;;  %v8869_v34 = vld [vmem:[#allocation140_spill] sm:$0xff] }
 0x2a8   : > { %v5112_v38 = vpop.eup %5111  ;;  %3736 = vst.msk [vmem:[%s7162_s27 + $0x68] sm:$0xff] %vm365_vm0, %v3704_v48  ;;  %v3767_v27 = vadd.f32 %v7644_v41, %v3704_v48  ;;  %v3067_v37 = vadd.f32 %v3035_v4, %v2875_v54  ;;  %v3195_v61 = vadd.f32 %v5108_v40, %v3003_v35  ;;  %v3419_v57 = vmul.f32 %v5110_v28, %v7629_v17  ;;  %v8870_v41 = vld [vmem:[#allocation147_spill] sm:$0xff]  ;;  %v8873_v40 = vld [vmem:[#allocation57_spill] sm:$0xff] }
 0x2a9   : > { %v3611_v9 = vmul.f32 %v5112_v38, %v7633_v23  ;;  %5121 = vpow2.f32 %v2961_v63  ;;  %v3345_v46 = vmul.f32 1.442695, %v3294_v33  ;;  %v3537_v13 = vmul.f32 1.442695, %v3486_v55  ;;  %v7781_v55 = vpop.f32.mrb[111].mxu1 }
 0x2aa   : > { %v3768_v59 = vadd.f32 %v3767_v27, %v7612_v6  ;;  %v3259_v52 = vadd.f32 %v3227_v56, %v3067_v37  ;;  %v3387_v2 = vadd.f32 %v5110_v28, %v3195_v61  ;;  %5123 = vpow2.f32 %v3153_v7  ;;  %v8872_v7 = vld [vmem:[#allocation55_spill] sm:$0xff]  ;;  %v8874_v28 = vld [vmem:[#allocation134_spill] sm:$0xff] }
 0x2ab   : > { %5125 = vpow2.f32 %v3345_v46  ;;  %v2268_v58 = vmax.f32 %v8869_v34, %v7709_v32  ;;  %v2273_v24 = vmax.f32 %v8870_v41, %v7717_v51  ;;  %v7747_v17 = vadd.f32 %v7476_v44, %v7353_v19  ;;  %v8875_v56 = vld [vmem:[#allocation138_spill] sm:$0xff] }
 0x2ac   : > { %v3451_v23 = vadd.f32 %v3419_v57, %v3259_v52  ;;  %v3579_v39 = vadd.f32 %v5112_v38, %v3387_v2  ;;  %v7750_v10 = vadd.f32 %v3768_v59, %v7678_v3  ;;  %5127 = vpow2.f32 %v3537_v13  ;;  %v7783_v38 = vpop.f32.mrb[111].mxu0 }
 0x2ad   : > { %v2300_v6 = vmax.f32 %v2268_v58, %v7713_v20  ;;  %v7754_v11 = vmax.f32 %v2273_v24, %v7747_v17  ;;  %v7758_v45 = vadd.f32 %v7476_v44, %v7372_v50  ;;  %v7762_v49 = vadd.f32 %v7476_v44, %v7375_v31  ;;  %v8871_v50 = vld [vmem:[#allocation54_spill] sm:$0xff] }
 0x2ae   : > { %v5114_v19 = vpop.eup %5113  ;;  %v3643_v60 = vadd.f32 %v3611_v9, %v3451_v23  ;;  %5129 = vrcp.f32 %v3579_v39  ;;  %v7766_v3 = vadd.f32 %v7476_v44, %v7408_v47  ;;  %v7770_v53 = vadd.f32 %v7476_v44, %v7410_v36  ;;  %v8876_v24 = vld [vmem:[#allocation58_spill] sm:$0xff] }
 0x2af   : > { %v5116_v63 = vpop.eup %5115  ;;  %v2462_v1 = vmul.f32 %v5114_v19, %v8863_v14  ;;  %v2332_v4 = vsub.f32 %v8871_v50, %v2300_v6  ;;  %v2524_v31 = vsub.f32 %v8872_v7, %v2300_v6  ;;  %v2716_v48 = vsub.f32 %v8873_v40, %v2300_v6 }
 0x2b0   : > { %v5118_v54 = vpop.eup %5117  ;;  %v7776_v35 = vmul.f32 %v5116_v63, %v3645_v43  ;;  %v2908_v47 = vsub.f32 %v8874_v28, %v2300_v6  ;;  %v3100_v33 = vsub.f32 %v8875_v56, %v2300_v6  ;;  %v3292_v36 = vsub.f32 %v7709_v32, %v2300_v6 }
 0x2b1   : > { %v5120_v14 = vpop.eup %5119  ;;  %v2622_v27 = vadd.f32 %v5118_v54, %v5114_v19  ;;  %v2654_v37 = vmul.f32 %v5118_v54, %v8864_v22  ;;  %v2381_v61 = vmul.f32 1.442695, %v2332_v4  ;;  %v2573_v57 = vmul.f32 1.442695, %v2524_v31 }
 0x2b2   : > { %3741 = vst.msk [vmem:[%s7162_s27 + $0x90] sm:$0xff] %vm365_vm0, %v7776_v35  ;;  %v2846_v43 = vmul.f32 %v5120_v14, %v8865_v30  ;;  %v2765_v9 = vmul.f32 1.442695, %v2716_v48  ;;  %v2957_v46 = vmul.f32 1.442695, %v2908_v47  ;;  %v3484_v22 = vsub.f32 %v7713_v20, %v2300_v6 }
 0x2b3   : > { %v3149_v13 = vmul.f32 1.442695, %v3100_v33  ;;  %v5122_v59 = vpop.eup %5121  ;;  %v2686_v52 = vadd.f32 %v2654_v37, %v2462_v1  ;;  %v2814_v2 = vadd.f32 %v5120_v14, %v2622_v27  ;;  %5131 = vpow2.f32 %v2381_v61  ;;  %v8877_v33 = vld [vmem:[#allocation59_spill] sm:$0xff]  ;;  %v8879_v27 = vld [vmem:[#allocation141_spill] sm:$0xff] }
 0x2b4   : > { %v3341_v34 = vmul.f32 1.442695, %v3292_v36  ;;  %v5124_v58 = vpop.eup %5123  ;;  %v3038_v41 = vmul.f32 %v5122_v59, %v8866_v62  ;;  %5133 = vpow2.f32 %v2573_v57  ;;  %v2337_v23 = vsub.f32 %v8876_v24, %v7754_v11 }
 0x2b5   : > { %v5126_v39 = vpop.eup %5125  ;;  %v2878_v19 = vadd.f32 %v2846_v43, %v2686_v52  ;;  %v3006_v30 = vadd.f32 %v5122_v59, %v2814_v2  ;;  %v3230_v63 = vmul.f32 %v5124_v58, %v8867_v16  ;;  %5135 = vpow2.f32 %v2765_v9  ;;  %v8878_v16 = vld [vmem:[#allocation60_spill] sm:$0xff]  ;;  %v8880_v52 = vld [vmem:[#allocation142_spill] sm:$0xff] }
 0x2b6   : > { %v5128_v4 = vpop.eup %5127  ;;  %v3422_v1 = vmul.f32 %v5126_v39, %v7652_v18  ;;  %5137 = vpow2.f32 %v2957_v46  ;;  %v3533_v31 = vmul.f32 1.442695, %v3484_v22  ;;  %v2391_v48 = vmul.f32 1.442695, %v2337_v23 }
 0x2b7   : > { %v3070_v54 = vadd.f32 %v3038_v41, %v2878_v19  ;;  %v3198_v62 = vadd.f32 %v5124_v58, %v3006_v30  ;;  %v3614_v6 = vmul.f32 %v5128_v4, %v7663_v12  ;;  %5139 = vpow2.f32 %v3149_v13  ;;  %v8881_v58 = vld [vmem:[#allocation149_spill] sm:$0xff] }
 0x2b8   : > { %v5130_v47 = vpop.eup %5129  ;;  %5141 = vpow2.f32 %v3341_v34  ;;  %v2529_v36 = vsub.f32 %v8877_v33, %v7754_v11  ;;  %v2721_v14 = vsub.f32 %v8878_v16, %v7754_v11  ;;  %v2913_v18 = vsub.f32 %v8879_v27, %v7754_v11 }
 0x2b9   : > { %v3707_v37 = vmul.f32 %v5130_v47, %v3643_v60  ;;  %v3262_v61 = vadd.f32 %v3230_v63, %v3070_v54  ;;  %v3390_v57 = vadd.f32 %v5126_v39, %v3198_v62  ;;  %5143 = vpow2.f32 %v3533_v31  ;;  %v8882_v39 = vld [vmem:[#allocation151_spill] sm:$0xff] }
 0x2ba   : > { %5145 = vpow2.f32 %v2391_v48  ;;  %v2583_v43 = vmul.f32 1.442695, %v2529_v36  ;;  %v2775_v9 = vmul.f32 1.442695, %v2721_v14  ;;  %v2967_v12 = vmul.f32 1.442695, %v2913_v18 }
 0x2bb   : > { %3739 = vst.msk [vmem:[%s7162_s27 + $0x80] sm:$0xff] %vm365_vm0, %v3707_v37  ;;  %v7806_v46 = vadd.f32 %v7750_v10, %v3707_v37  ;;  %v3454_v13 = vadd.f32 %v3422_v1, %v3262_v61  ;;  %v3582_v59 = vadd.f32 %v5128_v4, %v3390_v57  ;;  %v3105_v2 = vsub.f32 %v8880_v52, %v7754_v11 }
 0x2bc   : > { %5147 = vpow2.f32 %v2583_v43  ;;  %v3297_v60 = vsub.f32 %v7717_v51, %v7754_v11  ;;  %v3489_v34 = vsub.f32 %v7747_v17, %v7754_v11  ;;  %v2271_v41 = vmax.f32 %v8881_v58, %v7758_v45  ;;  %v8884_v43 = vld [vmem:[#allocation62_spill] sm:$0xff]  ;;  %v8886_v58 = vld [vmem:[#allocation143_spill] sm:$0xff] }
 0x2bd   : > { %v5132_v22 = vpop.eup %5131  ;;  %v3646_v23 = vadd.f32 %v3614_v6, %v3454_v13  ;;  %5149 = vrcp.f32 %v3582_v59  ;;  %v3159_v10 = vmul.f32 1.442695, %v3105_v2  ;;  %v2274_v19 = vmax.f32 %v8882_v39, %v7766_v3  ;;  %v8885_v59 = vld [vmem:[#allocation63_spill] sm:$0xff] }
 0x2be   : > { %v5134_v30 = vpop.eup %5133  ;;  %v2460_v63 = vmul.f32 %v5132_v22, %v8871_v50  ;;  %5151 = vpow2.f32 %v2775_v9  ;;  %v3351_v4 = vmul.f32 1.442695, %v3297_v60  ;;  %v3543_v1 = vmul.f32 1.442695, %v3489_v34 }
 0x2bf   : > { %v5136_v31 = vpop.eup %5135  ;;  %v2620_v48 = vadd.f32 %v5134_v30, %v5132_v22  ;;  %v2652_v11 = vmul.f32 %v5134_v30, %v8872_v7  ;;  %5153 = vpow2.f32 %v2967_v12  ;;  %v7821_v54 = vmax.f32 %v2271_v41, %v7762_v49 }
 0x2c0   : > { %v5138_v62 = vpop.eup %5137  ;;  %v2844_v6 = vmul.f32 %v5136_v31, %v8873_v40  ;;  %5155 = vpow2.f32 %v3159_v10  ;;  %v7825_v47 = vmax.f32 %v2274_v19, %v7770_v53  ;;  %v7829_v50 = vadd.f32 %v7476_v44, %v7449_v42  ;;  %v8883_v40 = vld [vmem:[#allocation61_spill] sm:$0xff] }
 0x2c1   : > { %v5140_v36 = vpop.eup %5139  ;;  %v2684_v14 = vadd.f32 %v2652_v11, %v2460_v63  ;;  %v2812_v18 = vadd.f32 %v5136_v31, %v2620_v48  ;;  %v3036_v7 = vmul.f32 %v5138_v62, %v8874_v28  ;;  %5157 = vpow2.f32 %v3351_v4 }
 0x2c2   : > { %v5142_v37 = vpop.eup %5141  ;;  %v3228_v61 = vmul.f32 %v5140_v36, %v8875_v56  ;;  %5159 = vpow2.f32 %v3543_v1  ;;  %v2335_v57 = vsub.f32 %v8883_v40, %v7821_v54  ;;  %v2527_v9 = vsub.f32 %v8884_v43, %v7821_v54 }
 0x2c3   : > { %v5144_v12 = vpop.eup %5143  ;;  %v2876_v13 = vadd.f32 %v2844_v6, %v2684_v14  ;;  %v3004_v42 = vadd.f32 %v5138_v62, %v2812_v18  ;;  %v3420_v44 = vmul.f32 %v5142_v37, %v7709_v32  ;;  %v2719_v2 = vsub.f32 %v8885_v59, %v7821_v54  ;;  %v8887_v32 = vld [vmem:[#allocation144_spill] sm:$0xff] }
 0x2c4   : > { %v5146_v28 = vpop.eup %5145  ;;  %v3612_v60 = vmul.f32 %v5144_v12, %v7713_v20  ;;  %v2387_v34 = vmul.f32 1.442695, %v2335_v57  ;;  %v2579_v56 = vmul.f32 1.442695, %v2527_v9  ;;  %v2911_v41 = vsub.f32 %v8886_v58, %v7821_v54 }
 0x2c5   : > { %v3068_v22 = vadd.f32 %v3036_v7, %v2876_v13  ;;  %v3196_v10 = vadd.f32 %v5140_v36, %v3004_v42  ;;  %v2465_v39 = vmul.f32 %v5146_v28, %v8876_v24  ;;  %v2771_v19 = vmul.f32 1.442695, %v2719_v2 }
 0x2c6   : > { %v5148_v30 = vpop.eup %5147  ;;  %5161 = vpow2.f32 %v2387_v34  ;;  %v2963_v63 = vmul.f32 1.442695, %v2911_v41  ;;  %v3103_v4 = vsub.f32 %v8887_v32, %v7821_v54  ;;  %v3295_v1 = vsub.f32 %v7758_v45, %v7821_v54 }
 0x2c7   : > { %v5150_v20 = vpop.eup %5149  ;;  %v3260_v31 = vadd.f32 %v3228_v61, %v3068_v22  ;;  %v3388_v48 = vadd.f32 %v5142_v37, %v3196_v10  ;;  %v2625_v11 = vadd.f32 %v5148_v30, %v5146_v28  ;;  %v2657_v62 = vmul.f32 %v5148_v30, %v8877_v33 }
 0x2c8   : > { %v5152_v6 = vpop.eup %5151  ;;  %v7849_v36 = vmul.f32 %v5150_v20, %v3646_v23  ;;  %5163 = vpow2.f32 %v2579_v56  ;;  %v3155_v24 = vmul.f32 1.442695, %v3103_v4  ;;  %v3347_v14 = vmul.f32 1.442695, %v3295_v1 }
 0x2c9   : > { %v5154_v18 = vpop.eup %5153  ;;  %v3452_v7 = vadd.f32 %v3420_v44, %v3260_v31  ;;  %v3580_v57 = vadd.f32 %v5144_v12, %v3388_v48  ;;  %v2689_v9 = vadd.f32 %v2657_v62, %v2465_v39  ;;  %v2817_v13 = vadd.f32 %v5152_v6, %v2625_v11  ;;  %v8892_v48 = vld [vmem:[#allocation148_spill] sm:$0xff] }
 0x2ca   : > { %v5156_v42 = vpop.eup %5155  ;;  %3742 = vst.msk [vmem:[%s7162_s27 + $0x98] sm:$0xff] %vm365_vm0, %v7849_v36  ;;  %v2849_v37 = vmul.f32 %v5152_v6, %v8878_v16  ;;  %v3041_v61 = vmul.f32 %v5154_v18, %v8879_v27  ;;  %5165 = vpow2.f32 %v2771_v19  ;;  %v3487_v33 = vsub.f32 %v7762_v49, %v7821_v54  ;;  %v8888_v27 = vld [vmem:[#allocation64_spill] sm:$0xff] }
 0x2cb   : > { %v5158_v23 = vpop.eup %5157  ;;  %v3644_v2 = vadd.f32 %v3612_v60, %v3452_v7  ;;  %5167 = vrcp.f32 %v3580_v57  ;;  %v3009_v28 = vadd.f32 %v5154_v18, %v2817_v13  ;;  %v3233_v12 = vmul.f32 %v5156_v42, %v8880_v52  ;;  %v8889_v60 = vld [vmem:[#allocation65_spill] sm:$0xff]  ;;  %v8890_v52 = vld [vmem:[#allocation68_spill] sm:$0xff] }
 0x2cc   : > { %v5160_v44 = vpop.eup %5159  ;;  %v2881_v34 = vadd.f32 %v2849_v37, %v2689_v9  ;;  %v3425_v56 = vmul.f32 %v5158_v23, %v7717_v51  ;;  %5169 = vpow2.f32 %v2963_v63  ;;  %v3539_v41 = vmul.f32 1.442695, %v3487_v33  ;;  %v8891_v63 = vld [vmem:[#allocation145_spill] sm:$0xff]  ;;  %v8893_v33 = vld [vmem:[#allocation152_spill] sm:$0xff] }
 0x2cd   : > { %v3201_v22 = vadd.f32 %v5156_v42, %v3009_v28  ;;  %v3617_v16 = vmul.f32 %v5160_v44, %v7747_v17  ;;  %5171 = vpow2.f32 %v3155_v24  ;;  %v2338_v10 = vsub.f32 %v8888_v27, %v7825_v47 }
 0x2ce   : > { %v3073_v54 = vadd.f32 %v3041_v61, %v2881_v34  ;;  %5173 = vpow2.f32 %v3347_v14  ;;  %v2530_v39 = vsub.f32 %v8889_v60, %v7825_v47  ;;  %v2722_v19 = vsub.f32 %v8890_v52, %v7825_v47 }
 0x2cf   : > { %v3393_v30 = vadd.f32 %v5158_v23, %v3201_v22  ;;  %5175 = vpow2.f32 %v3539_v41  ;;  %v2393_v51 = vmul.f32 1.442695, %v2338_v10  ;;  %v2914_v4 = vsub.f32 %v8891_v63, %v7825_v47  ;;  %v8894_v22 = vld [vmem:[#allocation10_spill] sm:$0xff] }
 0x2d0   : > { %v5162_v1 = vpop.eup %5161  ;;  %v3265_v17 = vadd.f32 %v3233_v12, %v3073_v54  ;;  %v2585_v20 = vmul.f32 1.442695, %v2530_v39  ;;  %v2777_v31 = vmul.f32 1.442695, %v2722_v19  ;;  %v3106_v11 = vsub.f32 %v8892_v48, %v7825_v47 }
 0x2d1   : > { %v3585_v62 = vadd.f32 %v5160_v44, %v3393_v30  ;;  %v2463_v6 = vmul.f32 %v5162_v1, %v8883_v40  ;;  %5177 = vpow2.f32 %v2393_v51  ;;  %v2969_v24 = vmul.f32 1.442695, %v2914_v4 }
 0x2d2   : > { %v5164_v14 = vpop.eup %5163  ;;  %v3457_v18 = vadd.f32 %v3425_v56, %v3265_v17  ;;  %5179 = vpow2.f32 %v2585_v20  ;;  %v3161_v7 = vmul.f32 1.442695, %v3106_v11  ;;  %v3298_v57 = vsub.f32 %v7766_v3, %v7825_v47 }
 0x2d3   : > { %5181 = vrcp.f32 %v3585_v62  ;;  %v2623_v9 = vadd.f32 %v5164_v14, %v5162_v1  ;;  %v2655_v13 = vmul.f32 %v5164_v14, %v8884_v43  ;;  %v3490_v42 = vsub.f32 %v7770_v53, %v7825_v47  ;;  %v7883_v47 = vld [vmem:[%s8269_s2] ss:$0 sm:$0xff] }
 0x2d4   : > { %v5166_v37 = vpop.eup %5165  ;;  %v3649_v61 = vadd.f32 %v3617_v16, %v3457_v18  ;;  %5183 = vpow2.f32 %v2777_v31  ;;  %v3353_v40 = vmul.f32 1.442695, %v3298_v57  ;;  %v2272_v23 = vmax.f32 %v8893_v33, %v7829_v50  ;;  %v8895_v31 = vld [vmem:[#allocation11_spill] sm:$0xff]  ;;  %v8898_v57 = vld [vmem:[#allocation69_spill] sm:$0xff] }
 0x2d5   : > { %v5168_v28 = vpop.eup %5167  ;;  %v2687_v12 = vadd.f32 %v2655_v13, %v2463_v6  ;;  %v2815_v44 = vadd.f32 %v5166_v37, %v2623_v9  ;;  %v2847_v34 = vmul.f32 %v5166_v37, %v8885_v59  ;;  %5185 = vpow2.f32 %v2969_v24  ;;  %v8896_v6 = vld [vmem:[#allocation66_spill] sm:$0xff]  ;;  %v8897_v24 = vld [vmem:[#allocation67_spill] sm:$0xff] }
 0x2d6   : > { %v5170_v56 = vpop.eup %5169  ;;  %v3708_v41 = vmul.f32 %v5168_v28, %v3644_v2  ;;  %5187 = vpow2.f32 %v3161_v7  ;;  %v3545_v43 = vmul.f32 1.442695, %v3490_v42  ;;  %v7887_v16 = vadd.f32 %v7883_v47, %v8894_v22  ;;  %v8899_v13 = vld [vmem:[#allocation146_spill] sm:$0xff] }
 0x2d7   : > { %v5172_v10 = vpop.eup %5171  ;;  %v2879_v54 = vadd.f32 %v2847_v34, %v2687_v12  ;;  %v3007_v39 = vadd.f32 %v5170_v56, %v2815_v44  ;;  %v3039_v19 = vmul.f32 %v5170_v56, %v8886_v58  ;;  %5189 = vpow2.f32 %v3353_v40 }
 0x2d8   : > { %v5174_v59 = vpop.eup %5173  ;;  %3740 = vst.msk [vmem:[%s7162_s27 + $0x88] sm:$0xff] %vm365_vm0, %v3708_v41  ;;  %v3771_v2 = vadd.f32 %v7806_v46, %v3708_v41  ;;  %v3231_v30 = vmul.f32 %v5172_v10, %v8887_v32  ;;  %5191 = vpow2.f32 %v3545_v43  ;;  %v2304_v51 = vmax.f32 %v2272_v23, %v7887_v16 }
 0x2d9   : > { %v5176_v4 = vpop.eup %5175  ;;  %v3071_v1 = vadd.f32 %v3039_v19, %v2879_v54  ;;  %v3199_v17 = vadd.f32 %v5172_v10, %v3007_v39  ;;  %v3423_v20 = vmul.f32 %v5174_v59, %v7758_v45  ;;  %v7898_v11 = vadd.f32 %v7883_v47, %v8895_v31 }
 0x2da   : > { %v3772_v58 = vadd.f32 %v3771_v2, %v7776_v35  ;;  %v3615_v62 = vmul.f32 %v5176_v4, %v7762_v49  ;;  %v2336_v46 = vsub.f32 %v8896_v6, %v2304_v51  ;;  %v2528_v32 = vsub.f32 %v8897_v24, %v2304_v51 }
 0x2db   : > { %v5178_v14 = vpop.eup %5177  ;;  %v3263_v18 = vadd.f32 %v3231_v30, %v3071_v1  ;;  %v3391_v7 = vadd.f32 %v5174_v59, %v3199_v17  ;;  %v2720_v9 = vsub.f32 %v8898_v57, %v2304_v51  ;;  %v2912_v42 = vsub.f32 %v8899_v13, %v2304_v51 }
 0x2dc   : > { %v5180_v45 = vpop.eup %5179  ;;  %v7907_v37 = vadd.f32 %v3772_v58, %v7849_v36  ;;  %v2466_v40 = vmul.f32 %v5178_v14, %v8888_v27  ;;  %v2389_v35 = vmul.f32 1.442695, %v2336_v46  ;;  %v2581_v33 = vmul.f32 1.442695, %v2528_v32  ;;  %v8901_v32 = vld [vmem:[#allocation159_spill] sm:$0xff] }
 0x2dd   : > { %v5182_v49 = vpop.eup %5181  ;;  %v3455_v23 = vadd.f32 %v3423_v20, %v3263_v18  ;;  %v3583_v28 = vadd.f32 %v5176_v4, %v3391_v7  ;;  %v2626_v12 = vadd.f32 %v5180_v45, %v5178_v14  ;;  %v2658_v44 = vmul.f32 %v5180_v45, %v8889_v60  ;;  %v8900_v60 = vld [vmem:[#allocation150_spill] sm:$0xff]  ;;  %v8902_v14 = vld [vmem:[#allocation12_spill] sm:$0xff] }
 0x2de   : > { %v5184_v34 = vpop.eup %5183  ;;  %v7911_v56 = vmul.f32 %v5182_v49, %v3649_v61  ;;  %5193 = vpow2.f32 %v2389_v35  ;;  %v2773_v41 = vmul.f32 1.442695, %v2720_v9  ;;  %v2965_v43 = vmul.f32 1.442695, %v2912_v42  ;;  %v8903_v9 = vld [vmem:[#allocation101_spill] sm:$0xff]  ;;  %v8905_v35 = vld [vmem:[#allocation178_spill] sm:$0xff] }
 0x2df   : > { %v5186_v22 = vpop.eup %5185  ;;  %v3647_v36 = vadd.f32 %v3615_v62, %v3455_v23  ;;  %5195 = vrcp.f32 %v3583_v28  ;;  %v2690_v10 = vadd.f32 %v2658_v44, %v2466_v40  ;;  %v2818_v27 = vadd.f32 %v5184_v34, %v2626_v12  ;;  %v8906_v23 = vld [vmem:[#allocation161_spill] sm:$0xff] }
 0x2e0   : > { %v5188_v54 = vpop.eup %5187  ;;  %3745 = vst.msk [vmem:[%s7162_s27 + $0xb0] sm:$0xff] %vm365_vm0, %v7911_v56  ;;  %v2850_v39 = vmul.f32 %v5184_v34, %v8890_v52  ;;  %v3042_v19 = vmul.f32 %v5186_v22, %v8891_v63  ;;  %5197 = vpow2.f32 %v2581_v33  ;;  %v3104_v61 = vsub.f32 %v8900_v60, %v2304_v51 }
 0x2e1   : > { %v5190_v59 = vpop.eup %5189  ;;  %v3010_v2 = vadd.f32 %v5186_v22, %v2818_v27  ;;  %v3234_v30 = vmul.f32 %v5188_v54, %v8892_v48  ;;  %5199 = vpow2.f32 %v2773_v41  ;;  %v3296_v4 = vsub.f32 %v7829_v50, %v2304_v51  ;;  %v8907_v41 = vld [vmem:[#allocation70_spill] sm:$0xff]  ;;  %v8908_v22 = vld [vmem:[#allocation71_spill] sm:$0xff]  ;;  %v8909_v27 = vld [vmem:[#allocation72_spill] sm:$0xff] }
 0x2e2   : > { %v5192_v1 = vpop.eup %5191  ;;  %v2882_v17 = vadd.f32 %v2850_v39, %v2690_v10  ;;  %v3426_v20 = vmul.f32 %v5190_v59, %v7766_v3  ;;  %5201 = vpow2.f32 %v2965_v43  ;;  %v3157_v31 = vmul.f32 1.442695, %v3104_v61  ;;  %v8910_v61 = vld [vmem:[#allocation153_spill] sm:$0xff] }
 0x2e3   : > { %v3202_v58 = vadd.f32 %v5188_v54, %v3010_v2  ;;  %v3618_v52 = vmul.f32 %v5192_v1, %v7770_v53  ;;  %v3349_v63 = vmul.f32 1.442695, %v3296_v4  ;;  %v3488_v62 = vsub.f32 %v7887_v16, %v2304_v51  ;;  %v8904_v51 = vld [vmem:[#allocation177_spill] sm:$0xff]  ;;  %v8911_v2 = vld [vmem:[#allocation154_spill] sm:$0xff] }
 0x2e4   : > { %v3074_v46 = vadd.f32 %v3042_v19, %v2882_v17  ;;  %5203 = vpow2.f32 %v3157_v31  ;;  %v2277_v48 = vmax.f32 %v8901_v32, %v7898_v11  ;;  %v7928_v18 = vadd.f32 %v7883_v47, %v8902_v14 }
 0x2e5   : > { %v3394_v7 = vadd.f32 %v5190_v59, %v3202_v58  ;;  %5205 = vpow2.f32 %v3349_v63  ;;  %v3541_v3 = vmul.f32 1.442695, %v3488_v62  ;;  %v7932_v42 = vadd.f32 %v7883_v47, %v8903_v9 }
 0x2e6   : > { %v3266_v53 = vadd.f32 %v3234_v30, %v3074_v46  ;;  %v2309_v45 = vmax.f32 %v2277_v48, %v7928_v18  ;;  %v7937_v40 = vadd.f32 %v7883_v47, %v8904_v51  ;;  %v7941_v33 = vadd.f32 %v7883_v47, %v8905_v35 }
 0x2e7   : > { %v3586_v49 = vadd.f32 %v5192_v1, %v3394_v7  ;;  %5207 = vpow2.f32 %v3541_v3  ;;  %v2275_v28 = vmax.f32 %v8906_v23, %v7932_v42  ;;  %v7947_v12 = vadd.f32 %v7883_v47, %v7567_v25 }
 0x2e8   : > { %v5194_v44 = vpop.eup %5193  ;;  %v3458_v34 = vadd.f32 %v3426_v20, %v3266_v53  ;;  %v2341_v43 = vsub.f32 %v8907_v41, %v2309_v45  ;;  %v2533_v10 = vsub.f32 %v8908_v22, %v2309_v45  ;;  %v2725_v54 = vsub.f32 %v8909_v27, %v2309_v45 }
 0x2e9   : > { %v5196_v39 = vpop.eup %5195  ;;  %5209 = vrcp.f32 %v3586_v49  ;;  %v2464_v19 = vmul.f32 %v5194_v44, %v8896_v6  ;;  %v2917_v59 = vsub.f32 %v8910_v61, %v2309_v45  ;;  %v3109_v30 = vsub.f32 %v8911_v2, %v2309_v45 }
 0x2ea   : > { %v5198_v4 = vpop.eup %5197  ;;  %v3711_v25 = vmul.f32 %v5196_v39, %v3647_v36  ;;  %v3650_v1 = vadd.f32 %v3618_v52, %v3458_v34  ;;  %v2399_v17 = vmul.f32 1.442695, %v2341_v43  ;;  %v2591_v20 = vmul.f32 1.442695, %v2533_v10  ;;  %v8912_v10 = vld [vmem:[#allocation73_spill] sm:$0xff]  ;;  %v8913_v39 = vld [vmem:[#allocation74_spill] sm:$0xff] }
 0x2eb   : > { %v5200_v31 = vpop.eup %5199  ;;  %v2624_v58 = vadd.f32 %v5198_v4, %v5194_v44  ;;  %v2656_v63 = vmul.f32 %v5198_v4, %v8897_v24  ;;  %v2783_v62 = vmul.f32 1.442695, %v2725_v54  ;;  %v2975_v46 = vmul.f32 1.442695, %v2917_v59 }
 0x2ec   : > { %v5202_v32 = vpop.eup %5201  ;;  %3743 = vst.msk [vmem:[%s7162_s27 + $0xa0] sm:$0xff] %vm365_vm0, %v3711_v25  ;;  %v7959_v6 = vadd.f32 %v7907_v37, %v3711_v25  ;;  %v2848_v48 = vmul.f32 %v5200_v31, %v8898_v57  ;;  %5211 = vpow2.f32 %v2399_v17  ;;  %v3167_v14 = vmul.f32 1.442695, %v3109_v30  ;;  %v8915_v30 = vld [vmem:[#allocation155_spill] sm:$0xff] }
 0x2ed   : > { %v2688_v36 = vadd.f32 %v2656_v63, %v2464_v19  ;;  %v2816_v52 = vadd.f32 %v5200_v31, %v2624_v58  ;;  %v3040_v7 = vmul.f32 %v5202_v32, %v8899_v13  ;;  %5213 = vpow2.f32 %v2591_v20  ;;  %v8914_v19 = vld [vmem:[#allocation75_spill] sm:$0xff] }
 0x2ee   : > { %v5204_v3 = vpop.eup %5203  ;;  %5215 = vpow2.f32 %v2783_v62  ;;  %v3301_v24 = vsub.f32 %v7898_v11, %v2309_v45  ;;  %v3493_v9 = vsub.f32 %v7928_v18, %v2309_v45  ;;  %v2307_v53 = vmax.f32 %v2275_v28, %v7937_v40 }
 0x2ef   : > { %v5206_v51 = vpop.eup %5205  ;;  %v2880_v37 = vadd.f32 %v2848_v48, %v2688_v36  ;;  %v3008_v35 = vadd.f32 %v5202_v32, %v2816_v52  ;;  %v3232_v57 = vmul.f32 %v5204_v3, %v8900_v60  ;;  %5217 = vpow2.f32 %v2975_v46 }
 0x2f0   : > { %v3424_v49 = vmul.f32 %v5206_v51, %v7829_v50  ;;  %5219 = vpow2.f32 %v3167_v14  ;;  %v3359_v23 = vmul.f32 1.442695, %v3301_v24  ;;  %v3551_v13 = vmul.f32 1.442695, %v3493_v9 }
 0x2f1   : > { %v5208_v44 = vpop.eup %5207  ;;  %v3072_v34 = vadd.f32 %v3040_v7, %v2880_v37  ;;  %v3200_v43 = vadd.f32 %v5204_v3, %v3008_v35  ;;  %v2339_v54 = vsub.f32 %v8912_v10, %v2307_v53  ;;  %v2531_v45 = vsub.f32 %v8913_v39, %v2307_v53 }
 0x2f2   : > { %v3616_v28 = vmul.f32 %v5208_v44, %v7887_v16  ;;  %5221 = vpow2.f32 %v3359_v23  ;;  %v2723_v59 = vsub.f32 %v8914_v19, %v2307_v53  ;;  %v2915_v60 = vsub.f32 %v8915_v30, %v2307_v53  ;;  %v8916_v16 = vld [vmem:[#allocation156_spill] sm:$0xff] }
 0x2f3   : > { %v5210_v4 = vpop.eup %5209  ;;  %v3264_v50 = vadd.f32 %v3232_v57, %v3072_v34  ;;  %v3392_v25 = vadd.f32 %v5206_v51, %v3200_v43  ;;  %5223 = vpow2.f32 %v3551_v13  ;;  %v2395_v17 = vmul.f32 1.442695, %v2339_v54 }
 0x2f4   : > { %v7973_v20 = vmul.f32 %v5210_v4, %v3650_v1  ;;  %v2587_v31 = vmul.f32 1.442695, %v2531_v45  ;;  %v2779_v58 = vmul.f32 1.442695, %v2723_v59  ;;  %v2971_v63 = vmul.f32 1.442695, %v2915_v60 }
 0x2f5   : > { %v3456_v62 = vadd.f32 %v3424_v49, %v3264_v50  ;;  %v3584_v46 = vadd.f32 %v5208_v44, %v3392_v25  ;;  %5225 = vpow2.f32 %v2395_v17  ;;  %v3107_v32 = vsub.f32 %v8916_v16, %v2307_v53  ;;  %v8917_v1 = vld [vmem:[#allocation163_spill] sm:$0xff]  ;;  %v8920_v50 = vld [vmem:[#allocation80_spill] sm:$0xff] }
 0x2f6   : > { %v5212_v48 = vpop.eup %5211  ;;  %3746 = vst.msk [vmem:[%s7162_s27 + $0xb8] sm:$0xff] %vm365_vm0, %v7973_v20  ;;  %5227 = vpow2.f32 %v2587_v31  ;;  %v3299_v14 = vsub.f32 %v7932_v42, %v2307_v53  ;;  %v3491_v36 = vsub.f32 %v7937_v40, %v2307_v53  ;;  %v2278_v52 = vmax.f32 %v8917_v1, %v7941_v33  ;;  %v8922_v1 = vld [vmem:[#allocation160_spill] sm:$0xff] }
 0x2f7   : > { %v5214_v7 = vpop.eup %5213  ;;  %v3648_v3 = vadd.f32 %v3616_v28, %v3456_v62  ;;  %5229 = vrcp.f32 %v3584_v46  ;;  %v2469_v24 = vmul.f32 %v5212_v48, %v8907_v41  ;;  %v3163_v9 = vmul.f32 1.442695, %v3107_v32  ;;  %v8919_v28 = vld [vmem:[#allocation77_spill] sm:$0xff] }
 0x2f8   : > { %v5216_v51 = vpop.eup %5215  ;;  %v2629_v37 = vadd.f32 %v5214_v7, %v5212_v48  ;;  %v2661_v35 = vmul.f32 %v5214_v7, %v8908_v22  ;;  %5231 = vpow2.f32 %v2779_v58  ;;  %v3355_v57 = vmul.f32 1.442695, %v3299_v14  ;;  %v8918_v22 = vld [vmem:[#allocation76_spill] sm:$0xff] }
 0x2f9   : > { %v5218_v49 = vpop.eup %5217  ;;  %v2853_v23 = vmul.f32 %v5216_v51, %v8909_v27  ;;  %5233 = vpow2.f32 %v2971_v63  ;;  %v3547_v53 = vmul.f32 1.442695, %v3491_v36  ;;  %v7987_v13 = vmax.f32 %v2278_v52, %v7947_v12 }
 0x2fa   : > { %v5220_v44 = vpop.eup %5219  ;;  %v2693_v34 = vadd.f32 %v2661_v35, %v2469_v24  ;;  %v2821_v43 = vadd.f32 %v5216_v51, %v2629_v37  ;;  %v3045_v41 = vmul.f32 %v5218_v49, %v8910_v61  ;;  %5235 = vpow2.f32 %v3163_v9 }
 0x2fb   : > { %v3237_v54 = vmul.f32 %v5220_v44, %v8911_v2  ;;  %5237 = vpow2.f32 %v3355_v57  ;;  %v2342_v45 = vsub.f32 %v8918_v22, %v7987_v13  ;;  %v2534_v27 = vsub.f32 %v8919_v28, %v7987_v13  ;;  %v8921_v2 = vld [vmem:[#allocation157_spill] sm:$0xff] }
 0x2fc   : > { %v5222_v59 = vpop.eup %5221  ;;  %v2885_v60 = vadd.f32 %v2853_v23, %v2693_v34  ;;  %v3013_v4 = vadd.f32 %v5218_v49, %v2821_v43  ;;  %5239 = vpow2.f32 %v3547_v53  ;;  %v2726_v25 = vsub.f32 %v8920_v50, %v7987_v13 }
 0x2fd   : > { %v5224_v17 = vpop.eup %5223  ;;  %v3429_v61 = vmul.f32 %v5222_v59, %v7898_v11  ;;  %v2401_v31 = vmul.f32 1.442695, %v2342_v45  ;;  %v2593_v58 = vmul.f32 1.442695, %v2534_v27  ;;  %v2918_v63 = vsub.f32 %v8921_v2, %v7987_v13 }
 0x2fe   : > { %v3077_v62 = vadd.f32 %v3045_v41, %v2885_v60  ;;  %v3205_v46 = vadd.f32 %v5220_v44, %v3013_v4  ;;  %v3621_v32 = vmul.f32 %v5224_v17, %v7928_v18  ;;  %v2785_v48 = vmul.f32 1.442695, %v2726_v25 }
 0x2ff   : > { %v5226_v14 = vpop.eup %5225  ;;  %5241 = vpow2.f32 %v2401_v31  ;;  %v2977_v36 = vmul.f32 1.442695, %v2918_v63  ;;  %v3110_v52 = vsub.f32 %v8922_v1, %v7987_v13  ;;  %v3302_v7 = vsub.f32 %v7941_v33, %v7987_v13 }
 0x300   : > { %v5228_v11 = vpop.eup %5227  ;;  %v3269_v24 = vadd.f32 %v3237_v54, %v3077_v62  ;;  %v3397_v9 = vadd.f32 %v5222_v59, %v3205_v46  ;;  %v2467_v51 = vmul.f32 %v5226_v14, %v8912_v10  ;;  %5243 = vpow2.f32 %v2593_v58 }
 0x301   : > { %v5230_v37 = vpop.eup %5229  ;;  %v2627_v35 = vadd.f32 %v5228_v11, %v5226_v14  ;;  %v2659_v18 = vmul.f32 %v5228_v11, %v8913_v39  ;;  %5245 = vpow2.f32 %v2785_v48  ;;  %v3169_v57 = vmul.f32 1.442695, %v3110_v52 }
 0x302   : > { %v5232_v49 = vpop.eup %5231  ;;  %v3712_v23 = vmul.f32 %v5230_v37, %v3648_v3  ;;  %v3461_v53 = vadd.f32 %v3429_v61, %v3269_v24  ;;  %v3589_v44 = vadd.f32 %v5224_v17, %v3397_v9  ;;  %5247 = vpow2.f32 %v2977_v36 }
 0x303   : > { %v5234_v34 = vpop.eup %5233  ;;  %v2691_v43 = vadd.f32 %v2659_v18, %v2467_v51  ;;  %v2819_v41 = vadd.f32 %v5232_v49, %v2627_v35  ;;  %v2851_v54 = vmul.f32 %v5232_v49, %v8914_v19  ;;  %5249 = vpow2.f32 %v3169_v57  ;;  %v8924_v51 = vld [vmem:[#allocation78_spill] sm:$0xff]  ;;  %v8925_v35 = vld [vmem:[#allocation79_spill] sm:$0xff]  ;;  %v8926_v18 = vld [vmem:[#allocation81_spill] sm:$0xff] }
 0x304   : > { %v5236_v10 = vpop.eup %5235  ;;  %3744 = vst.msk [vmem:[%s7162_s27 + $0xa8] sm:$0xff] %vm365_vm0, %v3712_v23  ;;  %v3775_v45 = vadd.f32 %v7959_v6, %v3712_v23  ;;  %v3653_v27 = vadd.f32 %v3621_v32, %v3461_v53  ;;  %5251 = vrcp.f32 %v3589_v44  ;;  %v3043_v39 = vmul.f32 %v5234_v34, %v8915_v30 }
 0x305   : > { %v5238_v59 = vpop.eup %5237  ;;  %v2883_v3 = vadd.f32 %v2851_v54, %v2691_v43  ;;  %v3011_v60 = vadd.f32 %v5234_v34, %v2819_v41  ;;  %v3235_v4 = vmul.f32 %v5236_v10, %v8916_v16  ;;  %v3361_v25 = vmul.f32 1.442695, %v3302_v7 }
 0x306   : > { %v5240_v17 = vpop.eup %5239  ;;  %v3776_v61 = vadd.f32 %v3775_v45, %v7911_v56  ;;  %v3427_v19 = vmul.f32 %v5238_v59, %v7932_v42  ;;  %v3494_v31 = vsub.f32 %v7947_v12, %v7987_v13  ;;  %v8019_v6 = vadd.f32 %v7883_v47, %v7609_v0  ;;  %v8923_v56 = vld [vmem:[#allocation164_spill] sm:$0xff] }
 0x307   : > { %v3075_v58 = vadd.f32 %v3043_v39, %v2883_v3  ;;  %v3203_v30 = vadd.f32 %v5236_v10, %v3011_v60  ;;  %v3619_v63 = vmul.f32 %v5240_v17, %v7937_v40  ;;  %5253 = vpow2.f32 %v3361_v25  ;;  %v8927_v39 = vld [vmem:[#allocation158_spill] sm:$0xff] }
 0x308   : > { %v8023_v16 = vadd.f32 %v3776_v61, %v7973_v20  ;;  %v3553_v62 = vmul.f32 1.442695, %v3494_v31  ;;  %v2276_v46 = vmax.f32 %v8923_v56, %v8019_v6  ;;  %v8029_v42 = vadd.f32 %v7883_v47, %v7623_v21  ;;  %v8928_v3 = vld [vmem:[#allocation162_spill] sm:$0xff]  ;;  %v8929_v56 = vld [vmem:[#allocation171_spill] sm:$0xff] }
 0x309   : > { %v5242_v13 = vpop.eup %5241  ;;  %v3267_v32 = vadd.f32 %v3235_v4, %v3075_v58  ;;  %v3395_v0 = vadd.f32 %v5238_v59, %v3203_v30  ;;  %v8033_v48 = vadd.f32 %v7883_v47, %v7670_v5  ;;  %v8037_v40 = vadd.f32 %v7883_v47, %v7672_v8 }
 0x30a   : > { %v5244_v20 = vpop.eup %5243  ;;  %v2470_v14 = vmul.f32 %v5242_v13, %v8918_v22  ;;  %5255 = vpow2.f32 %v3553_v62  ;;  %v2308_v36 = vmax.f32 %v2276_v46, %v8029_v42  ;;  %v8043_v21 = vadd.f32 %v7883_v47, %v7691_v15 }
 0x30b   : > { %v5246_v52 = vpop.eup %5245  ;;  %v3459_v7 = vadd.f32 %v3427_v19, %v3267_v32  ;;  %v3587_v11 = vadd.f32 %v5240_v17, %v3395_v0  ;;  %v2630_v24 = vadd.f32 %v5244_v20, %v5242_v13  ;;  %v2662_v5 = vmul.f32 %v5244_v20, %v8919_v28  ;;  %v8930_v13 = vld [vmem:[#allocation173_spill] sm:$0xff] }
 0x30c   : > { %v5248_v9 = vpop.eup %5247  ;;  %v2854_v8 = vmul.f32 %v5246_v52, %v8920_v50  ;;  %v2340_v37 = vsub.f32 %v8924_v51, %v2308_v36  ;;  %v2532_v22 = vsub.f32 %v8925_v35, %v2308_v36  ;;  %v2724_v57 = vsub.f32 %v8926_v18, %v2308_v36 }
 0x30d   : > { %v5250_v49 = vpop.eup %5249  ;;  %v3651_v23 = vadd.f32 %v3619_v63, %v3459_v7  ;;  %5257 = vrcp.f32 %v3587_v11  ;;  %v2694_v15 = vadd.f32 %v2662_v5, %v2470_v14  ;;  %v2822_v53 = vadd.f32 %v5246_v52, %v2630_v24  ;;  %v8931_v7 = vld [vmem:[#allocation179_spill] sm:$0xff] }
 0x30e   : > { %v5252_v44 = vpop.eup %5251  ;;  %v3046_v34 = vmul.f32 %v5248_v9, %v8921_v2  ;;  %v3238_v28 = vmul.f32 %v5250_v49, %v8922_v1  ;;  %v2397_v43 = vmul.f32 1.442695, %v2340_v37  ;;  %v2589_v41 = vmul.f32 1.442695, %v2532_v22  ;;  %v8933_v22 = vld [vmem:[#allocation83_spill] sm:$0xff] }
 0x30f   : > { %v8052_v50 = vmul.f32 %v5252_v44, %v3653_v27  ;;  %v2886_v54 = vadd.f32 %v2854_v8, %v2694_v15  ;;  %v3014_v10 = vadd.f32 %v5248_v9, %v2822_v53  ;;  %v2781_v45 = vmul.f32 1.442695, %v2724_v57  ;;  %v8932_v8 = vld [vmem:[#allocation82_spill] sm:$0xff]  ;;  %v8935_v53 = vld [vmem:[#allocation165_spill] sm:$0xff] }
 0x310   : > { %5259 = vpow2.f32 %v2397_v43  ;;  %v2916_v59 = vsub.f32 %v8927_v39, %v2308_v36  ;;  %v3108_v60 = vsub.f32 %v8928_v3, %v2308_v36  ;;  %v3300_v4 = vsub.f32 %v8019_v6, %v2308_v36 }
 0x311   : > { %v5254_v25 = vpop.eup %5253  ;;  %3749 = vst.msk [vmem:[%s7162_s27 + $0xd0] sm:$0xff] %vm365_vm0, %v8052_v50  ;;  %v3078_v2 = vadd.f32 %v3046_v34, %v2886_v54  ;;  %v3206_v1 = vadd.f32 %v5250_v49, %v3014_v10  ;;  %5261 = vpow2.f32 %v2589_v41  ;;  %v3492_v27 = vsub.f32 %v8029_v42, %v2308_v36  ;;  %v8934_v49 = vld [vmem:[#allocation84_spill] sm:$0xff]  ;;  %v8936_v34 = vld [vmem:[#allocation166_spill] sm:$0xff] }
 0x312   : > { %v3430_v17 = vmul.f32 %v5254_v25, %v7941_v33  ;;  %5263 = vpow2.f32 %v2781_v45  ;;  %v2973_v61 = vmul.f32 1.442695, %v2916_v59  ;;  %v3165_v19 = vmul.f32 1.442695, %v3108_v60 }
 0x313   : > { %v3270_v31 = vadd.f32 %v3238_v28, %v3078_v2  ;;  %v3398_v58 = vadd.f32 %v5254_v25, %v3206_v1  ;;  %v3357_v30 = vmul.f32 1.442695, %v3300_v4  ;;  %v3549_v63 = vmul.f32 1.442695, %v3492_v27 }
 0x314   : > { %v5256_v62 = vpop.eup %5255  ;;  %5265 = vpow2.f32 %v2973_v61  ;;  %v2281_v46 = vmax.f32 %v8929_v56, %v8033_v48  ;;  %v2279_v32 = vmax.f32 %v8930_v13, %v8043_v21  ;;  %v8068_v0 = vadd.f32 %v7883_v47, %v7693_v29  ;;  %v8937_v61 = vld [vmem:[#allocation85_spill] sm:$0xff] }
 0x315   : > { %v3462_v33 = vadd.f32 %v3430_v17, %v3270_v31  ;;  %v3590_v20 = vadd.f32 %v5256_v62, %v3398_v58  ;;  %v3622_v14 = vmul.f32 %v5256_v62, %v7947_v12  ;;  %5267 = vpow2.f32 %v3165_v19 }
 0x316   : > { %5269 = vpow2.f32 %v3357_v30  ;;  %v2313_v36 = vmax.f32 %v2281_v46, %v8037_v40  ;;  %v8073_v52 = vmax.f32 %v2279_v32, %v8068_v0  ;;  %v8077_v11 = vadd.f32 %v7883_v47, %v8931_v7  ;;  %v8939_v46 = vld [vmem:[#allocation87_spill] sm:$0xff] }
 0x317   : > { %v5258_v24 = vpop.eup %5257  ;;  %v3654_v5 = vadd.f32 %v3622_v14, %v3462_v33  ;;  %5271 = vrcp.f32 %v3590_v20  ;;  %v8081_v29 = vadd.f32 %v7883_v47, %v7729_v26  ;;  %v8085_v12 = vadd.f32 %v7883_v47, %v7781_v55 }
 0x318   : > { %v3715_v9 = vmul.f32 %v5258_v24, %v3651_v23  ;;  %5273 = vpow2.f32 %v3549_v63  ;;  %v2345_v37 = vsub.f32 %v8932_v8, %v2313_v36  ;;  %v2537_v57 = vsub.f32 %v8933_v22, %v2313_v36 }
 0x319   : > { %v2729_v15 = vsub.f32 %v8934_v49, %v2313_v36  ;;  %v2921_v44 = vsub.f32 %v8935_v53, %v2313_v36  ;;  %v3113_v28 = vsub.f32 %v8936_v34, %v2313_v36  ;;  %v3305_v43 = vsub.f32 %v8033_v48, %v2313_v36 }
 0x31a   : > { %v5260_v26 = vpop.eup %5259  ;;  %3747 = vst.msk [vmem:[%s7162_s27 + $0xc0] sm:$0xff] %vm365_vm0, %v3715_v9  ;;  %v8096_v55 = vadd.f32 %v8023_v16, %v3715_v9  ;;  %v2407_v23 = vmul.f32 1.442695, %v2345_v37  ;;  %v2599_v41 = vmul.f32 1.442695, %v2537_v57  ;;  %v3497_v54 = vsub.f32 %v8037_v40, %v2313_v36 }
 0x31b   : > { %v5262_v10 = vpop.eup %5261  ;;  %v2468_v45 = vmul.f32 %v5260_v26, %v8924_v51  ;;  %v2791_v59 = vmul.f32 1.442695, %v2729_v15  ;;  %v2983_v60 = vmul.f32 1.442695, %v2921_v44  ;;  %v3175_v4 = vmul.f32 1.442695, %v3113_v28 }
 0x31c   : > { %v5264_v25 = vpop.eup %5263  ;;  %v2628_v2 = vadd.f32 %v5262_v10, %v5260_v26  ;;  %v2660_v1 = vmul.f32 %v5262_v10, %v8925_v35  ;;  %5275 = vpow2.f32 %v2407_v23  ;;  %v3367_v27 = vmul.f32 1.442695, %v3305_v43  ;;  %v8938_v51 = vld [vmem:[#allocation86_spill] sm:$0xff]  ;;  %v8940_v44 = vld [vmem:[#allocation167_spill] sm:$0xff]  ;;  %v8941_v28 = vld [vmem:[#allocation168_spill] sm:$0xff] }
 0x31d   : > { %v2852_v17 = vmul.f32 %v5264_v25, %v8926_v18  ;;  %5277 = vpow2.f32 %v2599_v41  ;;  %v3559_v16 = vmul.f32 1.442695, %v3497_v54  ;;  %v2343_v19 = vsub.f32 %v8937_v61, %v8073_v52 }
 0x31e   : > { %v5266_v31 = vpop.eup %5265  ;;  %v2692_v58 = vadd.f32 %v2660_v1, %v2468_v45  ;;  %v2820_v30 = vadd.f32 %v5264_v25, %v2628_v2  ;;  %5279 = vpow2.f32 %v2791_v59  ;;  %v2535_v63 = vsub.f32 %v8938_v51, %v8073_v52 }
 0x31f   : > { %v5268_v62 = vpop.eup %5267  ;;  %v3044_v56 = vmul.f32 %v5266_v31, %v8927_v39  ;;  %5281 = vpow2.f32 %v2983_v60  ;;  %v2403_v35 = vmul.f32 1.442695, %v2343_v19  ;;  %v2727_v18 = vsub.f32 %v8939_v46, %v8073_v52  ;;  %v8942_v60 = vld [vmem:[#allocation175_spill] sm:$0xff] }
 0x320   : > { %v5270_v13 = vpop.eup %5269  ;;  %v2884_v32 = vadd.f32 %v2852_v17, %v2692_v58  ;;  %v3012_v33 = vadd.f32 %v5266_v31, %v2820_v30  ;;  %v3236_v20 = vmul.f32 %v5268_v62, %v8928_v3  ;;  %5283 = vpow2.f32 %v3175_v4 }
 0x321   : > { %v5272_v14 = vpop.eup %5271  ;;  %v3428_v36 = vmul.f32 %v5270_v13, %v8019_v6  ;;  %5285 = vpow2.f32 %v3367_v27  ;;  %v2595_v7 = vmul.f32 1.442695, %v2535_v63  ;;  %v2787_v24 = vmul.f32 1.442695, %v2727_v18  ;;  %v8943_v27 = vld [vmem:[#allocation176_spill] sm:$0xff] }
 0x322   : > { %v5274_v9 = vpop.eup %5273  ;;  %v8111_v39 = vmul.f32 %v5272_v14, %v3654_v5  ;;  %v3076_v37 = vadd.f32 %v3044_v56, %v2884_v32  ;;  %v3204_v57 = vadd.f32 %v5268_v62, %v3012_v33  ;;  %5287 = vpow2.f32 %v3559_v16  ;;  %v8945_v33 = vld [vmem:[#allocation89_spill] sm:$0xff] }
 0x323   : > { %v3620_v15 = vmul.f32 %v5274_v9, %v8029_v42  ;;  %5289 = vpow2.f32 %v2403_v35  ;;  %v2919_v3 = vsub.f32 %v8940_v44, %v8073_v52  ;;  %v3111_v43 = vsub.f32 %v8941_v28, %v8073_v52 }
 0x324   : > { %3750 = vst.msk [vmem:[%s7162_s27 + $0xd8] sm:$0xff] %vm365_vm0, %v8111_v39  ;;  %v3268_v6 = vadd.f32 %v3236_v20, %v3076_v37  ;;  %v3396_v26 = vadd.f32 %v5270_v13, %v3204_v57  ;;  %5291 = vpow2.f32 %v2595_v7  ;;  %v3303_v5 = vsub.f32 %v8043_v21, %v8073_v52  ;;  %v8946_v7 = vld [vmem:[#allocation92_spill] sm:$0xff]  ;;  %v8947_v57 = vld [vmem:[#allocation169_spill] sm:$0xff] }
 0x325   : > { %5293 = vpow2.f32 %v2787_v24  ;;  %v2979_v23 = vmul.f32 1.442695, %v2919_v3  ;;  %v3171_v41 = vmul.f32 1.442695, %v3111_v43  ;;  %v3495_v42 = vsub.f32 %v8068_v0, %v8073_v52 }
 0x326   : > { %v5276_v54 = vpop.eup %5275  ;;  %v3460_v10 = vadd.f32 %v3428_v36, %v3268_v6  ;;  %v3588_v45 = vadd.f32 %v5274_v9, %v3396_v26  ;;  %v3363_v59 = vmul.f32 1.442695, %v3303_v5  ;;  %v2282_v4 = vmax.f32 %v8942_v60, %v8077_v11 }
 0x327   : > { %v5278_v25 = vpop.eup %5277  ;;  %v2473_v2 = vmul.f32 %v5276_v54, %v8932_v8  ;;  %5295 = vpow2.f32 %v2979_v23  ;;  %v3555_v1 = vmul.f32 1.442695, %v3495_v42  ;;  %v2280_v17 = vmax.f32 %v8943_v27, %v8085_v12 }
 0x328   : > { %v5280_v16 = vpop.eup %5279  ;;  %v3652_v19 = vadd.f32 %v3620_v15, %v3460_v10  ;;  %5297 = vrcp.f32 %v3588_v45  ;;  %v2633_v31 = vadd.f32 %v5278_v25, %v5276_v54  ;;  %v2665_v52 = vmul.f32 %v5278_v25, %v8933_v22 }
 0x329   : > { %v5282_v58 = vpop.eup %5281  ;;  %v2857_v30 = vmul.f32 %v5280_v16, %v8934_v49  ;;  %5299 = vpow2.f32 %v3171_v41  ;;  %v8133_v63 = vmax.f32 %v2282_v4, %v8081_v29  ;;  %v8137_v8 = vadd.f32 %v7883_v47, %v7783_v38  ;;  %v8944_v49 = vld [vmem:[#allocation88_spill] sm:$0xff] }
 0x32a   : > { %v5284_v62 = vpop.eup %5283  ;;  %v2697_v56 = vadd.f32 %v2665_v52, %v2473_v2  ;;  %v2825_v35 = vadd.f32 %v5280_v16, %v2633_v31  ;;  %v3049_v18 = vmul.f32 %v5282_v58, %v8935_v53  ;;  %5301 = vpow2.f32 %v3363_v59  ;;  %v8948_v4 = vld [vmem:[#allocation172_spill] sm:$0xff] }
 0x32b   : > { %v5286_v13 = vpop.eup %5285  ;;  %v3241_v22 = vmul.f32 %v5284_v62, %v8936_v34  ;;  %5303 = vpow2.f32 %v3555_v1  ;;  %v2346_v32 = vsub.f32 %v8944_v49, %v8133_v63  ;;  %v2538_v20 = vsub.f32 %v8945_v33, %v8133_v63 }
 0x32c   : > { %v5288_v14 = vpop.eup %5287  ;;  %v2889_v36 = vadd.f32 %v2857_v30, %v2697_v56  ;;  %v3017_v38 = vadd.f32 %v5282_v58, %v2825_v35  ;;  %v3433_v47 = vmul.f32 %v5286_v13, %v8033_v48  ;;  %v2730_v24 = vsub.f32 %v8946_v7, %v8133_v63 }
 0x32d   : > { %v5290_v53 = vpop.eup %5289  ;;  %v3625_v9 = vmul.f32 %v5288_v14, %v8037_v40  ;;  %v2409_v37 = vmul.f32 1.442695, %v2346_v32  ;;  %v2601_v34 = vmul.f32 1.442695, %v2538_v20  ;;  %v2922_v15 = vsub.f32 %v8947_v57, %v8133_v63 }
 0x32e   : > { %v5292_v3 = vpop.eup %5291  ;;  %v3081_v43 = vadd.f32 %v3049_v18, %v2889_v36  ;;  %v3209_v6 = vadd.f32 %v5284_v62, %v3017_v38  ;;  %v2471_v26 = vmul.f32 %v5290_v53, %v8937_v61  ;;  %v2793_v5 = vmul.f32 1.442695, %v2730_v24 }
 0x32f   : > { %v5294_v23 = vpop.eup %5293  ;;  %v2631_v41 = vadd.f32 %v5292_v3, %v5290_v53  ;;  %v2663_v48 = vmul.f32 %v5292_v3, %v8938_v51  ;;  %5305 = vpow2.f32 %v2409_v37  ;;  %v2985_v42 = vmul.f32 1.442695, %v2922_v15  ;;  %v8951_v3 = vld [vmem:[#allocation93_spill] sm:$0xff] }
 0x330   : > { %v3273_v54 = vadd.f32 %v3241_v22, %v3081_v43  ;;  %v3401_v10 = vadd.f32 %v5286_v13, %v3209_v6  ;;  %v2855_v40 = vmul.f32 %v5294_v23, %v8939_v46  ;;  %5307 = vpow2.f32 %v2601_v34 }
 0x331   : > { %v5296_v45 = vpop.eup %5295  ;;  %v2695_v59 = vadd.f32 %v2663_v48, %v2471_v26  ;;  %v2823_v60 = vadd.f32 %v5294_v23, %v2631_v41  ;;  %5309 = vpow2.f32 %v2793_v5  ;;  %v3114_v25 = vsub.f32 %v8948_v4, %v8133_v63 }
 0x332   : > { %v5298_v61 = vpop.eup %5297  ;;  %v3465_v2 = vadd.f32 %v3433_v47, %v3273_v54  ;;  %v3593_v1 = vadd.f32 %v5288_v14, %v3401_v10  ;;  %v3047_v51 = vmul.f32 %v5296_v45, %v8940_v44  ;;  %5311 = vpow2.f32 %v2985_v42  ;;  %v8952_v10 = vld [vmem:[#allocation170_spill] sm:$0xff] }
 0x333   : > { %v5300_v16 = vpop.eup %5299  ;;  %v3716_v31 = vmul.f32 %v5298_v61, %v3652_v19  ;;  %v2887_v52 = vadd.f32 %v2855_v40, %v2695_v59  ;;  %v3015_v58 = vadd.f32 %v5296_v45, %v2823_v60  ;;  %v3177_v46 = vmul.f32 1.442695, %v3114_v25  ;;  %v8953_v59 = vld [vmem:[#allocation174_spill] sm:$0xff] }
 0x334   : > { %v5302_v30 = vpop.eup %5301  ;;  %v3657_v62 = vadd.f32 %v3625_v9, %v3465_v2  ;;  %5313 = vrcp.f32 %v3593_v1  ;;  %v3239_v56 = vmul.f32 %v5300_v16, %v8941_v28  ;;  %v3306_v35 = vsub.f32 %v8077_v11, %v8133_v63  ;;  %v8949_v9 = vld [vmem:[#allocation90_spill] sm:$0xff] }
 0x335   : > { %v5304_v18 = vpop.eup %5303  ;;  %3748 = vst.msk [vmem:[%s7162_s27 + $0xc8] sm:$0xff] %vm365_vm0, %v3716_v31  ;;  %v3779_v13 = vadd.f32 %v8096_v55, %v3716_v31  ;;  %v3079_v44 = vadd.f32 %v3047_v51, %v2887_v52  ;;  %v3207_v22 = vadd.f32 %v5300_v16, %v3015_v58  ;;  %v3431_v19 = vmul.f32 %v5302_v30, %v8043_v21 }
 0x336   : > { %v3623_v32 = vmul.f32 %v5304_v18, %v8068_v0  ;;  %5315 = vpow2.f32 %v3177_v46  ;;  %v3369_v20 = vmul.f32 1.442695, %v3306_v35  ;;  %v3498_v14 = vsub.f32 %v8081_v29, %v8133_v63 }
 0x337   : > { %v3780_v28 = vadd.f32 %v3779_v13, %v8052_v50  ;;  %v3271_v36 = vadd.f32 %v3239_v56, %v3079_v44  ;;  %v3399_v38 = vadd.f32 %v5302_v30, %v3207_v22  ;;  %v2312_v55 = vmax.f32 %v2280_v17, %v8137_v8  ;;  %v8950_v50 = vld [vmem:[#allocation91_spill] sm:$0xff] }
 0x338   : > { %5317 = vpow2.f32 %v3369_v20  ;;  %v3561_v47 = vmul.f32 1.442695, %v3498_v14 }
 0x339   : > { %v5306_v24 = vpop.eup %5305  ;;  %v3463_v21 = vadd.f32 %v3431_v19, %v3271_v36  ;;  %v3591_v53 = vadd.f32 %v5304_v18, %v3399_v38  ;;  %v3781_v0 = vadd.f32 %v3780_v28, %v8111_v39  ;;  %v2344_v37 = vsub.f32 %v8949_v9, %v2312_v55 }
 0x33a   : > { %v5308_v34 = vpop.eup %5307  ;;  %v2474_v63 = vmul.f32 %v5306_v24, %v8944_v49  ;;  %5319 = vpow2.f32 %v3561_v47  ;;  %v2536_v15 = vsub.f32 %v8950_v50, %v2312_v55  ;;  %v2728_v43 = vsub.f32 %v8951_v3, %v2312_v55 }
 0x33b   : > { %v5310_v6 = vpop.eup %5309  ;;  %v3655_v27 = vadd.f32 %v3623_v32, %v3463_v21  ;;  %5321 = vrcp.f32 %v3591_v53  ;;  %v2634_v17 = vadd.f32 %v5308_v34, %v5306_v24  ;;  %v2666_v26 = vmul.f32 %v5308_v34, %v8945_v33 }
 0x33c   : > { %v5312_v5 = vpop.eup %5311  ;;  %v2858_v23 = vmul.f32 %v5310_v6, %v8946_v7  ;;  %v2405_v39 = vmul.f32 1.442695, %v2344_v37  ;;  %v2597_v41 = vmul.f32 1.442695, %v2536_v15  ;;  %v2789_v48 = vmul.f32 1.442695, %v2728_v43 }
 0x33d   : > { %v2698_v42 = vadd.f32 %v2666_v26, %v2474_v63  ;;  %v2826_v54 = vadd.f32 %v5310_v6, %v2634_v17  ;;  %v3050_v49 = vmul.f32 %v5312_v5, %v8947_v57  ;;  %v2920_v40 = vsub.f32 %v8952_v10, %v2312_v55 }
 0x33e   : > { %v5314_v45 = vpop.eup %5313  ;;  %5323 = vpow2.f32 %v2405_v39  ;;  %v3112_v60 = vsub.f32 %v8953_v59, %v2312_v55  ;;  %v3304_v25 = vsub.f32 %v8085_v12, %v2312_v55  ;;  %v3496_v33 = vsub.f32 %v8137_v8, %v2312_v55 }
 0x33f   : > { %v8184_v61 = vmul.f32 %v5314_v45, %v3657_v62  ;;  %v2890_v7 = vadd.f32 %v2858_v23, %v2698_v42  ;;  %v3018_v2 = vadd.f32 %v5312_v5, %v2826_v54  ;;  %5325 = vpow2.f32 %v2597_v41 }
 0x340   : > { %v5316_v1 = vpop.eup %5315  ;;  %5327 = vpow2.f32 %v2789_v48  ;;  %v2981_v51 = vmul.f32 1.442695, %v2920_v40  ;;  %v3173_v57 = vmul.f32 1.442695, %v3112_v60  ;;  %v3365_v16 = vmul.f32 1.442695, %v3304_v25 }
 0x341   : > { %3753 = vst.msk [vmem:[%s7162_s27 + $0xf0] sm:$0xff] %vm365_vm0, %v8184_v61  ;;  %v3082_v31 = vadd.f32 %v3050_v49, %v2890_v7  ;;  %v3210_v52 = vadd.f32 %v5316_v1, %v3018_v2  ;;  %v3242_v58 = vmul.f32 %v5316_v1, %v8948_v4  ;;  %v3557_v46 = vmul.f32 1.442695, %v3496_v33 }
 0x342   : > { %v5318_v30 = vpop.eup %5317  ;;  %5329 = vpow2.f32 %v2981_v51 }
 0x343   : > { %v3274_v62 = vadd.f32 %v3242_v58, %v3082_v31  ;;  %v3402_v56 = vadd.f32 %v5318_v30, %v3210_v52  ;;  %v3434_v35 = vmul.f32 %v5318_v30, %v8077_v11  ;;  %5331 = vpow2.f32 %v3173_v57 }
 0x344   : > { %v5320_v18 = vpop.eup %5319  ;;  %5333 = vpow2.f32 %v3365_v16 }
 0x345   : > { %v5322_v13 = vpop.eup %5321  ;;  %v3466_v44 = vadd.f32 %v3434_v35, %v3274_v62  ;;  %v3594_v22 = vadd.f32 %v5320_v18, %v3402_v56  ;;  %v3626_v19 = vmul.f32 %v5320_v18, %v8081_v29  ;;  %5335 = vpow2.f32 %v3557_v46 }
 0x346   : > { %v3719_v32 = vmul.f32 %v5322_v13, %v3655_v27 }
 0x347   : > { %v3658_v20 = vadd.f32 %v3626_v19, %v3466_v44  ;;  %5337 = vrcp.f32 %v3594_v22 }
 0x348   : > { %v5324_v4 = vpop.eup %5323  ;;  %3751 = vst.msk [vmem:[%s7162_s27 + $0xe0] sm:$0xff] %vm365_vm0, %v3719_v32  ;;  %v3782_v14 = vadd.f32 %v3781_v0, %v3719_v32 }
 0x349   : > { %v5326_v28 = vpop.eup %5325  ;;  %v2472_v36 = vmul.f32 %v5324_v4, %v8949_v9 }
 0x34a   : > { %v5328_v11 = vpop.eup %5327  ;;  %v2632_v38 = vadd.f32 %v5326_v28, %v5324_v4  ;;  %v2664_v55 = vmul.f32 %v5326_v28, %v8950_v50 }
 0x34b   : > { %v2856_v47 = vmul.f32 %v5328_v11, %v8951_v3 }
 0x34c   : > { %v5330_v24 = vpop.eup %5329  ;;  %v2696_v21 = vadd.f32 %v2664_v55, %v2472_v36  ;;  %v2824_v29 = vadd.f32 %v5328_v11, %v2632_v38 }
 0x34d   : > { %v5332_v53 = vpop.eup %5331  ;;  %v3048_v37 = vmul.f32 %v5330_v24, %v8952_v10 }
 0x34e   : > { %v5334_v34 = vpop.eup %5333  ;;  %v2888_v63 = vadd.f32 %v2856_v47, %v2696_v21  ;;  %v3016_v15 = vadd.f32 %v5330_v24, %v2824_v29  ;;  %v3240_v0 = vmul.f32 %v5332_v53, %v8953_v59 }
 0x34f   : > { %v5336_v9 = vpop.eup %5335  ;;  %v3432_v43 = vmul.f32 %v5334_v34, %v8085_v12 }
 0x350   : > { %v3080_v50 = vadd.f32 %v3048_v37, %v2888_v63  ;;  %v3208_v6 = vadd.f32 %v5332_v53, %v3016_v15  ;;  %v3624_v3 = vmul.f32 %v5336_v9, %v8137_v8 }
 0x351   : > { %v5338_v27 = vpop.eup %5337 }
 0x352   : > { %v3722_v17 = vmul.f32 %v5338_v27, %v3658_v20  ;;  %v3272_v26 = vadd.f32 %v3240_v0, %v3080_v50  ;;  %v3400_v5 = vadd.f32 %v5334_v34, %v3208_v6 }
 0x354   : > { %3754 = vst.msk [vmem:[%s7162_s27 + $0xf8] sm:$0xff] %vm365_vm0, %v3722_v17  ;;  %v3464_v23 = vadd.f32 %v3432_v43, %v3272_v26  ;;  %v3592_v39 = vadd.f32 %v5336_v9, %v3400_v5 }
 0x356   : > { %v3656_v41 = vadd.f32 %v3624_v3, %v3464_v23  ;;  %5339 = vrcp.f32 %v3592_v39 }
 0x360   : > { %v5340_v12 = vpop.eup %5339 }
 0x361   : > { %v3720_v8 = vmul.f32 %v5340_v12, %v3656_v41 }
 0x363   : > { %3752 = vst.msk [vmem:[%s7162_s27 + $0xe8] sm:$0xff] %vm365_vm0, %v3720_v8  ;;  %v3783_v48 = vadd.f32 %v3782_v14, %v3720_v8 }
 0x364   : > { %5387 = shalt.err (!%p5384_p4)
}
 0x365   : > { %s5388_s27 = scalar_lea.hbm %s8208_s25, 4096  ;;  %s5392_s7 = scalar_lea.hbm %s8270_s3, 8192 }
 0x366   : > { %p5389_p6 = scmp.ne.s32.totalorder %s8208_s25, %s5388_s27  ;;  %p5393_p12 = scmp.lt.u32.totalorder %s8208_s25, %s8270_s3 }
 0x367   : > { %p5394_p1 = scmp.lt.u32.totalorder %s5392_s7, %s5388_s27  ;;  %p5396_p8 = scmp.lt.u32.totalorder %s5388_s27, %s8208_s25 }
 0x368   : > { %p5390_p7 = pnand %p5389_p6, %p8954_p9 }
 0x369   : > { %p5395_p3 = por %p5394_p1, %p5393_p12 }
 0x36a   : > { %p5391_p10 = pneg %p5390_p7 }
 0x36b   : > { %p5397_p11 = por %p5396_p8, %p5395_p3 }
 0x36d   : > { %p5398_p0 = pnand %p5397_p11, %p5391_p10 }
 0x36f   : > { %5401 = shalt.err (!%p5398_p0)
}
 0x370   : > { %s5462_s21 = smov 128   ;;  %s5463_s24 = smov 8   ;;  %v3784_v42 = vadd.f32 %v3783_v48, %v8184_v61 }
 0x371   : > { %4758 = dma.vmem_to_hbm [thread:$0]  (%p8954_p9), %s8210_s12, 4096, %s8208_s25, %s3794_s26, %s5462_s21, %s5462_s21, %s5463_s24  }
 0x372   : > { %v3785_v54 = vadd.f32 %v3784_v42, %v3722_v17  ;;  %p247_p5 = scmp.lt.s32.totalorder %s5448_s18, 1 }
 0x374   : > { %v3786_v49 = vrot.slane %v3785_v54, 4  ;;  %s8965_s18 = smov (!%p247_p5, %s5448_s18), 1 }
 0x375   : > { %s252_s13 = scalar_lea.vmem %s8271_s4, %s8965_s18 }
 0x376   : > { %v3787_v10 = vadd.f32 %v3786_v49, %v3785_v54 }
 0x378   : > { %v3788_v40 = vrot.slane %v3787_v10, 2 }
 0x37a   : > { %v3789_v45 = vadd.f32 %v3788_v40, %v3787_v10 }
 0x37c   : > { %v3790_v59 = vrot.slane %v3789_v45, 1 }
 0x37e   : > { %v3791_v60 = vadd.f32 %v3790_v59, %v3789_v45 }
 0x380   : > { %3792 = vst [vmem:[%s252_s13] sm:$0x1] %v3791_v60 }
 0x381 PF: > { %s3833_s28 = sand.u32 1, %s5436_s15   ;;  %p8955_p9 = scmp.ne.s32.totalorder %s8563_s30, 0 }
 0x382   : > { %p8956_p13 = scmp.ge.s32.totalorder %s5456_s20, 2  ;;  %s3834_s22 = scalar_lea.sflag [#allocation4], %s3833_s28 }
 0x384   : > { %p4765_p2 = pnand %p8956_p13, %p8955_p9 }
 0x386   : > { %5431 = dma.done.wait (!%p4765_p2), %s3834_s22, 4096  }
 0x387   : > { %5433 = vsyncadd (!%p4765_p2), %s3834_s22, 4294963200  ;;  %s21_s20 = sadd.s32 1, %s5456_s20   ;;  %s8957_s15 = smov %s5440_s16 }
 0x388   : > { %p18_p4 = scmp.ge.s32.totalorder %s21_s20, 4   ;;  %s8958_s16 = smov %s5444_s17 }
 0x389   : > { %s8959_s17 = smov %s5545_s29  ;;  %s8960_s18 = smov %s5452_s19 }
 0x38a   : > { %s8961_s19 = smov %s8963_s23  ;;  %20 = sbr.rel (!%p18_p4) target bundleno = 6 (0x6), region = 95 }
 0x391   :  { %3848 = vsyncpa [#allocation3], 1 }
 0x392   :  { %3850 = vsyncpa [#allocation3 + $0x1], 1 }
 0x393   :  { %3851 = vsyncpa [#allocation4], 1 }
 0x394   :  { %3853 = vsyncpa [#allocation4 + $0x1], 1 }

</bundles_post_ra>
